<compile_context>
chip_gen: v5e
topology: v5e:2x2
jax: 0.10.0
libtpu: 0.0.40
codegen_flags: <defaults>
</compile_context>

<pallas_src>
import functools

import jax
import jax.numpy as jnp
from jax import lax
from jax.experimental import pallas as pl
from jax.experimental.pallas import tpu as pltpu

START_TIME = 0.0
END_TIME = 1.0
_ENERGY_LANES = 128  # lane width of the per-tile energy-partial output block


def _round_up(a: int, b: int) -> int:
    return (a + b - 1) // b * b


# ------------------------------- Pallas kernel -------------------------------
def _cnf_forward_kernel(
    xt_ref,      # VMEM (D+1, TILE_N)  rows 0..D-1 = x^T, row D = t  (lane-dense batch axis)
    r_ref,       # VMEM (1, TILE_N)    ratio
    w1t_ref,     # VMEM (H, D+1)       W1^T (t column folded in)      (resident across tiles)
    b1_ref,      # VMEM (H, 1)                                         (resident)
    w2t_ref,     # VMEM (D, H)         W2^T                            (resident)
    b2_ref,      # VMEM (D, 1)                                         (resident)
    c_ref,       # VMEM (1, H)         c_k = sum_{i<dim} W1[i,k]*W2[k,i]   (resident)
    dx_ref,      # VMEM (D, TILE_N)    out: dx^T
    negdiv_ref,  # VMEM (1, TILE_N)    out: -div
    esum_ref,    # VMEM (1, 1, 128)    out: per-tile partial sum of dx*dx
    *,
    n_valid,     # static: global number of valid rows (columns here)
    tile_n,      # static: tile width along the batch axis
):
    ratio = r_ref[...]                                           # (1, T)

    # hidden layer: W1^T @ [x; t] + b1  -> (H, T). t rides as the last feature row of xt,
    # so the whole affine map is one MXU matmul (contraction dim D+1).
    pre = (
        jnp.dot(w1t_ref[...], xt_ref[...], preferred_element_type=jnp.float32)
        + b1_ref[...]
    )                                                            # (H, T)
    h = jnp.tanh(pre)                                            # (H, T)  (EUP, full lanes)

    # output layer: W2^T @ h + b2 -> (D, T)
    out = jnp.dot(w2t_ref[...], h, preferred_element_type=jnp.float32) + b2_ref[...]
    dx = out * ratio                                             # (D, T)
    dx_ref[...] = dx                                             # lane-dense store

    # exact divergence (analytic trace of d dx[:dim] / d x[:dim]):
    #   div[n] = ratio[n] * sum_k (1 - h[k,n]^2) * c_k
    # Reduction over H done on the (idle) MXU. Kept at HIGHEST precision because -div
    # feeds the accumulated log-density.
    gsum = jnp.dot(c_ref[...], 1.0 - h * h,
                   preferred_element_type=jnp.float32,
                   precision=jax.lax.Precision.HIGHEST)          # (1, T)
    negdiv_ref[...] = -(gsum * ratio)

    # per-tile partial of sum(dx*dx); columns beyond the valid range (ragged last tile,
    # no wrapper-side padding) are masked out so stale VMEM garbage never contributes.
    col = pl.program_id(0) * tile_n + lax.broadcasted_iota(jnp.int32, (1, tile_n), 1)
    colsum = jnp.where(col < n_valid,
                       jnp.sum(dx * dx, axis=0, keepdims=True),  # sublane reduce (D rows)
                       0.0)                                      # (1, T)
    total = jnp.sum(colsum, axis=1, keepdims=True)               # one lane reduce per tile
    esum_ref[...] = jnp.broadcast_to(total.reshape(1, 1, 1), (1, 1, _ENERGY_LANES))


# --------------------------------- wrapper ------------------------------------
def time_variable_cnf_forward(s, state, params, dim, *, tile_n=None):
    """Mirrors TimeVariableCNF.forward in eval mode (training=False, nonself_connections=False).

    state  = (t0, t1, e, x, logpx, energy, jacnorm);  x: (N, D), t0/t1: (N,)
    params = dict(W1=(D+1, H), b1=(H,), W2=(H, D), b2=(D,))
    returns (0*t0, 0*t1, 0*e, dx, -div, d_energy, d_jacnorm)
    """
    t0, t1, e, x, _logpx, _energy, _jacnorm = state
    N, D = x.shape
    W1 = params["W1"].astype(jnp.float32)        # (D+1, H)
    b1 = params["b1"].astype(jnp.float32)        # (H,)
    W2 = params["W2"].astype(jnp.float32)        # (H, D)
    b2 = params["b2"].astype(jnp.float32)        # (D,)
    H = W1.shape[1]

    # glue: transposed weights for the feature-major kernel + analytic-trace coefficients.
    w1t = W1.T                                                            # (H, D+1)
    w2t = W2.T                                                            # (D, H)
    c = jnp.sum(W1[:dim, :] * W2[:, :dim].T, axis=0, keepdims=True)       # (1, H)

    # ratio / t precomputed outside the kernel (trivial elementwise, fused by XLA).
    t0f = t0.astype(jnp.float32)
    ratio = (t1.astype(jnp.float32) - t0f) / (END_TIME - START_TIME)      # (N,)
    t = (jnp.float32(s) - START_TIME) * ratio + t0f                       # (N,)

    # feature-major, lane-dense packing: rows 0..D-1 = x^T, row D = t (extra feature
    # row folded into the first matmul). Layout plumbing only — no compute hoisted.
    xt = jnp.concatenate([x.astype(jnp.float32).T, t[None, :]], axis=0)   # (D+1, N)
    r = ratio[None, :]                                                    # (1, N)

    # Tile over the (lane) batch axis. Big tiles amortize the ~0.35 us/step pipeline
    # overhead; cap at 32768 rows (~16 MiB working set incl. H-sized f32 temporaries)
    # so the double-buffered pipeline fits v7x's 64 MiB VMEM, and aim for >=8 grid
    # steps at large N so "parallel" shards tiles across both TensorCores.
    if tile_n is None:
        per_step = _round_up(pl.cdiv(max(N, 1), 8), 128)
        tile_n = max(4096, min(32768, per_step))
    tile_n = int(tile_n)
    if tile_n % 128 != 0:
        raise ValueError("tile_n must be a multiple of 128 (lane width)")
    num_tiles = (N + tile_n - 1) // tile_n
    # No jnp.pad of x/tr: the ragged last tile is handled in-kernel (energy masked via
    # iota; out-of-range dx/negdiv columns are simply not written back by the pipeline).

    kernel = functools.partial(_cnf_forward_kernel, n_valid=N, tile_n=tile_n)

    row_tile = lambda i: (0, i)   # tile along the lane (batch) axis
    resident = lambda i: (0, 0)   # constant index map -> block stays resident in VMEM

    dxT, negdivT, esum = pl.pallas_call(
        kernel,
        grid=(num_tiles,),
        out_shape=(
            jax.ShapeDtypeStruct((D, N), jnp.float32),
            jax.ShapeDtypeStruct((1, N), jnp.float32),
            jax.ShapeDtypeStruct((num_tiles, 1, _ENERGY_LANES), jnp.float32),
        ),
        in_specs=[
            pl.BlockSpec((D + 1, tile_n), row_tile),   # xt  (x^T rows + t row)
            pl.BlockSpec((1, tile_n), row_tile),       # ratio
            pl.BlockSpec((H, D + 1), resident),        # W1^T  (resident)
            pl.BlockSpec((H, 1), resident),            # b1    (resident)
            pl.BlockSpec((D, H), resident),            # W2^T  (resident)
            pl.BlockSpec((D, 1), resident),            # b2    (resident)
            pl.BlockSpec((1, H), resident),            # c     (resident)
        ],
        out_specs=(
            pl.BlockSpec((D, tile_n), row_tile),
            pl.BlockSpec((1, tile_n), row_tile),
            pl.BlockSpec((1, 1, _ENERGY_LANES), lambda i: (i, 0, 0)),
        ),
        compiler_params=pltpu.CompilerParams(
            dimension_semantics=("parallel",),      # tiles are independent -> megacore
            vmem_limit_bytes=48 * 1024 * 1024,      # headroom on v5e/v6e (128 MiB) & v7x (64 MiB)
        ),
    )(xt, r, w1t, b1.reshape(H, 1), w2t, b2.reshape(D, 1), c)

    dx = dxT.T                                            # back to (N, D) module layout
    negdiv = negdivT[0]                                   # (N,)
    d_energy = (jnp.sum(esum[:, 0, 0]) / N).reshape(1)    # normalize by global N once
    d_jacnorm = jnp.zeros((1,), jnp.float32)              # eval mode (training=False)

    # TODO(synk): `integrate()` wraps torchdiffeq's odeint_adjoint (adaptive dopri5); that
    # ODE-solver driver has no Pallas equivalent and is out of scope — only the `forward`
    # dynamics evaluation is implemented here.
    return (
        jnp.zeros_like(t0),
        jnp.zeros_like(t1),
        jnp.zeros_like(e),
        dx,
        negdiv,
        d_energy,
        d_jacnorm,
    )


# ----------------------------- pure-JAX reference ------------------------------
def _reference_forward(s, state, params, dim):
    """Autodiff reference: same func, divergence via jacfwd trace."""
    t0, t1, e, x, *_ = state
    W1 = params["W1"].astype(jnp.float32)
    b1 = params["b1"].astype(jnp.float32)
    W2 = params["W2"].astype(jnp.float32)
    b2 = params["b2"].astype(jnp.float32)
    D = x.shape[1]
    w1x, w1t = W1[:D, :], W1[D, :]

    ratio = (t1 - t0) / (END_TIME - START_TIME)
    t = (s - START_TIME) * ratio + t0

    def func(tn, xn):                         # xn: (D,), tn: scalar
        h = jnp.tanh(xn @ w1x + tn * w1t + b1)
        return h @ W2 + b2

    dx = jax.vmap(func)(t, x) * ratio[:, None]

    def per_sample_div(tn, xn, rn):
        J = jax.jacfwd(lambda xx: func(tn, xx) * rn)(xn)   # (D, D)
        return jnp.trace(J[:dim, :dim])

    div = jax.vmap(per_sample_div)(t, x, ratio)
    d_energy = (jnp.sum(dx * dx) / x.shape[0]).reshape(1)
    return dx, -div, d_energy


# ------------------------------------ main --------------------------------------
if __name__ == "__main__":
    key = jax.random.PRNGKey(0)
    D, dim, H = 4, 2, 32

    k = jax.random.split(key, 8)
    params = {
        "W1": 0.3 * jax.random.normal(k[4], (D + 1, H), jnp.float32),
        "b1": 0.1 * jax.random.normal(k[5], (H,), jnp.float32),
        "W2": 0.3 * jax.random.normal(k[6], (H, D), jnp.float32),
        "b2": 0.1 * jax.random.normal(k[7], (D,), jnp.float32),
    }
    s = 0.37

    def make_state(n, kk):
        kx, k0, k1, ke = jax.random.split(kk, 4)
        x = jax.random.normal(kx, (n, D), jnp.float32)
        t0 = jax.random.uniform(k0, (n,), jnp.float32, 0.0, 0.5)
        t1 = t0 + jax.random.uniform(k1, (n,), jnp.float32, 0.5, 1.5)
        e = jax.random.normal(ke, (n, dim), jnp.float32)
        logpx = jnp.zeros((n,), jnp.float32)
        energy = jnp.zeros((1,), jnp.float32)
        jacnorm = jnp.zeros((1,), jnp.float32)
        return (t0, t1, e, x, logpx, energy, jacnorm)

    # Loose tolerance: with default (non-HIGHEST) MXU matmul precision either the kernel
    # or the XLA reference may use bf16 MXU passes, bounding agreement at ~1e-2. A formula
    # error (wrong trace / missing ratio) would be off by O(1), so the check stays meaningful.
    TOL = dict(rtol=5e-2, atol=5e-2)

    cases = (
        ("single-tile-ragged", 8, None),     # tiny batch, one (partially filled) grid step
        ("multi-tile-ragged", 200, 128),     # 2 grid steps, ragged last tile (200 -> 256 masked)
        ("multi-tile-exact", 384, 128),      # 3 grid steps, exact division
    )
    for name, n, tn in cases:
        state = make_state(n, jax.random.fold_in(key, n))
        out = jax.block_until_ready(
            time_variable_cnf_forward(s, state, params, dim, tile_n=tn))
        dt0, dt1, de, dx, negdiv, d_energy, d_jacnorm = out

        dx_ref, negdiv_ref, d_energy_ref = _reference_forward(s, state, params, dim)
        assert dx.shape == (n, D) and negdiv.shape == (n,) and d_energy.shape == (1,), name
        assert jnp.allclose(dx, dx_ref, **TOL), name
        assert jnp.allclose(negdiv, negdiv_ref, **TOL), name
        assert jnp.allclose(d_energy, d_energy_ref, **TOL), name
        # precision-independent self-consistency: energy plumbing (incl. ragged-tail
        # masking) vs the kernel's own dx
        assert jnp.allclose(d_energy, (jnp.sum(dx * dx) / n).reshape(1),
                            rtol=1e-5, atol=1e-6), name
        assert jnp.all(dt0 == 0) and jnp.all(dt1 == 0) and jnp.all(de == 0), name
        assert jnp.all(d_jacnorm == 0), name

    print("KERNEL_OK")
</pallas_src>

<mosaic_0001>
module attributes {stable_mosaic.version = 11 : i64} {
  func.func @_cnf_forward_kernel(%arg0: i32, %arg1: memref<5x4096xf32, #tpu.memory_space<vmem>>, %arg2: memref<1x4096xf32, #tpu.memory_space<vmem>>, %arg3: memref<32x5xf32, #tpu.memory_space<vmem>>, %arg4: memref<32x1xf32, #tpu.memory_space<vmem>>, %arg5: memref<4x32xf32, #tpu.memory_space<vmem>>, %arg6: memref<4x1xf32, #tpu.memory_space<vmem>>, %arg7: memref<1x32xf32, #tpu.memory_space<vmem>>, %arg8: memref<4x4096xf32, #tpu.memory_space<vmem>>, %arg9: memref<1x4096xf32, #tpu.memory_space<vmem>>, %arg10: memref<1x1x128xf32, #tpu.memory_space<vmem>>) attributes {dimension_semantics = [#tpu.dimension_semantics<parallel>], iteration_bounds = array<i64: 1>, scalar_prefetch = 0 : i64, scratch_operands = 0 : i64, tpu.core_type = #tpu.core_type<tc>, window_params = [{transform_indices = @transform_0, window_bounds = array<i64: 5, 4096>}, {transform_indices = @transform_1, window_bounds = array<i64: 1, 4096>}, {pipeline_mode = #tpu.pipeline_mode<synchronous>, transform_indices = @transform_2, window_bounds = array<i64: 32, 5>}, {pipeline_mode = #tpu.pipeline_mode<synchronous>, transform_indices = @transform_3, window_bounds = array<i64: 32, 1>}, {pipeline_mode = #tpu.pipeline_mode<synchronous>, transform_indices = @transform_4, window_bounds = array<i64: 4, 32>}, {pipeline_mode = #tpu.pipeline_mode<synchronous>, transform_indices = @transform_5, window_bounds = array<i64: 4, 1>}, {pipeline_mode = #tpu.pipeline_mode<synchronous>, transform_indices = @transform_6, window_bounds = array<i64: 1, 32>}, {transform_indices = @transform_7, window_bounds = array<i64: 4, 4096>}, {transform_indices = @transform_8, window_bounds = array<i64: 1, 4096>}, {transform_indices = @transform_9, window_bounds = array<i64: 1, 1, 128>}]} {
    %c0 = arith.constant 0 : index
    %c0_0 = arith.constant 0 : index
    %0 = vector.load %arg2[%c0, %c0_0] : memref<1x4096xf32, #tpu.memory_space<vmem>>, vector<1x4096xf32>
    %c0_1 = arith.constant 0 : index
    %c0_2 = arith.constant 0 : index
    %1 = vector.load %arg3[%c0_1, %c0_2] : memref<32x5xf32, #tpu.memory_space<vmem>>, vector<32x5xf32>
    %c0_3 = arith.constant 0 : index
    %c0_4 = arith.constant 0 : index
    %2 = vector.load %arg1[%c0_3, %c0_4] : memref<5x4096xf32, #tpu.memory_space<vmem>>, vector<5x4096xf32>
    %cst = arith.constant dense<0.000000e+00> : vector<32x4096xf32>
    %3 = tpu.matmul %1, %2, %cst {dimension_numbers = #tpu.dot_dimension_numbers<[1], [0], [0], [1], [0, 0, 1, 1], [], []>} : vector<32x5xf32>, vector<5x4096xf32>, vector<32x4096xf32> -> vector<32x4096xf32>
    %c0_5 = arith.constant 0 : index
    %c0_6 = arith.constant 0 : index
    %4 = vector.load %arg4[%c0_5, %c0_6] : memref<32x1xf32, #tpu.memory_space<vmem>>, vector<32x1xf32>
    %5 = vector.broadcast %4 : vector<32x1xf32> to vector<32x4096xf32>
    %6 = arith.addf %3, %5 : vector<32x4096xf32>
    %7 = math.tanh %6 : vector<32x4096xf32>
    %c0_7 = arith.constant 0 : index
    %c0_8 = arith.constant 0 : index
    %8 = vector.load %arg5[%c0_7, %c0_8] : memref<4x32xf32, #tpu.memory_space<vmem>>, vector<4x32xf32>
    %cst_9 = arith.constant dense<0.000000e+00> : vector<4x4096xf32>
    %9 = tpu.matmul %8, %7, %cst_9 {dimension_numbers = #tpu.dot_dimension_numbers<[1], [0], [0], [1], [0, 0, 1, 1], [], []>} : vector<4x32xf32>, vector<32x4096xf32>, vector<4x4096xf32> -> vector<4x4096xf32>
    %c0_10 = arith.constant 0 : index
    %c0_11 = arith.constant 0 : index
    %10 = vector.load %arg6[%c0_10, %c0_11] : memref<4x1xf32, #tpu.memory_space<vmem>>, vector<4x1xf32>
    %11 = vector.broadcast %10 : vector<4x1xf32> to vector<4x4096xf32>
    %12 = arith.addf %9, %11 : vector<4x4096xf32>
    %13 = vector.broadcast %0 : vector<1x4096xf32> to vector<4x4096xf32>
    %14 = arith.mulf %12, %13 : vector<4x4096xf32>
    %c0_12 = arith.constant 0 : index
    %c0_13 = arith.constant 0 : index
    %15 = vector.load %arg8[%c0_12, %c0_13] : memref<4x4096xf32, #tpu.memory_space<vmem>>, vector<4x4096xf32>
    tpu.vector_store %arg8[%c0_12, %c0_13], %14 {strides = array<i32>} : memref<4x4096xf32, #tpu.memory_space<vmem>>, vector<4x4096xf32>,
    %c0_14 = arith.constant 0 : index
    %c0_15 = arith.constant 0 : index
    %16 = vector.load %arg7[%c0_14, %c0_15] : memref<1x32xf32, #tpu.memory_space<vmem>>, vector<1x32xf32>
    %17 = arith.mulf %7, %7 : vector<32x4096xf32>
    %cst_16 = arith.constant 1.000000e+00 : f32
    %18 = vector.broadcast %cst_16 : f32 to vector<32x4096xf32>
    %19 = arith.subf %18, %17 : vector<32x4096xf32>
    %cst_17 = arith.constant dense<0.000000e+00> : vector<1x4096xf32>
    %20 = tpu.matmul %16, %19, %cst_17 {dimension_numbers = #tpu.dot_dimension_numbers<[1], [0], [0], [1], [0, 0, 1, 1], [], []>, precision = #tpu.contract_precision<fp32>} : vector<1x32xf32>, vector<32x4096xf32>, vector<1x4096xf32> -> vector<1x4096xf32>
    %21 = arith.mulf %20, %0 : vector<1x4096xf32>
    %cst_18 = arith.constant 0.000000e+00 : f32
    %22 = vector.broadcast %cst_18 : f32 to vector<1x4096xf32>
    %23 = arith.subf %22, %21 : vector<1x4096xf32>
    %c0_19 = arith.constant 0 : index
    %c0_20 = arith.constant 0 : index
    %24 = vector.load %arg9[%c0_19, %c0_20] : memref<1x4096xf32, #tpu.memory_space<vmem>>, vector<1x4096xf32>
    tpu.vector_store %arg9[%c0_19, %c0_20], %23 {strides = array<i32>} : memref<1x4096xf32, #tpu.memory_space<vmem>>, vector<1x4096xf32>,
    %c4096_i32 = arith.constant 4096 : i32
    %25 = arith.muli %arg0, %c4096_i32 : i32
    %26 = tpu.iota {dimensions = array<i32: 1>} : vector<1x4096xi32>
    %27 = vector.broadcast %25 : i32 to vector<1x4096xi32>
    %28 = arith.addi %27, %26 : vector<1x4096xi32>
    %c8_i32 = arith.constant 8 : i32
    %29 = vector.broadcast %c8_i32 : i32 to vector<1x4096xi32>
    %30 = arith.cmpi slt, %28, %29 : vector<1x4096xi32>
    %31 = arith.mulf %14, %14 : vector<4x4096xf32>
    %cst_21 = arith.constant dense<0.000000e+00> : vector<4096xf32>
    %32 = vector.multi_reduction <add>, %31, %cst_21 [0] : vector<4x4096xf32> to vector<4096xf32>
    %33 = vector.shape_cast %32 : vector<4096xf32> to vector<1x4096xf32>
    %cst_22 = arith.constant 0.000000e+00 : f32
    %34 = vector.broadcast %cst_22 : f32 to vector<1x4096xf32>
    %35 = arith.select %30, %33, %34 : vector<1x4096xi1>, vector<1x4096xf32>
    %cst_23 = arith.constant dense<0.000000e+00> : vector<1xf32>
    %36 = vector.multi_reduction <add>, %35, %cst_23 [1] : vector<1x4096xf32> to vector<1xf32>
    %37 = vector.shape_cast %36 : vector<1xf32> to vector<1x1xf32>
    %38 = vector.shape_cast %37 : vector<1x1xf32> to vector<1x1x1xf32>
    %39 = vector.shape_cast %38 : vector<1x1x1xf32> to vector<1x1x1xf32>
    %40 = vector.broadcast %39 : vector<1x1x1xf32> to vector<1x1x128xf32>
    %c0_24 = arith.constant 0 : index
    %c0_25 = arith.constant 0 : index
    %c0_26 = arith.constant 0 : index
    %41 = vector.load %arg10[%c0_24, %c0_25, %c0_26] : memref<1x1x128xf32, #tpu.memory_space<vmem>>, vector<1x1x128xf32>
    tpu.vector_store %arg10[%c0_24, %c0_25, %c0_26], %40 {strides = array<i32>} : memref<1x1x128xf32, #tpu.memory_space<vmem>>, vector<1x1x128xf32>,
    return
  }
  func.func @transform_0(%arg0: i32) -> (i32, i32) {
    %c0_i32 = arith.constant 0 : i32
    %c0_i32_0 = arith.constant 0 : i32
    return %c0_i32, %arg0 : i32, i32
  }
  func.func @transform_1(%arg0: i32) -> (i32, i32) {
    %c0_i32 = arith.constant 0 : i32
    %c0_i32_0 = arith.constant 0 : i32
    return %c0_i32, %arg0 : i32, i32
  }
  func.func @transform_2(%arg0: i32) -> (i32, i32) {
    %c0_i32 = arith.constant 0 : i32
    %c0_i32_0 = arith.constant 0 : i32
    %c0_i32_1 = arith.constant 0 : i32
    return %c0_i32, %c0_i32_0 : i32, i32
  }
  func.func @transform_3(%arg0: i32) -> (i32, i32) {
    %c0_i32 = arith.constant 0 : i32
    %c0_i32_0 = arith.constant 0 : i32
    %c0_i32_1 = arith.constant 0 : i32
    return %c0_i32, %c0_i32_0 : i32, i32
  }
  func.func @transform_4(%arg0: i32) -> (i32, i32) {
    %c0_i32 = arith.constant 0 : i32
    %c0_i32_0 = arith.constant 0 : i32
    %c0_i32_1 = arith.constant 0 : i32
    return %c0_i32, %c0_i32_0 : i32, i32
  }
  func.func @transform_5(%arg0: i32) -> (i32, i32) {
    %c0_i32 = arith.constant 0 : i32
    %c0_i32_0 = arith.constant 0 : i32
    %c0_i32_1 = arith.constant 0 : i32
    return %c0_i32, %c0_i32_0 : i32, i32
  }
  func.func @transform_6(%arg0: i32) -> (i32, i32) {
    %c0_i32 = arith.constant 0 : i32
    %c0_i32_0 = arith.constant 0 : i32
    %c0_i32_1 = arith.constant 0 : i32
    return %c0_i32, %c0_i32_0 : i32, i32
  }
  func.func @transform_7(%arg0: i32) -> (i32, i32) {
    %c0_i32 = arith.constant 0 : i32
    %c0_i32_0 = arith.constant 0 : i32
    return %c0_i32, %arg0 : i32, i32
  }
  func.func @transform_8(%arg0: i32) -> (i32, i32) {
    %c0_i32 = arith.constant 0 : i32
    %c0_i32_0 = arith.constant 0 : i32
    return %c0_i32, %arg0 : i32, i32
  }
  func.func @transform_9(%arg0: i32) -> (i32, i32, i32) {
    %c0_i32 = arith.constant 0 : i32
    %c0_i32_0 = arith.constant 0 : i32
    %c0_i32_1 = arith.constant 0 : i32
    return %arg0, %c0_i32, %c0_i32_0 : i32, i32, i32
  }
}

</mosaic_0001>

<bundles_post_ra>
// kernel: tpu_custom_call.1
= control target key start
LH: loop header
LB: loop body
LE: loop exit
PB: predicated region body
PF: predicated region fallthrough
CT: control target
= control target key end

     0   :  { %15 = vsyncpa [#allocation3], 0  ;;  %s13822_s0 = inlined_call_operand.vmem [shape: f32[5,8], index: 0, kind: input, shape index: {}]   ;;  %s13823_s1 = inlined_call_operand.vmem [shape: f32[1,8], index: 1, kind: input, shape index: {}]   ;;  %s13824_s2 = inlined_call_operand.vmem [shape: f32[32,5], index: 2, kind: input, shape index: {}]   ;;  %s13825_s3 = inlined_call_operand.vmem [shape: f32[32,1], index: 3, kind: input, shape index: {}]   ;;  %s13826_s4 = inlined_call_operand.vmem [shape: f32[4,32], index: 4, kind: input, shape index: {}]   ;;  %s13827_s5 = inlined_call_operand.vmem [shape: f32[4,1], index: 5, kind: input, shape index: {}]   ;;  %s13828_s6 = inlined_call_operand.vmem [shape: f32[1,32], index: 6, kind: input, shape index: {}]   ;;  %s13829_s7 = inlined_call_operand.hbm [shape: f32[4,8], index: 7, kind: output, shape index: {0}]   ;;  %s13830_s8 = inlined_call_operand.hbm [shape: f32[1,8], index: 8, kind: output, shape index: {1}]   ;;  %s13831_s9 = inlined_call_operand.hbm [shape: f32[1,1,128], index: 9, kind: output, shape index: {2}]  }
   0x1   :  { %16 = vsyncpa [#allocation5], 0  ;;  %v39_v0 = vld [vmem:[%s13822_s0] sm:$0x1f]  ;;  %vm108_vm0 = vcmask 1044480   ;;  %vm95_vm1 = vcmask 39936  }
   0x2   :  { %v9514_v1 = vld [vmem:[%s13824_s2] sm:$0xff]  ;;  %8923 = vmatpush.msk.msra.mxu0 %vm108_vm0, %v39_v0  ;;  %v40_v2 = vld [vmem:[%s13822_s0 + $0x8] sm:$0x1f]  ;;  %v41_v3 = vld [vmem:[%s13822_s0 + $0x10] sm:$0x1f]  ;;  %v9454_v10 = vmov 0  }
   0x3   :  { %v42_v4 = vld [vmem:[%s13822_s0 + $0x18] sm:$0x1f]  ;;  %8928 = vmatpush.msk.msra.mxu1 %vm108_vm0, %v40_v2  ;;  %8933 = vmatpush.msk.msra.mxu2 %vm108_vm0, %v41_v3  ;;  %v45_v5 = vld [vmem:[%s13822_s0 + $0x30] sm:$0x1f]  ;;  %v72_v7 = vld [vmem:[%s13825_s3 + $0x8] sm:$0xff]  ;;  %vm1268_vm2 = vcmask 261120  }
   0x4   :  { %8938 = vmatpush.msk.msra.mxu3 %vm108_vm0, %v42_v4  ;;  %8924 = vmatmul.msk.f32.vlgmr.msra.gmra.mxu0 %vm95_vm1, %v9514_v1  ;;  %v46_v6 = vld [vmem:[%s13822_s0 + $0x38] sm:$0x1f]  ;;  %v43_v8 = vld [vmem:[%s13822_s0 + $0x20] sm:$0x1f]  ;;  %v44_v9 = vld [vmem:[%s13822_s0 + $0x28] sm:$0x1f] }
   0x5   :  { %8929 = vmatmul.msk.f32.vlgmr.msra.gmra.mxu1 %vm95_vm1, %v9514_v1  ;;  %8934 = vmatmul.msk.f32.vlgmr.msra.gmra.mxu2 %vm95_vm1, %v9514_v1  ;;  %v74_v11 = vld [vmem:[%s13825_s3 + $0x18] sm:$0xff]  ;;  %v49_v12 = vld [vmem:[%s13822_s0 + $0x50] sm:$0x1f]  ;;  %v9567_v14 = vld [vmem:[%s13824_s2 + $0x8] sm:$0xff]  ;;  %vm2060_vm3 = vcmask 1043456   ;;  %vm8415_vm5 = vcmask 1042434  }
   0x6   :  { %8939 = vmatmul.msk.f32.vlgmr.msra.gmra.mxu3 %vm95_vm1, %v9514_v1  ;;  %8953 = vmatpush.msk.msrb.mxu2 %vm108_vm0, %v45_v5  ;;  %v50_v13 = vld [vmem:[%s13822_s0 + $0x58] sm:$0x1f]  ;;  %v71_v15 = vld [vmem:[%s13825_s3] sm:$0xff]  ;;  %v48_v17 = vld [vmem:[%s13822_s0 + $0x48] sm:$0x1f]  ;;  %vm8413_vm6 = vcmask 1040384  }
   0x7   :  { %8958 = vmatpush.msk.msrb.mxu3 %vm108_vm0, %v46_v6  ;;  %9120 = vset.pattern.permute.xlu1 %v9454_v10  ;;  %v47_v16 = vld [vmem:[%s13822_s0 + $0x40] sm:$0x1f]  ;;  %v73_v18 = vld [vmem:[%s13825_s3 + $0x10] sm:$0xff]  ;;  %v9610_v20 = vld [vmem:[%s13824_s2 + $0x18] sm:$0xff]  ;;  %vm8417_vm7 = vcmask 1041408   ;;  %vm8419_vm8 = vcmask 1044484  }
   0x8   :  { %82 = vperm.xlu1 %9120, %v72_v7   ;;  %8943 = vmatpush.msk.msrb.mxu0 %vm108_vm0, %v43_v8  ;;  %v9597_v19 = vld [vmem:[%s13824_s2 + $0x10] sm:$0xff]  ;;  %v54_v22 = vld [vmem:[%s13822_s0 + $0x78] sm:$0x1f]  ;;  %v51_v23 = vld [vmem:[%s13822_s0 + $0x60] sm:$0x1f]  ;;  %vm8421_vm9 = vcmask 1046534  }
   0x9   :  { %8948 = vmatpush.msk.msrb.mxu1 %vm108_vm0, %v44_v9  ;;  %9119 = vset.pattern.permute.xlu0 %v9454_v10  ;;  %v53_v21 = vld [vmem:[%s13822_s0 + $0x70] sm:$0x1f]  ;;  %v52_v24 = vld [vmem:[%s13822_s0 + $0x68] sm:$0x1f]  ;;  %v58_v26 = vld [vmem:[%s13822_s0 + $0x98] sm:$0x1f] }
   0xa   :  { %92 = vperm.xlu0 %9119, %v74_v11   ;;  %8973 = vmatpush.msk.msra.mxu2 %vm108_vm0, %v49_v12  ;;  %v57_v25 = vld [vmem:[%s13822_s0 + $0x90] sm:$0x1f]  ;;  %v55_v27 = vld [vmem:[%s13822_s0 + $0x80] sm:$0x1f]  ;;  %v56_v28 = vld [vmem:[%s13822_s0 + $0x88] sm:$0x1f] }
   0xb   :  { %8978 = vmatpush.msk.msra.mxu3 %vm108_vm0, %v50_v13  ;;  %9121 = vset.pattern.permute.xlu2 %v9454_v10  ;;  %v61_v29 = vld [vmem:[%s13822_s0 + $0xb0] sm:$0x1f]  ;;  %v62_v30 = vld [vmem:[%s13822_s0 + $0xb8] sm:$0x1f]  ;;  %v59_v31 = vld [vmem:[%s13822_s0 + $0xa0] sm:$0x1f] }
   0xc   :  { %8925 = vmatmul.msk.f32.gmra.mxu0 %vm95_vm1, %v9567_v14  ;;  %8968 = vmatpush.msk.msra.mxu1 %vm108_vm0, %v48_v17  ;;  %v60_v32 = vld [vmem:[%s13822_s0 + $0xa8] sm:$0x1f]  ;;  %v65_v39 = vld [vmem:[%s13822_s0 + $0xd0] sm:$0x1f]  ;;  %v66_v44 = vld [vmem:[%s13822_s0 + $0xd8] sm:$0x1f] }
   0xd   :  { %8930 = vmatmul.msk.f32.gmra.mxu1 %vm95_vm1, %v9567_v14  ;;  %8935 = vmatmul.msk.f32.gmra.mxu2 %vm95_vm1, %v9567_v14  ;;  %v63_v45 = vld [vmem:[%s13822_s0 + $0xc0] sm:$0x1f]  ;;  %v64_v50 = vld [vmem:[%s13822_s0 + $0xc8] sm:$0x1f]  ;;  %v69_v57 = vld [vmem:[%s13822_s0 + $0xf0] sm:$0x1f] }
   0xe   :  { %8940 = vmatmul.msk.f32.gmra.mxu3 %vm95_vm1, %v9567_v14  ;;  %8963 = vmatpush.msk.msra.mxu0 %vm108_vm0, %v47_v16  ;;  %v67_v55 = vld [vmem:[%s13822_s0 + $0xe0] sm:$0x1f]  ;;  %v68_v56 = vld [vmem:[%s13822_s0 + $0xe8] sm:$0x1f]  ;;  %v70_v58 = vld [vmem:[%s13822_s0 + $0xf8] sm:$0x1f] }
   0xf   :  { %vm8423_vm10 = vcmask 1045508  }
  0x10   :  { %77 = vperm.xlu1 %9120, %v71_v15  }
  0x12   :  { %87 = vperm.xlu0 %9119, %v73_v18  }
  0x14   :  { %8926 = vmatmul.msk.f32.gmra.mxu0 %vm95_vm1, %v9597_v19 }
  0x15   :  { %8931 = vmatmul.msk.f32.gmra.mxu1 %vm95_vm1, %v9597_v19  ;;  %8936 = vmatmul.msk.f32.gmra.mxu2 %vm95_vm1, %v9597_v19 }
  0x16   :  { %8941 = vmatmul.msk.f32.gmra.mxu3 %vm95_vm1, %v9597_v19 }
  0x1c   :  { %8927 = vmatmul.msk.f32.gmra.mxu0 %vm95_vm1, %v9610_v20 }
  0x1d   :  { %8932 = vmatmul.msk.f32.gmra.mxu1 %vm95_vm1, %v9610_v20  ;;  %8937 = vmatmul.msk.f32.gmra.mxu2 %vm95_vm1, %v9610_v20 }
  0x1e   :  { %8942 = vmatmul.msk.f32.gmra.mxu3 %vm95_vm1, %v9610_v20 }
  0x24   :  { %8944 = vmatmul.msk.f32.vlgmr.msrb.gmra.mxu0 %vm95_vm1, %v9514_v1 }
  0x25   :  { %8949 = vmatmul.msk.f32.vlgmr.msrb.gmra.mxu1 %vm95_vm1, %v9514_v1  ;;  %8954 = vmatmul.msk.f32.vlgmr.msrb.gmra.mxu2 %vm95_vm1, %v9514_v1 }
  0x26   :  { %8959 = vmatmul.msk.f32.vlgmr.msrb.gmra.mxu3 %vm95_vm1, %v9514_v1  ;;  %8993 = vmatpush.msk.msrb.mxu2 %vm108_vm0, %v53_v21 }
  0x27   :  { %8998 = vmatpush.msk.msrb.mxu3 %vm108_vm0, %v54_v22  ;;  %8983 = vmatpush.msk.msrb.mxu0 %vm108_vm0, %v51_v23 }
  0x28   :  { %8988 = vmatpush.msk.msrb.mxu1 %vm108_vm0, %v52_v24 }
  0x2c   :  { %8945 = vmatmul.msk.f32.gmra.mxu0 %vm95_vm1, %v9567_v14 }
  0x2d   :  { %8950 = vmatmul.msk.f32.gmra.mxu1 %vm95_vm1, %v9567_v14  ;;  %8955 = vmatmul.msk.f32.gmra.mxu2 %vm95_vm1, %v9567_v14 }
  0x2e   :  { %8960 = vmatmul.msk.f32.gmra.mxu3 %vm95_vm1, %v9567_v14 }
  0x34   :  { %8946 = vmatmul.msk.f32.gmra.mxu0 %vm95_vm1, %v9597_v19 }
  0x35   :  { %8951 = vmatmul.msk.f32.gmra.mxu1 %vm95_vm1, %v9597_v19  ;;  %8956 = vmatmul.msk.f32.gmra.mxu2 %vm95_vm1, %v9597_v19 }
  0x36   :  { %8961 = vmatmul.msk.f32.gmra.mxu3 %vm95_vm1, %v9597_v19 }
  0x3c   :  { %8947 = vmatmul.msk.f32.gmra.mxu0 %vm95_vm1, %v9610_v20 }
  0x3d   :  { %8952 = vmatmul.msk.f32.gmra.mxu1 %vm95_vm1, %v9610_v20  ;;  %8957 = vmatmul.msk.f32.gmra.mxu2 %vm95_vm1, %v9610_v20 }
  0x3e   :  { %8962 = vmatmul.msk.f32.gmra.mxu3 %vm95_vm1, %v9610_v20 }
  0x44   :  { %8964 = vmatmul.msk.f32.vlgmr.msra.gmra.mxu0 %vm95_vm1, %v9514_v1 }
  0x45   :  { %8969 = vmatmul.msk.f32.vlgmr.msra.gmra.mxu1 %vm95_vm1, %v9514_v1  ;;  %8974 = vmatmul.msk.f32.vlgmr.msra.gmra.mxu2 %vm95_vm1, %v9514_v1 }
  0x46   :  { %8979 = vmatmul.msk.f32.vlgmr.msra.gmra.mxu3 %vm95_vm1, %v9514_v1  ;;  %9013 = vmatpush.msk.msra.mxu2 %vm108_vm0, %v57_v25 }
  0x47   :  { %9018 = vmatpush.msk.msra.mxu3 %vm108_vm0, %v58_v26  ;;  %9003 = vmatpush.msk.msra.mxu0 %vm108_vm0, %v55_v27 }
  0x48   :  { %9008 = vmatpush.msk.msra.mxu1 %vm108_vm0, %v56_v28 }
  0x4c   :  { %8965 = vmatmul.msk.f32.gmra.mxu0 %vm95_vm1, %v9567_v14 }
  0x4d   :  { %8970 = vmatmul.msk.f32.gmra.mxu1 %vm95_vm1, %v9567_v14  ;;  %8975 = vmatmul.msk.f32.gmra.mxu2 %vm95_vm1, %v9567_v14 }
  0x4e   :  { %8980 = vmatmul.msk.f32.gmra.mxu3 %vm95_vm1, %v9567_v14 }
  0x54   :  { %8966 = vmatmul.msk.f32.gmra.mxu0 %vm95_vm1, %v9597_v19 }
  0x55   :  { %8971 = vmatmul.msk.f32.gmra.mxu1 %vm95_vm1, %v9597_v19  ;;  %8976 = vmatmul.msk.f32.gmra.mxu2 %vm95_vm1, %v9597_v19 }
  0x56   :  { %8981 = vmatmul.msk.f32.gmra.mxu3 %vm95_vm1, %v9597_v19 }
  0x5c   :  { %8967 = vmatmul.msk.f32.gmra.mxu0 %vm95_vm1, %v9610_v20 }
  0x5d   :  { %8972 = vmatmul.msk.f32.gmra.mxu1 %vm95_vm1, %v9610_v20  ;;  %8977 = vmatmul.msk.f32.gmra.mxu2 %vm95_vm1, %v9610_v20 }
  0x5e   :  { %8982 = vmatmul.msk.f32.gmra.mxu3 %vm95_vm1, %v9610_v20 }
  0x64   :  { %8984 = vmatmul.msk.f32.vlgmr.msrb.gmra.mxu0 %vm95_vm1, %v9514_v1 }
  0x65   :  { %8989 = vmatmul.msk.f32.vlgmr.msrb.gmra.mxu1 %vm95_vm1, %v9514_v1  ;;  %8994 = vmatmul.msk.f32.vlgmr.msrb.gmra.mxu2 %vm95_vm1, %v9514_v1 }
  0x66   :  { %8999 = vmatmul.msk.f32.vlgmr.msrb.gmra.mxu3 %vm95_vm1, %v9514_v1  ;;  %9033 = vmatpush.msk.msrb.mxu2 %vm108_vm0, %v61_v29 }
  0x67   :  { %9038 = vmatpush.msk.msrb.mxu3 %vm108_vm0, %v62_v30  ;;  %9023 = vmatpush.msk.msrb.mxu0 %vm108_vm0, %v59_v31 }
  0x68   :  { %9028 = vmatpush.msk.msrb.mxu1 %vm108_vm0, %v60_v32 }
  0x6c   :  { %8985 = vmatmul.msk.f32.gmra.mxu0 %vm95_vm1, %v9567_v14 }
  0x6d   :  { %8990 = vmatmul.msk.f32.gmra.mxu1 %vm95_vm1, %v9567_v14  ;;  %8995 = vmatmul.msk.f32.gmra.mxu2 %vm95_vm1, %v9567_v14 }
  0x6e   :  { %9000 = vmatmul.msk.f32.gmra.mxu3 %vm95_vm1, %v9567_v14 }
  0x74   :  { %8986 = vmatmul.msk.f32.gmra.mxu0 %vm95_vm1, %v9597_v19 }
  0x75   :  { %8991 = vmatmul.msk.f32.gmra.mxu1 %vm95_vm1, %v9597_v19  ;;  %8996 = vmatmul.msk.f32.gmra.mxu2 %vm95_vm1, %v9597_v19 }
  0x76   :  { %9001 = vmatmul.msk.f32.gmra.mxu3 %vm95_vm1, %v9597_v19 }
  0x7a   :  { %v9856_v59 = vpop.permute.xlu1 %82 }
  0x7c   :  { %8987 = vmatmul.msk.f32.gmra.mxu0 %vm95_vm1, %v9610_v20  ;;  %v9872_v0 = vpop.permute.xlu0 %92 }
  0x7d   :  { %8992 = vmatmul.msk.f32.gmra.mxu1 %vm95_vm1, %v9610_v20  ;;  %8997 = vmatmul.msk.f32.gmra.mxu2 %vm95_vm1, %v9610_v20 }
  0x7e   :  { %9002 = vmatmul.msk.f32.gmra.mxu3 %vm95_vm1, %v9610_v20 }
  0x81   :  { %v9764_v33 = vpop.f32.mrf.mxu0 }
  0x82   :  { %v9766_v34 = vpop.f32.mrf.mxu1  ;;  %v9882_v2 = vpop.permute.xlu1 %77 }
  0x83   :  { %v223_v7 = vadd.f32 %v9764_v33, %v9882_v2  ;;  %v252_v9 = vadd.f32 %v9766_v34, %v9882_v2 }
  0x84   :  { %9004 = vmatmul.msk.f32.vlgmr.msra.gmra.mxu0 %vm95_vm1, %v9514_v1  ;;  %v9896_v8 = vpop.permute.xlu0 %87 }
  0x85   :  { %9009 = vmatmul.msk.f32.vlgmr.msra.gmra.mxu1 %vm95_vm1, %v9514_v1  ;;  %9014 = vmatmul.msk.f32.vlgmr.msra.gmra.mxu2 %vm95_vm1, %v9514_v1  ;;  %9122 = vtanh.f32 %v223_v7 }
  0x86   :  { %9019 = vmatmul.msk.f32.vlgmr.msra.gmra.mxu3 %vm95_vm1, %v9514_v1  ;;  %9053 = vmatpush.msk.msra.mxu2 %vm108_vm0, %v65_v39  ;;  %9124 = vtanh.f32 %v252_v9 }
  0x87   :  { %9058 = vmatpush.msk.msra.mxu3 %vm108_vm0, %v66_v44  ;;  %9043 = vmatpush.msk.msra.mxu0 %vm108_vm0, %v63_v45 }
  0x88   :  { %v9776_v35 = vpop.f32.mrf.mxu2  ;;  %9048 = vmatpush.msk.msra.mxu1 %vm108_vm0, %v64_v50 }
  0x89   :  { %v9778_v36 = vpop.f32.mrf.mxu3  ;;  %v9780_v37 = vpop.f32.mrf.mxu0  ;;  %v281_v39 = vadd.f32 %v9776_v35, %v9882_v2 }
  0x8a   :  { %v9782_v38 = vpop.f32.mrf.mxu1  ;;  %v226_v10 = vadd.f32 %v9780_v37, %v9856_v59 }
  0x8b   :  { %v255_v11 = vadd.f32 %v9782_v38, %v9856_v59  ;;  %v9931_v25 = vpop.eup %9122 }
  0x8c   :  { %9005 = vmatmul.msk.f32.gmra.mxu0 %vm95_vm1, %v9567_v14  ;;  %9126 = vtanh.f32 %v226_v10  ;;  %v9937_v27 = vpop.eup %9124 }
  0x8d   :  { %9010 = vmatmul.msk.f32.gmra.mxu1 %vm95_vm1, %v9567_v14  ;;  %9015 = vmatmul.msk.f32.gmra.mxu2 %vm95_vm1, %v9567_v14  ;;  %9128 = vtanh.f32 %v255_v11 }
  0x8e   :  { %9020 = vmatmul.msk.f32.gmra.mxu3 %vm95_vm1, %v9567_v14 }
  0x90   :  { %v9796_v40 = vpop.f32.mrf.mxu2 }
  0x91   :  { %v9798_v41 = vpop.f32.mrf.mxu3  ;;  %v228_v42 = vpop.f32.mrf.mxu0  ;;  %v284_v30 = vadd.f32 %v9796_v40, %v9856_v59 }
  0x92   :  { %v9800_v43 = vpop.f32.mrf.mxu1  ;;  %v229_v13 = vadd.f32 %v228_v42, %v9896_v8  ;;  %v9941_v29 = vpop.eup %9126  ;;  %v313_v33 = vadd.f32 %v9798_v41, %v9856_v59 }
  0x93   :  { %v258_v17 = vadd.f32 %v9800_v43, %v9896_v8  ;;  %v9947_v32 = vpop.eup %9128  ;;  %v310_v43 = vadd.f32 %v9778_v36, %v9882_v2 }
  0x94   :  { %9006 = vmatmul.msk.f32.gmra.mxu0 %vm95_vm1, %v9597_v19  ;;  %9130 = vtanh.f32 %v229_v13 }
  0x95   :  { %9011 = vmatmul.msk.f32.gmra.mxu1 %vm95_vm1, %v9597_v19  ;;  %9016 = vmatmul.msk.f32.gmra.mxu2 %vm95_vm1, %v9597_v19  ;;  %9132 = vtanh.f32 %v258_v17 }
  0x96   :  { %9021 = vmatmul.msk.f32.gmra.mxu3 %vm95_vm1, %v9597_v19 }
  0x98   :  { %v9818_v46 = vpop.f32.mrf.mxu2 }
  0x99   :  { %v9820_v47 = vpop.f32.mrf.mxu3  ;;  %v231_v48 = vpop.f32.mrf.mxu0  ;;  %v287_v26 = vadd.f32 %v9818_v46, %v9896_v8 }
  0x9a   :  { %v260_v49 = vpop.f32.mrf.mxu1  ;;  %v232_v18 = vadd.f32 %v231_v48, %v9872_v0  ;;  %v316_v28 = vadd.f32 %v9820_v47, %v9896_v8  ;;  %v9955_v38 = vpop.eup %9130 }
  0x9b   :  { %v261_v22 = vadd.f32 %v260_v49, %v9872_v0  ;;  %v9961_v42 = vpop.eup %9132 }
  0x9c   :  { %9007 = vmatmul.msk.f32.gmra.mxu0 %vm95_vm1, %v9610_v20  ;;  %9134 = vtanh.f32 %v232_v18 }
  0x9d   :  { %9012 = vmatmul.msk.f32.gmra.mxu1 %vm95_vm1, %v9610_v20  ;;  %9017 = vmatmul.msk.f32.gmra.mxu2 %vm95_vm1, %v9610_v20  ;;  %9136 = vtanh.f32 %v261_v22 }
  0x9e   :  { %9022 = vmatmul.msk.f32.gmra.mxu3 %vm95_vm1, %v9610_v20 }
  0xa0   :  { %v289_v51 = vpop.f32.mrf.mxu2 }
  0xa1   :  { %v318_v52 = vpop.f32.mrf.mxu3  ;;  %v9834_v53 = vpop.f32.mrf.mxu0  ;;  %v290_v23 = vadd.f32 %v289_v51, %v9872_v0 }
  0xa2   :  { %v9836_v54 = vpop.f32.mrf.mxu1  ;;  %v319_v24 = vadd.f32 %v318_v52, %v9872_v0  ;;  %v9965_v41 = vpop.eup %9134  ;;  %v339_v10 = vadd.f32 %v9834_v53, %v9882_v2 }
  0xa3   :  { %9138 = vtanh.f32 %v290_v23  ;;  %v9969_v44 = vpop.eup %9136  ;;  %v368_v11 = vadd.f32 %v9836_v54, %v9882_v2 }
  0xa4   :  { %9024 = vmatmul.msk.f32.vlgmr.msrb.gmra.mxu0 %vm95_vm1, %v9514_v1  ;;  %9140 = vtanh.f32 %v319_v24 }
  0xa5   :  { %9029 = vmatmul.msk.f32.vlgmr.msrb.gmra.mxu1 %vm95_vm1, %v9514_v1  ;;  %9034 = vmatmul.msk.f32.vlgmr.msrb.gmra.mxu2 %vm95_vm1, %v9514_v1  ;;  %9142 = vtanh.f32 %v287_v26 }
  0xa6   :  { %9039 = vmatmul.msk.f32.vlgmr.msrb.gmra.mxu3 %vm95_vm1, %v9514_v1  ;;  %9063 = vmatpush.msk.msrb.mxu0 %vm108_vm0, %v67_v55  ;;  %9144 = vtanh.f32 %v316_v28 }
  0xa7   :  { %9068 = vmatpush.msk.msrb.mxu1 %vm108_vm0, %v68_v56  ;;  %9073 = vmatpush.msk.msrb.mxu2 %vm108_vm0, %v69_v57  ;;  %9146 = vtanh.f32 %v284_v30 }
  0xa8   :  { %v9863_v60 = vpop.f32.mrf.mxu2  ;;  %9078 = vmatpush.msk.msrb.mxu3 %vm108_vm0, %v70_v58  ;;  %9148 = vtanh.f32 %v313_v33 }
  0xa9   :  { %v9866_v61 = vpop.f32.mrf.mxu3  ;;  %v9868_v62 = vpop.f32.mrf.mxu0  ;;  %9150 = vtanh.f32 %v281_v39 }
  0xaa   :  { %v9870_v63 = vpop.f32.mrf.mxu1  ;;  %v9975_v35 = vpop.eup %9138  ;;  %9152 = vtanh.f32 %v310_v43  ;;  %v342_v13 = vadd.f32 %v9868_v62, %v9856_v59 }
  0xab   :  { %v9980_v36 = vpop.eup %9140  ;;  %v371_v53 = vadd.f32 %v9870_v63, %v9856_v59  ;;  %9154 = vtanh.f32 %v339_v10 }
  0xac   :  { %9025 = vmatmul.msk.f32.gmra.mxu0 %vm95_vm1, %v9567_v14  ;;  %v9984_v45 = vpop.eup %9142  ;;  %9156 = vtanh.f32 %v368_v11  ;;  %v397_v11 = vadd.f32 %v9863_v60, %v9882_v2 }
  0xad   :  { %9030 = vmatmul.msk.f32.gmra.mxu1 %vm95_vm1, %v9567_v14  ;;  %9035 = vmatmul.msk.f32.gmra.mxu2 %vm95_vm1, %v9567_v14  ;;  %v9990_v47 = vpop.eup %9144  ;;  %9158 = vtanh.f32 %v342_v13 }
  0xae   :  { %9040 = vmatmul.msk.f32.gmra.mxu3 %vm95_vm1, %v9567_v14  ;;  %v9998_v50 = vpop.eup %9146  ;;  %9160 = vtanh.f32 %v371_v53 }
  0xaf   :  { %v10004_v52 = vpop.eup %9148 }
  0xb0   :  { %v9884_v3 = vpop.f32.mrf.mxu2  ;;  %v10008_v55 = vpop.eup %9150 }
  0xb1   :  { %v9886_v4 = vpop.f32.mrf.mxu3  ;;  %v9888_v5 = vpop.f32.mrf.mxu0 }
  0xb2   :  { %v9890_v6 = vpop.f32.mrf.mxu1  ;;  %v10012_v56 = vpop.eup %9152  ;;  %v345_v22 = vadd.f32 %v9888_v5, %v9896_v8  ;;  %v429_v10 = vadd.f32 %v9886_v4, %v9856_v59 }
  0xb3   :  { %v374_v62 = vadd.f32 %v9890_v6, %v9896_v8  ;;  %v10075_v6 = vpop.eup %9154 }
  0xb4   :  { %9026 = vmatmul.msk.f32.gmra.mxu0 %vm95_vm1, %v9597_v19  ;;  %9162 = vtanh.f32 %v345_v22  ;;  %v10083_v28 = vpop.eup %9156 }
  0xb5   :  { %9031 = vmatmul.msk.f32.gmra.mxu1 %vm95_vm1, %v9597_v19  ;;  %9036 = vmatmul.msk.f32.gmra.mxu2 %vm95_vm1, %v9597_v19  ;;  %9164 = vtanh.f32 %v374_v62  ;;  %13993 = vst [vmem:[#allocation9_spill] sm:$0xff] %v10083_v28 }
  0xb6   :  { %9041 = vmatmul.msk.f32.gmra.mxu3 %vm95_vm1, %v9597_v19 }
  0xb8   :  { %v9910_v12 = vpop.f32.mrf.mxu2 }
  0xb9   :  { %v9913_v15 = vpop.f32.mrf.mxu3  ;;  %v9915_v16 = vpop.f32.mrf.mxu0 }
  0xba   :  { %v9920_v21 = vpop.f32.mrf.mxu1  ;;  %v348_v24 = vadd.f32 %v9915_v16, %v9872_v0  ;;  %v403_v16 = vadd.f32 %v9910_v12, %v9896_v8  ;;  %v432_v30 = vadd.f32 %v9913_v15, %v9896_v8  ;;  %v400_v12 = vadd.f32 %v9884_v3, %v9856_v59 }
  0xbb   :  { %v377_v63 = vadd.f32 %v9920_v21, %v9872_v0  ;;  %v426_v3 = vadd.f32 %v9866_v61, %v9882_v2 }
  0xbc   :  { %9027 = vmatmul.msk.f32.gmra.mxu0 %vm95_vm1, %v9610_v20  ;;  %9166 = vtanh.f32 %v348_v24 }
  0xbd   :  { %9032 = vmatmul.msk.f32.gmra.mxu1 %vm95_vm1, %v9610_v20  ;;  %9037 = vmatmul.msk.f32.gmra.mxu2 %vm95_vm1, %v9610_v20  ;;  %9168 = vtanh.f32 %v377_v63 }
  0xbe   :  { %9042 = vmatmul.msk.f32.gmra.mxu3 %vm95_vm1, %v9610_v20 }
  0xc0   :  { %v9945_v31 = vpop.f32.mrf.mxu2 }
  0xc1   :  { %v9951_v34 = vpop.f32.mrf.mxu3  ;;  %v9953_v37 = vpop.f32.mrf.mxu0  ;;  %v406_v26 = vadd.f32 %v9945_v31, %v9872_v0 }
  0xc2   :  { %v9959_v40 = vpop.f32.mrf.mxu1  ;;  %v435_v5 = vadd.f32 %v9951_v34, %v9872_v0  ;;  %v10091_v34 = vpop.eup %9158 }
  0xc3   :  { %9170 = vtanh.f32 %v406_v26  ;;  %v10097_v43 = vpop.eup %9160 }
  0xc4   :  { %9044 = vmatmul.msk.f32.vlgmr.msra.gmra.mxu0 %vm95_vm1, %v9514_v1  ;;  %13994 = vst [vmem:[#allocation10_spill] sm:$0xff] %v10097_v43  ;;  %9172 = vtanh.f32 %v435_v5  ;;  %v10101_v15 = vpop.eup %9162 }
  0xc5   :  { %9049 = vmatmul.msk.f32.vlgmr.msra.gmra.mxu1 %vm95_vm1, %v9514_v1  ;;  %9054 = vmatmul.msk.f32.vlgmr.msra.gmra.mxu2 %vm95_vm1, %v9514_v1  ;;  %9174 = vtanh.f32 %v403_v16  ;;  %v10105_v13 = vpop.eup %9164 }
  0xc6   :  { %9059 = vmatmul.msk.f32.vlgmr.msra.gmra.mxu3 %vm95_vm1, %v9514_v1  ;;  %1284 = vmatpush.msra.mxu0 %v9965_v41  ;;  %9176 = vtanh.f32 %v432_v30  ;;  %v10109_v53 = vpop.eup %9166 }
  0xc7   :  { %1304 = vmatpush.msra.mxu1 %v9969_v44  ;;  %1324 = vmatpush.msra.mxu2 %v9975_v35  ;;  %9178 = vtanh.f32 %v400_v12  ;;  %v10113_v4 = vpop.eup %9168 }
  0xc8   :  { %1344 = vmatpush.msra.mxu3 %v9980_v36  ;;  %1285 = vmatpush.msra.mxu0 %v9955_v38  ;;  %v9988_v46 = vpop.f32.mrf.mxu2  ;;  %9180 = vtanh.f32 %v429_v10 }
  0xc9   :  { %1305 = vmatpush.msra.mxu1 %v9961_v42  ;;  %1325 = vmatpush.msra.mxu2 %v9984_v45  ;;  %v9994_v48 = vpop.f32.mrf.mxu3  ;;  %v9996_v49 = vpop.f32.mrf.mxu0  ;;  %9182 = vtanh.f32 %v397_v11 }
  0xca   :  { %1345 = vmatpush.msra.mxu3 %v9990_v47  ;;  %1286 = vmatpush.msra.mxu0 %v9941_v29  ;;  %v10002_v51 = vpop.f32.mrf.mxu1  ;;  %v10119_v60 = vpop.eup %9170  ;;  %9184 = vtanh.f32 %v426_v3 }
  0xcb   :  { %1306 = vmatpush.msra.mxu1 %v9947_v32  ;;  %1326 = vmatpush.msra.mxu2 %v9998_v50  ;;  %13995 = vst [vmem:[#allocation11_spill] sm:$0xff] %v10119_v60  ;;  %v10126_v22 = vpop.eup %9172 }
  0xcc   :  { %1346 = vmatpush.msra.mxu3 %v10004_v52  ;;  %1287 = vmatpush.msra.mxu0 %v9931_v25  ;;  %13996 = vst [vmem:[#allocation12_spill] sm:$0xff] %v10126_v22  ;;  %v10134_v63 = vpop.eup %9174 }
  0xcd   :  { %1307 = vmatpush.msra.mxu1 %v9937_v27  ;;  %1327 = vmatpush.msra.mxu2 %v10008_v55  ;;  %13997 = vst [vmem:[#allocation13_spill] sm:$0xff] %v10134_v63  ;;  %v10140_v26 = vpop.eup %9176 }
  0xce   :  { %1347 = vmatpush.msra.mxu3 %v10012_v56  ;;  %9045 = vmatmul.msk.f32.gmra.mxu0 %vm95_vm1, %v9567_v14  ;;  %13998 = vst [vmem:[#allocation14_spill] sm:$0xff] %v10140_v26  ;;  %v10144_v5 = vpop.eup %9178 }
  0xcf   :  { %9050 = vmatmul.msk.f32.gmra.mxu1 %vm95_vm1, %v9567_v14  ;;  %9055 = vmatmul.msk.f32.gmra.mxu2 %vm95_vm1, %v9567_v14  ;;  %13999 = vst [vmem:[#allocation15_spill] sm:$0xff] %v10144_v5  ;;  %v10148_v16 = vpop.eup %9180 }
  0xd0   :  { %9060 = vmatmul.msk.f32.gmra.mxu3 %vm95_vm1, %v9567_v14  ;;  %v10025_v57 = vpop.f32.mrf.mxu2  ;;  %14000 = vst [vmem:[#allocation16_spill] sm:$0xff] %v10148_v16  ;;  %v10152_v30 = vpop.eup %9182 }
  0xd1   :  { %v10027_v58 = vpop.f32.mrf.mxu3  ;;  %v10029_v7 = vpop.f32.mrf.mxu0  ;;  %14001 = vst [vmem:[#allocation17_spill] sm:$0xff] %v10152_v30 }
  0xd2   :  { %v10031_v9 = vpop.f32.mrf.mxu1  ;;  %v10156_v12 = vpop.eup %9184 }
  0xd3   :  { %14002 = vst [vmem:[#allocation18_spill] sm:$0xff] %v10156_v12 }
  0xd6   :  { %9046 = vmatmul.msk.f32.gmra.mxu0 %vm95_vm1, %v9597_v19 }
  0xd7   :  { %9051 = vmatmul.msk.f32.gmra.mxu1 %vm95_vm1, %v9597_v19  ;;  %9056 = vmatmul.msk.f32.gmra.mxu2 %vm95_vm1, %v9597_v19 }
  0xd8   :  { %9061 = vmatmul.msk.f32.gmra.mxu3 %vm95_vm1, %v9597_v19  ;;  %v10047_v17 = vpop.f32.mrf.mxu2 }
  0xd9   :  { %v10051_v18 = vpop.f32.mrf.mxu3  ;;  %v10053_v54 = vpop.f32.mrf.mxu0 }
  0xda   :  { %v10057_v23 = vpop.f32.mrf.mxu1 }
  0xde   :  { %9047 = vmatmul.msk.f32.gmra.mxu0 %vm95_vm1, %v9610_v20 }
  0xdf   :  { %9052 = vmatmul.msk.f32.gmra.mxu1 %vm95_vm1, %v9610_v20  ;;  %9057 = vmatmul.msk.f32.gmra.mxu2 %vm95_vm1, %v9610_v20 }
  0xe0   :  { %9062 = vmatmul.msk.f32.gmra.mxu3 %vm95_vm1, %v9610_v20  ;;  %v10081_v21 = vpop.f32.mrf.mxu2 }
  0xe1   :  { %v10087_v31 = vpop.f32.mrf.mxu3  ;;  %v10089_v33 = vpop.f32.mrf.mxu0 }
  0xe2   :  { %v10095_v39 = vpop.f32.mrf.mxu1 }
  0xe6   :  { %9064 = vmatmul.msk.f32.vlgmr.msrb.gmra.mxu0 %vm95_vm1, %v9514_v1 }
  0xe7   :  { %9069 = vmatmul.msk.f32.vlgmr.msrb.gmra.mxu1 %vm95_vm1, %v9514_v1  ;;  %9074 = vmatmul.msk.f32.vlgmr.msrb.gmra.mxu2 %vm95_vm1, %v9514_v1 }
  0xe8   :  { %9079 = vmatmul.msk.f32.vlgmr.msrb.gmra.mxu3 %vm95_vm1, %v9514_v1  ;;  %1364 = vmatpush.msrb.mxu0 %v10109_v53  ;;  %v10124_v61 = vpop.f32.mrf.mxu2 }
  0xe9   :  { %1384 = vmatpush.msrb.mxu1 %v10113_v4  ;;  %1404 = vmatpush.msrb.mxu2 %v10119_v60  ;;  %v10130_v62 = vpop.f32.mrf.mxu3  ;;  %v10132_v24 = vpop.f32.mrf.mxu0 }
  0xea   :  { %1424 = vmatpush.msrb.mxu3 %v10126_v22  ;;  %1365 = vmatpush.msrb.mxu0 %v10101_v15  ;;  %v10138_v1 = vpop.f32.mrf.mxu1  ;;  %v513_v22 = vadd.f32 %v9988_v46, %v9882_v2  ;;  %v545_v46 = vadd.f32 %v10027_v58, %v9856_v59  ;;  %v490_v58 = vadd.f32 %v10031_v9, %v9896_v8 }
  0xeb   :  { %1385 = vmatpush.msrb.mxu1 %v10105_v13  ;;  %1405 = vmatpush.msrb.mxu2 %v10134_v63  ;;  %v493_v9 = vadd.f32 %v10057_v23, %v9872_v0 }
  0xec   :  { %1425 = vmatpush.msrb.mxu3 %v10140_v26  ;;  %1366 = vmatpush.msrb.mxu0 %v10091_v34  ;;  %v484_v26 = vadd.f32 %v9959_v40, %v9882_v2 }
  0xed   :  { %1386 = vmatpush.msrb.mxu1 %v10097_v43  ;;  %1406 = vmatpush.msrb.mxu2 %v10144_v5  ;;  %v458_v5 = vadd.f32 %v9996_v49, %v9856_v59 }
  0xee   :  { %1426 = vmatpush.msrb.mxu3 %v10148_v16  ;;  %1367 = vmatpush.msrb.mxu0 %v10075_v6  ;;  %v455_v16 = vadd.f32 %v9953_v37, %v9882_v2  ;;  %v487_v37 = vadd.f32 %v10002_v51, %v9856_v59  ;;  %v461_v51 = vadd.f32 %v10029_v7, %v9896_v8 }
  0xef   :  { %1387 = vmatpush.msrb.mxu1 %v10083_v28  ;;  %1407 = vmatpush.msrb.mxu2 %v10152_v30  ;;  %v542_v30 = vadd.f32 %v9994_v48, %v9882_v2  ;;  %v548_v7 = vadd.f32 %v10051_v18, %v9896_v8 }
  0xf0   :  { %1427 = vmatpush.msrb.mxu3 %v10156_v12  ;;  %9065 = vmatmul.msk.f32.gmra.mxu0 %vm95_vm1, %v9567_v14  ;;  %v10163_v10 = vpop.f32.mrf.mxu2  ;;  %9186 = vtanh.f32 %v455_v16 }
  0xf1   :  { %9070 = vmatmul.msk.f32.gmra.mxu1 %vm95_vm1, %v9567_v14  ;;  %9075 = vmatmul.msk.f32.gmra.mxu2 %vm95_vm1, %v9567_v14  ;;  %v10169_v11 = vpop.f32.mrf.mxu3  ;;  %v10171_v3 = vpop.f32.mrf.mxu0  ;;  %9188 = vtanh.f32 %v484_v26  ;;  %v519_v26 = vadd.f32 %v10047_v17, %v9896_v8  ;;  %v522_v17 = vadd.f32 %v10081_v21, %v9872_v0 }
  0xf2   :  { %9080 = vmatmul.msk.f32.gmra.mxu3 %vm95_vm1, %v9567_v14  ;;  %v10177_v12 = vpop.f32.mrf.mxu1  ;;  %9190 = vtanh.f32 %v513_v22  ;;  %v516_v14 = vadd.f32 %v10025_v57, %v9856_v59 }
  0xf3   :  { %9192 = vtanh.f32 %v542_v30 }
  0xf4   :  { %9194 = vtanh.f32 %v458_v5 }
  0xf5   :  { %9196 = vtanh.f32 %v487_v37 }
  0xf6   :  { %v10209_v22 = vpop.eup %9186  ;;  %9198 = vtanh.f32 %v516_v14 }
  0xf7   :  { %v10213_v16 = vpop.eup %9188  ;;  %9200 = vtanh.f32 %v545_v46 }
  0xf8   :  { %9066 = vmatmul.msk.f32.gmra.mxu0 %vm95_vm1, %v9597_v19  ;;  %v10193_v40 = vpop.f32.mrf.mxu2  ;;  %v10217_v5 = vpop.eup %9190  ;;  %9202 = vtanh.f32 %v461_v51  ;;  %v571_v51 = vadd.f32 %v10089_v33, %v9882_v2  ;;  %v10264_v33 = vld [vmem:[%s13826_s4] sm:$0xf] }
  0xf9   :  { %9071 = vmatmul.msk.f32.gmra.mxu1 %vm95_vm1, %v9597_v19  ;;  %9076 = vmatmul.msk.f32.gmra.mxu2 %vm95_vm1, %v9597_v19  ;;  %v10201_v48 = vpop.f32.mrf.mxu3  ;;  %v579_v49 = vpop.f32.mrf.mxu0  ;;  %9204 = vtanh.f32 %v490_v58 }
  0xfa   :  { %9081 = vmatmul.msk.f32.gmra.mxu3 %vm95_vm1, %v9597_v19  ;;  %v608_v57 = vpop.f32.mrf.mxu1  ;;  %v464_v19 = vadd.f32 %v10053_v54, %v9872_v0  ;;  %v10221_v30 = vpop.eup %9192  ;;  %9206 = vtanh.f32 %v519_v26  ;;  %v551_v54 = vadd.f32 %v10087_v31, %v9872_v0  ;;  %v600_v26 = vadd.f32 %v10095_v39, %v9882_v2 }
  0xfb   :  { %v10225_v37 = vpop.eup %9194  ;;  %9208 = vtanh.f32 %v548_v7  ;;  %v577_v39 = vadd.f32 %v10171_v3, %v9896_v8  ;;  %v609_v3 = vadd.f32 %v608_v57, %v9872_v0 }
  0xfc   :  { %v10231_v14 = vpop.eup %9196  ;;  %9210 = vtanh.f32 %v464_v19  ;;  %v574_v19 = vadd.f32 %v10132_v24, %v9856_v59  ;;  %v606_v24 = vadd.f32 %v10177_v12, %v9896_v8 }
  0xfd   :  { %v10241_v21 = vpop.eup %9198  ;;  %9212 = vtanh.f32 %v493_v9 }
  0xfe   :  { %v10249_v31 = vpop.eup %9200  ;;  %9214 = vtanh.f32 %v522_v17 }
  0xff   :  { %14003 = vst [vmem:[#allocation19_spill] sm:$0xff] %v10249_v31  ;;  %v10253_v7 = vpop.eup %9202  ;;  %9216 = vtanh.f32 %v551_v54 }
 0x100   :  { %9067 = vmatmul.msk.f32.gmra.mxu0 %vm95_vm1, %v9610_v20  ;;  %v637_v18 = vpop.f32.mrf.mxu2  ;;  %v10257_v63 = vpop.eup %9204  ;;  %9218 = vtanh.f32 %v571_v51 }
 0x101   :  { %9072 = vmatmul.msk.f32.gmra.mxu1 %vm95_vm1, %v9610_v20  ;;  %9077 = vmatmul.msk.f32.gmra.mxu2 %vm95_vm1, %v9610_v20  ;;  %v666_v23 = vpop.f32.mrf.mxu3  ;;  %v10239_v46 = vpop.f32.mrf.mxu0  ;;  %9220 = vtanh.f32 %v600_v26 }
 0x102   :  { %9082 = vmatmul.msk.f32.gmra.mxu3 %vm95_vm1, %v9610_v20  ;;  %v10247_v58 = vpop.f32.mrf.mxu1  ;;  %v603_v20 = vadd.f32 %v10138_v1, %v9856_v59  ;;  %v10266_v9 = vpop.eup %9206  ;;  %9222 = vtanh.f32 %v574_v19  ;;  %v580_v1 = vadd.f32 %v579_v49, %v9872_v0  ;;  %v638_v19 = vadd.f32 %v637_v18, %v9872_v0 }
 0x103   :  { %v10270_v17 = vpop.eup %9208  ;;  %v667_v43 = vadd.f32 %v666_v23, %v9872_v0  ;;  %v635_v18 = vadd.f32 %v10193_v40, %v9896_v8  ;;  %v632_v40 = vadd.f32 %v10163_v10, %v9856_v59  ;;  %v629_v10 = vadd.f32 %v10124_v61, %v9882_v2 }
 0x104   :  { %14004 = vst [vmem:[#allocation20_spill] sm:$0xff] %v10270_v17  ;;  %v10274_v54 = vpop.eup %9210  ;;  %9224 = vtanh.f32 %v603_v20 }
 0x105   :  { %v10281_v51 = vpop.eup %9212  ;;  %9226 = vtanh.f32 %v577_v39 }
 0x106   :  { %v10292_v49 = vpop.eup %9214  ;;  %9228 = vtanh.f32 %v606_v24  ;;  %v664_v24 = vadd.f32 %v10201_v48, %v9896_v8  ;;  %v661_v48 = vadd.f32 %v10169_v11, %v9856_v59 }
 0x107   :  { %v10300_v20 = vpop.eup %9216  ;;  %9230 = vtanh.f32 %v580_v1 }
 0x108   :  { %9083 = vmatmul.msk.f32.vlgmr.msra.gmra.mxu0 %vm1268_vm2, %v10264_v33  ;;  %v10279_v60 = vpop.f32.mrf.mxu2  ;;  %14005 = vst [vmem:[#allocation21_spill] sm:$0xff] %v10300_v20  ;;  %v10305_v28 = vpop.eup %9218  ;;  %9232 = vtanh.f32 %v609_v3 }
 0x109   :  { %9084 = vmatmul.msk.f32.vlgmr.msra.gmra.mxu1 %vm1268_vm2, %v10264_v33  ;;  %9085 = vmatmul.msk.f32.vlgmr.msra.gmra.mxu2 %vm1268_vm2, %v10264_v33  ;;  %v10288_v12 = vpop.f32.mrf.mxu3  ;;  %v10290_v26 = vpop.f32.mrf.mxu0  ;;  %14006 = vst [vmem:[#allocation22_spill] sm:$0xff] %v10305_v28  ;;  %9234 = vtanh.f32 %v638_v19 }
 0x10a   :  { %9086 = vmatmul.msk.f32.vlgmr.msra.gmra.mxu3 %vm1268_vm2, %v10264_v33  ;;  %1444 = vmatpush.msra.mxu0 %v10274_v54  ;;  %v10298_v57 = vpop.f32.mrf.mxu1  ;;  %v10311_v39 = vpop.eup %9220  ;;  %9236 = vtanh.f32 %v667_v43  ;;  %v658_v43 = vadd.f32 %v10130_v62, %v9882_v2 }
 0x10b   :  { %1464 = vmatpush.msra.mxu1 %v10281_v51  ;;  %1484 = vmatpush.msra.mxu2 %v10292_v49  ;;  %14007 = vst [vmem:[#allocation23_spill] sm:$0xff] %v10311_v39  ;;  %v10317_v23 = vpop.eup %9222  ;;  %9238 = vtanh.f32 %v635_v18 }
 0x10c   :  { %1504 = vmatpush.msra.mxu3 %v10300_v20  ;;  %1445 = vmatpush.msra.mxu0 %v10253_v7  ;;  %14008 = vst [vmem:[#allocation24_spill] sm:$0xff] %v10317_v23  ;;  %v10323_v1 = vpop.eup %9224  ;;  %9240 = vtanh.f32 %v664_v24 }
 0x10d   :  { %1465 = vmatpush.msra.mxu1 %v10257_v63  ;;  %1485 = vmatpush.msra.mxu2 %v10266_v9  ;;  %14009 = vst [vmem:[#allocation25_spill] sm:$0xff] %v10323_v1  ;;  %v10329_v3 = vpop.eup %9226  ;;  %9242 = vtanh.f32 %v632_v40 }
 0x10e   :  { %1505 = vmatpush.msra.mxu3 %v10270_v17  ;;  %1446 = vmatpush.msra.mxu0 %v10225_v37  ;;  %14010 = vst [vmem:[#allocation26_spill] sm:$0xff] %v10329_v3  ;;  %v10337_v17 = vpop.eup %9228  ;;  %9244 = vtanh.f32 %v661_v48 }
 0x10f   :  { %1466 = vmatpush.msra.mxu1 %v10231_v14  ;;  %1486 = vmatpush.msra.mxu2 %v10241_v21  ;;  %14011 = vst [vmem:[#allocation27_spill] sm:$0xff] %v10337_v17  ;;  %v10345_v18 = vpop.eup %9230  ;;  %9246 = vtanh.f32 %v629_v10  ;;  %v687_v10 = vadd.f32 %v10239_v46, %v9882_v2 }
 0x110   :  { %1506 = vmatpush.msra.mxu3 %v10249_v31  ;;  %1447 = vmatpush.msra.mxu0 %v10209_v22  ;;  %v10335_v19 = vpop.f32.mrf.mxu2  ;;  %14012 = vst [vmem:[#allocation28_spill] sm:$0xff] %v10345_v18  ;;  %v10350_v20 = vpop.eup %9232  ;;  %9248 = vtanh.f32 %v658_v43 }
 0x111   :  { %1467 = vmatpush.msra.mxu1 %v10213_v16  ;;  %1487 = vmatpush.msra.mxu2 %v10217_v5  ;;  %v10343_v11 = vpop.f32.mrf.mxu3  ;;  %v692_v61 = vpop.f32.mrf.mxu0  ;;  %14013 = vst [vmem:[#allocation29_spill] sm:$0xff] %v10350_v20  ;;  %9250 = vtanh.f32 %v687_v10 }
 0x112   :  { %1507 = vmatpush.msra.mxu3 %v10221_v30  ;;  %9087 = vmatmul.msk.f32.vlgmr.msrb.gmra.mxu0 %vm1268_vm2, %v10264_v33  ;;  %v721_v31 = vpop.f32.mrf.mxu1  ;;  %v10356_v62 = vpop.eup %9234 }
 0x113   :  { %9088 = vmatmul.msk.f32.vlgmr.msrb.gmra.mxu1 %vm1268_vm2, %v10264_v33  ;;  %9089 = vmatmul.msk.f32.vlgmr.msrb.gmra.mxu2 %vm1268_vm2, %v10264_v33  ;;  %14014 = vst [vmem:[#allocation30_spill] sm:$0xff] %v10356_v62  ;;  %v10361_v24 = vpop.eup %9236 }
 0x114   :  { %9090 = vmatmul.msk.f32.vlgmr.msrb.gmra.mxu3 %vm1268_vm2, %v10264_v33  ;;  %1524 = vmatpush.msrb.mxu0 %v10345_v18  ;;  %14015 = vst [vmem:[#allocation31_spill] sm:$0xff] %v10361_v24  ;;  %v10365_v40 = vpop.eup %9238 }
 0x115   :  { %1544 = vmatpush.msrb.mxu1 %v10350_v20  ;;  %1564 = vmatpush.msrb.mxu2 %v10356_v62  ;;  %14016 = vst [vmem:[#allocation32_spill] sm:$0xff] %v10365_v40  ;;  %v10369_v48 = vpop.eup %9240  ;;  %v716_v62 = vadd.f32 %v10247_v58, %v9882_v2 }
 0x116   :  { %1584 = vmatpush.msrb.mxu3 %v10361_v24  ;;  %1525 = vmatpush.msrb.mxu0 %v10329_v3  ;;  %14017 = vst [vmem:[#allocation33_spill] sm:$0xff] %v10369_v48  ;;  %v10375_v43 = vpop.eup %9242 }
 0x117   :  { %1545 = vmatpush.msrb.mxu1 %v10337_v17  ;;  %1565 = vmatpush.msrb.mxu2 %v10365_v40  ;;  %14018 = vst [vmem:[#allocation34_spill] sm:$0xff] %v10375_v43  ;;  %v10381_v20 = vpop.eup %9244  ;;  %9252 = vtanh.f32 %v716_v62 }
 0x118   :  { %1585 = vmatpush.msrb.mxu3 %v10369_v48  ;;  %1526 = vmatpush.msrb.mxu0 %v10317_v23  ;;  %v750_v24 = vpop.f32.mrf.mxu2  ;;  %14019 = vst [vmem:[#allocation35_spill] sm:$0xff] %v10381_v20  ;;  %v10385_v3 = vpop.eup %9246  ;;  %v693_v23 = vadd.f32 %v692_v61, %v9896_v8  ;;  %v719_v61 = vadd.f32 %v10298_v57, %v9856_v59 }
 0x119   :  { %1546 = vmatpush.msrb.mxu1 %v10323_v1  ;;  %1566 = vmatpush.msrb.mxu2 %v10375_v43  ;;  %v779_v46 = vpop.f32.mrf.mxu3  ;;  %v695_v17 = vpop.f32.mrf.mxu0  ;;  %14020 = vst [vmem:[#allocation36_spill] sm:$0xff] %v10385_v3  ;;  %v722_v1 = vadd.f32 %v721_v31, %v9896_v8 }
 0x11a   :  { %1586 = vmatpush.msrb.mxu3 %v10381_v20  ;;  %1527 = vmatpush.msrb.mxu0 %v10305_v28  ;;  %v696_v58 = vadd.f32 %v695_v17, %v9872_v0  ;;  %v724_v48 = vpop.f32.mrf.mxu1  ;;  %v10390_v40 = vpop.eup %9248  ;;  %v690_v17 = vadd.f32 %v10290_v26, %v9856_v59  ;;  %v751_v26 = vadd.f32 %v750_v24, %v9896_v8 }
 0x11b   :  { %14021 = vst [vmem:[#allocation37_spill] sm:$0xff] %v10390_v40  ;;  %1547 = vmatpush.msrb.mxu1 %v10311_v39  ;;  %1567 = vmatpush.msrb.mxu2 %v10385_v3  ;;  %v725_v43 = vadd.f32 %v724_v48, %v9872_v0  ;;  %v10410_v62 = vpop.eup %9250  ;;  %v780_v57 = vadd.f32 %v779_v46, %v9896_v8 }
 0x11c   :  { %1587 = vmatpush.msrb.mxu3 %v10390_v40  ;;  %9091 = vmatmul.msk.f32.vlgmr.msra.gmra.mxu0 %vm1268_vm2, %v10264_v33  ;;  %9254 = vtanh.f32 %v696_v58  ;;  %14022 = vst [vmem:[#allocation38_spill] sm:$0xff] %v10410_v62  ;;  %v745_v46 = vadd.f32 %v10279_v60, %v9882_v2 }
 0x11d   :  { %9092 = vmatmul.msk.f32.vlgmr.msra.gmra.mxu1 %vm1268_vm2, %v10264_v33  ;;  %9093 = vmatmul.msk.f32.vlgmr.msra.gmra.mxu2 %vm1268_vm2, %v10264_v33  ;;  %9256 = vtanh.f32 %v725_v43  ;;  %v10416_v40 = vpop.eup %9252 }
 0x11e   :  { %9094 = vmatmul.msk.f32.vlgmr.msra.gmra.mxu3 %vm1268_vm2, %v10264_v33  ;;  %9258 = vtanh.f32 %v693_v23  ;;  %14023 = vst [vmem:[#allocation39_spill] sm:$0xff] %v10416_v40 }
 0x11f   :  { %9260 = vtanh.f32 %v722_v1 }
 0x120   :  { %v753_v31 = vpop.f32.mrf.mxu2  ;;  %9262 = vtanh.f32 %v690_v17  ;;  %v748_v17 = vadd.f32 %v10335_v19, %v9856_v59 }
 0x121   :  { %v754_v48 = vadd.f32 %v753_v31, %v9872_v0  ;;  %v782_v10 = vpop.f32.mrf.mxu3  ;;  %v10414_v58 = vpop.f32.mrf.mxu0  ;;  %9264 = vtanh.f32 %v719_v61  ;;  %v777_v31 = vadd.f32 %v10343_v11, %v9856_v59 }
 0x122   :  { %v783_v43 = vadd.f32 %v782_v10, %v9872_v0  ;;  %v831_v23 = vpop.f32.mrf.mxu1  ;;  %v10420_v1 = vpop.eup %9254 }
 0x123   :  { %14024 = vst [vmem:[#allocation40_spill] sm:$0xff] %v10420_v1  ;;  %9266 = vtanh.f32 %v754_v48  ;;  %v10424_v24 = vpop.eup %9256  ;;  %1604 = vmatpush.msra.mxu0 %v10420_v1  ;;  %v774_v48 = vadd.f32 %v10288_v12, %v9882_v2 }
 0x124   :  { %14025 = vst [vmem:[#allocation41_spill] sm:$0xff] %v10424_v24  ;;  %9268 = vtanh.f32 %v783_v43  ;;  %v10429_v61 = vpop.eup %9258  ;;  %1624 = vmatpush.msra.mxu1 %v10424_v24  ;;  %9095 = vmatmul.msk.f32.vlgmr.msrb.gmra.mxu0 %vm1268_vm2, %v10264_v33 }
 0x125   :  { %14026 = vst [vmem:[#allocation42_spill] sm:$0xff] %v10429_v61  ;;  %9270 = vtanh.f32 %v751_v26  ;;  %v10436_v19 = vpop.eup %9260  ;;  %1605 = vmatpush.msra.mxu0 %v10429_v61  ;;  %9096 = vmatmul.msk.f32.vlgmr.msrb.gmra.mxu1 %vm1268_vm2, %v10264_v33 }
 0x126   :  { %14027 = vst [vmem:[#allocation43_spill] sm:$0xff] %v10436_v19  ;;  %9272 = vtanh.f32 %v780_v57  ;;  %v10443_v11 = vpop.eup %9262  ;;  %1625 = vmatpush.msra.mxu1 %v10436_v19  ;;  %9097 = vmatmul.msk.f32.vlgmr.msrb.gmra.mxu2 %vm1268_vm2, %v10264_v33  ;;  %v803_v19 = vadd.f32 %v10414_v58, %v9882_v2 }
 0x127   :  { %14028 = vst [vmem:[#allocation44_spill] sm:$0xff] %v10443_v11  ;;  %9274 = vtanh.f32 %v748_v17  ;;  %v10448_v60 = vpop.eup %9264  ;;  %1606 = vmatpush.msra.mxu0 %v10443_v11  ;;  %9098 = vmatmul.msk.f32.vlgmr.msrb.gmra.mxu3 %vm1268_vm2, %v10264_v33 }
 0x128   :  { %14029 = vst [vmem:[#allocation45_spill] sm:$0xff] %v10448_v60  ;;  %9276 = vtanh.f32 %v777_v31  ;;  %v10450_v26 = vpop.f32.mrf.mxu2  ;;  %1626 = vmatpush.msra.mxu1 %v10448_v60 }
 0x129   :  { %v10455_v12 = vpop.eup %9266  ;;  %9278 = vtanh.f32 %v745_v46  ;;  %v10457_v10 = vpop.f32.mrf.mxu3  ;;  %1607 = vmatpush.msra.mxu0 %v10410_v62 }
 0x12a   :  { %14030 = vst [vmem:[#allocation46_spill] sm:$0xff] %v10455_v12  ;;  %v805_v57 = vpop.f32.mrf.mxu0  ;;  %v10460_v43 = vpop.eup %9268  ;;  %9280 = vtanh.f32 %v774_v48  ;;  %1644 = vmatpush.msra.mxu2 %v10455_v12  ;;  %1627 = vmatpush.msra.mxu1 %v10416_v40 }
 0x12b   :  { %14031 = vst [vmem:[#allocation47_spill] sm:$0xff] %v10460_v43  ;;  %v834_v17 = vpop.f32.mrf.mxu1  ;;  %v10464_v31 = vpop.eup %9270  ;;  %1664 = vmatpush.msra.mxu3 %v10460_v43  ;;  %9282 = vtanh.f32 %v803_v19  ;;  %v806_v3 = vadd.f32 %v805_v57, %v9856_v59 }
 0x12c   :  { %14032 = vst [vmem:[#allocation48_spill] sm:$0xff] %v10464_v31  ;;  %v10468_v46 = vpop.eup %9272  ;;  %1645 = vmatpush.msra.mxu2 %v10464_v31  ;;  %9099 = vmatmul.msk.f32.vlgmr.msra.gmra.mxu0 %vm1268_vm2, %v10264_v33  ;;  %v835_v58 = vadd.f32 %v834_v17, %v9856_v59 }
 0x12d   :  { %14033 = vst [vmem:[#allocation49_spill] sm:$0xff] %v10468_v46  ;;  %v10471_v60 = vpop.eup %9274  ;;  %1665 = vmatpush.msra.mxu3 %v10468_v46  ;;  %9100 = vmatmul.msk.f32.vlgmr.msra.gmra.mxu1 %vm1268_vm2, %v10264_v33 }
 0x12e   :  { %14034 = vst [vmem:[#allocation50_spill] sm:$0xff] %v10471_v60  ;;  %v10476_v48 = vpop.eup %9276  ;;  %1646 = vmatpush.msra.mxu2 %v10471_v60 }
 0x12f   :  { %14035 = vst [vmem:[#allocation51_spill] sm:$0xff] %v10476_v48  ;;  %v10481_v12 = vpop.eup %9278  ;;  %1666 = vmatpush.msra.mxu3 %v10476_v48  ;;  %v832_v48 = vadd.f32 %v831_v23, %v9882_v2 }
 0x130   :  { %14036 = vst [vmem:[#allocation52_spill] sm:$0xff] %v10481_v12  ;;  %v10484_v43 = vpop.eup %9280  ;;  %v863_v31 = vpop.f32.mrf.mxu2  ;;  %1647 = vmatpush.msra.mxu2 %v10481_v12 }
 0x131   :  { %14037 = vst [vmem:[#allocation53_spill] sm:$0xff] %v10484_v43  ;;  %v892_v46 = vpop.f32.mrf.mxu3  ;;  %1667 = vmatpush.msra.mxu3 %v10484_v43  ;;  %9101 = vmatmul.msk.f32.vlgmr.msra.gmra.mxu2 %vm1268_vm2, %v10264_v33  ;;  %9284 = vtanh.f32 %v832_v48  ;;  %v10501_v39 = vpop.eup %9282 }
 0x132   :  { %v808_v40 = vpop.f32.mrf.mxu0  ;;  %9102 = vmatmul.msk.f32.vlgmr.msra.gmra.mxu3 %vm1268_vm2, %v10264_v33  ;;  %14038 = vst [vmem:[#allocation54_spill] sm:$0xff] %v10501_v39 }
 0x133   :  { %v837_v60 = vpop.f32.mrf.mxu1  ;;  %v809_v43 = vadd.f32 %v808_v40, %v9896_v8 }
 0x134   :  { %v838_v20 = vadd.f32 %v837_v60, %v9896_v8 }
 0x137   :  { %v10505_v48 = vpop.eup %9284 }
 0x138   :  { %v866_v24 = vpop.f32.mrf.mxu2  ;;  %14039 = vst [vmem:[#allocation55_spill] sm:$0xff] %v10505_v48 }
 0x139   :  { %v895_v62 = vpop.f32.mrf.mxu3  ;;  %v867_v19 = vadd.f32 %v866_v24, %v9896_v8  ;;  %v893_v24 = vadd.f32 %v892_v46, %v9856_v59 }
 0x13a   :  { %v811_v11 = vpop.f32.mrf.mxu0  ;;  %v896_v60 = vadd.f32 %v895_v62, %v9896_v8  ;;  %v861_v62 = vadd.f32 %v10450_v26, %v9882_v2 }
 0x13b   :  { %v812_v12 = vadd.f32 %v811_v11, %v9872_v0  ;;  %v840_v61 = vpop.f32.mrf.mxu1 }
 0x13c   :  { %v841_v1 = vadd.f32 %v840_v61, %v9872_v0 }
 0x13d   :  { %9286 = vtanh.f32 %v812_v12 }
 0x13e   :  { %9288 = vtanh.f32 %v841_v1 }
 0x13f   :  { %9290 = vtanh.f32 %v809_v43 }
 0x140   :  { %9292 = vtanh.f32 %v838_v20  ;;  %v869_v23 = vpop.f32.mrf.mxu2  ;;  %v864_v20 = vadd.f32 %v863_v31, %v9856_v59  ;;  %v890_v31 = vadd.f32 %v10457_v10, %v9882_v2 }
 0x141   :  { %9294 = vtanh.f32 %v806_v3  ;;  %v870_v40 = vadd.f32 %v869_v23, %v9872_v0  ;;  %v898_v61 = vpop.f32.mrf.mxu3 }
 0x142   :  { %v918_v11 = vpop.f32.mrf.mxu0  ;;  %9296 = vtanh.f32 %v835_v58  ;;  %v899_v12 = vadd.f32 %v898_v61, %v9872_v0 }
 0x143   :  { %v947_v1 = vpop.f32.mrf.mxu1  ;;  %v10509_v57 = vpop.eup %9286  ;;  %9298 = vtanh.f32 %v870_v40 }
 0x144   :  { %14040 = vst [vmem:[#allocation56_spill] sm:$0xff] %v10509_v57  ;;  %v10512_v3 = vpop.eup %9288  ;;  %9300 = vtanh.f32 %v899_v12  ;;  %1684 = vmatpush.msrb.mxu0 %v10509_v57 }
 0x145   :  { %14041 = vst [vmem:[#allocation57_spill] sm:$0xff] %v10512_v3  ;;  %v10516_v43 = vpop.eup %9290  ;;  %9302 = vtanh.f32 %v867_v19  ;;  %1704 = vmatpush.msrb.mxu1 %v10512_v3 }
 0x146   :  { %14042 = vst [vmem:[#allocation58_spill] sm:$0xff] %v10516_v43  ;;  %v10521_v17 = vpop.eup %9292  ;;  %9304 = vtanh.f32 %v896_v60  ;;  %1685 = vmatpush.msrb.mxu0 %v10516_v43 }
 0x147   :  { %14043 = vst [vmem:[#allocation59_spill] sm:$0xff] %v10521_v17  ;;  %v10526_v46 = vpop.eup %9294  ;;  %9306 = vtanh.f32 %v864_v20  ;;  %1705 = vmatpush.msrb.mxu1 %v10521_v17 }
 0x148   :  { %14044 = vst [vmem:[#allocation60_spill] sm:$0xff] %v10526_v46  ;;  %v10529_v58 = vpop.eup %9296  ;;  %9308 = vtanh.f32 %v893_v24  ;;  %v10531_v26 = vpop.f32.mrf.mxu2  ;;  %1686 = vmatpush.msrb.mxu0 %v10526_v46 }
 0x149   :  { %14045 = vst [vmem:[#allocation61_spill] sm:$0xff] %v10529_v58  ;;  %v10534_v23 = vpop.eup %9298  ;;  %9310 = vtanh.f32 %v861_v62  ;;  %v10536_v19 = vpop.f32.mrf.mxu3  ;;  %1706 = vmatpush.msrb.mxu1 %v10529_v58 }
 0x14a   :  { %14046 = vst [vmem:[#allocation62_spill] sm:$0xff] %v10534_v23  ;;  %v10539_v10 = vpop.eup %9300  ;;  %9312 = vtanh.f32 %v890_v31  ;;  %1687 = vmatpush.msrb.mxu0 %v10501_v39  ;;  %1724 = vmatpush.msrb.mxu2 %v10534_v23  ;;  %v919_v23 = vadd.f32 %v918_v11, %v9882_v2 }
 0x14b   :  { %14047 = vst [vmem:[#allocation63_spill] sm:$0xff] %v10539_v10  ;;  %v10543_v40 = vpop.eup %9302  ;;  %v921_v61 = vpop.f32.mrf.mxu0  ;;  %1707 = vmatpush.msrb.mxu1 %v10505_v48  ;;  %1744 = vmatpush.msrb.mxu3 %v10539_v10 }
 0x14c   :  { %14048 = vst [vmem:[#allocation64_spill] sm:$0xff] %v10543_v40  ;;  %v10547_v60 = vpop.eup %9304  ;;  %v950_v12 = vpop.f32.mrf.mxu1  ;;  %1725 = vmatpush.msrb.mxu2 %v10543_v40  ;;  %9103 = vmatmul.msk.f32.vlgmr.msrb.gmra.mxu0 %vm1268_vm2, %v10264_v33  ;;  %9314 = vtanh.f32 %v919_v23  ;;  %v922_v57 = vadd.f32 %v921_v61, %v9856_v59 }
 0x14d   :  { %14049 = vst [vmem:[#allocation65_spill] sm:$0xff] %v10547_v60  ;;  %v10552_v20 = vpop.eup %9306  ;;  %1745 = vmatpush.msrb.mxu3 %v10547_v60  ;;  %9104 = vmatmul.msk.f32.vlgmr.msrb.gmra.mxu1 %vm1268_vm2, %v10264_v33  ;;  %v951_v11 = vadd.f32 %v950_v12, %v9856_v59 }
 0x14e   :  { %14050 = vst [vmem:[#allocation66_spill] sm:$0xff] %v10552_v20  ;;  %v10557_v24 = vpop.eup %9308  ;;  %1726 = vmatpush.msrb.mxu2 %v10552_v20 }
 0x14f   :  { %14051 = vst [vmem:[#allocation67_spill] sm:$0xff] %v10557_v24  ;;  %v10560_v62 = vpop.eup %9310  ;;  %1746 = vmatpush.msrb.mxu3 %v10557_v24  ;;  %v948_v24 = vadd.f32 %v947_v1, %v9882_v2  ;;  %v1262_v1 = vld [vmem:[%s13827_s5] sm:$0xf] }
 0x150   :  { %14052 = vst [vmem:[#allocation68_spill] sm:$0xff] %v10560_v62  ;;  %v10563_v31 = vpop.eup %9312  ;;  %1727 = vmatpush.msrb.mxu2 %v10560_v62  ;;  %1265 = vperm.xlu2 %9121, %v1262_v1  }
 0x151   :  { %14053 = vst [vmem:[#allocation69_spill] sm:$0xff] %v10563_v31  ;;  %1747 = vmatpush.msrb.mxu3 %v10563_v31  ;;  %9105 = vmatmul.msk.f32.vlgmr.msrb.gmra.mxu2 %vm1268_vm2, %v10264_v33  ;;  %9316 = vtanh.f32 %v948_v24 }
 0x152   :  { %v979_v60 = vpop.f32.mrf.mxu2  ;;  %9106 = vmatmul.msk.f32.vlgmr.msrb.gmra.mxu3 %vm1268_vm2, %v10264_v33  ;;  %v10582_v23 = vpop.eup %9314 }
 0x153   :  { %v1008_v10 = vpop.f32.mrf.mxu3  ;;  %v924_v40 = vpop.f32.mrf.mxu0  ;;  %14054 = vst [vmem:[#allocation70_spill] sm:$0xff] %v10582_v23 }
 0x154   :  { %v953_v20 = vpop.f32.mrf.mxu1  ;;  %v925_v3 = vadd.f32 %v924_v40, %v9896_v8 }
 0x155   :  { %v954_v46 = vadd.f32 %v953_v20, %v9896_v8 }
 0x157   :  { %v10588_v12 = vpop.eup %9316 }
 0x158   :  { %14055 = vst [vmem:[#allocation71_spill] sm:$0xff] %v10588_v12 }
 0x15a   :  { %v982_v48 = vpop.f32.mrf.mxu2 }
 0x15b   :  { %v1011_v58 = vpop.f32.mrf.mxu3  ;;  %v927_v17 = vpop.f32.mrf.mxu0  ;;  %v983_v40 = vadd.f32 %v982_v48, %v9896_v8  ;;  %v1009_v48 = vadd.f32 %v1008_v10, %v9856_v59 }
 0x15c   :  { %v928_v62 = vadd.f32 %v927_v17, %v9872_v0  ;;  %v956_v31 = vpop.f32.mrf.mxu1 }
 0x15d   :  { %v957_v39 = vadd.f32 %v956_v31, %v9872_v0  ;;  %v980_v31 = vadd.f32 %v979_v60, %v9856_v59  ;;  %v1006_v60 = vadd.f32 %v10536_v19, %v9882_v2 }
 0x15e   :  { %9318 = vtanh.f32 %v928_v62 }
 0x15f   :  { %9320 = vtanh.f32 %v957_v39  ;;  %v1012_v39 = vadd.f32 %v1011_v58, %v9896_v8  ;;  %v977_v58 = vadd.f32 %v10531_v26, %v9882_v2 }
 0x160   :  { %9322 = vtanh.f32 %v925_v3 }
 0x161   :  { %9324 = vtanh.f32 %v954_v46 }
 0x162   :  { %v985_v17 = vpop.f32.mrf.mxu2  ;;  %9326 = vtanh.f32 %v922_v57 }
 0x163   :  { %v986_v20 = vadd.f32 %v985_v17, %v9872_v0  ;;  %v1014_v61 = vpop.f32.mrf.mxu3  ;;  %v10586_v24 = vpop.f32.mrf.mxu0  ;;  %9328 = vtanh.f32 %v951_v11 }
 0x164   :  { %v1015_v3 = vadd.f32 %v1014_v61, %v9872_v0  ;;  %v1063_v62 = vpop.f32.mrf.mxu1  ;;  %v10592_v46 = vpop.eup %9318 }
 0x165   :  { %14056 = vst [vmem:[#allocation72_spill] sm:$0xff] %v10592_v46  ;;  %9330 = vtanh.f32 %v986_v20  ;;  %v10595_v57 = vpop.eup %9320  ;;  %1764 = vmatpush.msra.mxu0 %v10592_v46  ;;  %v2110_v46 = vmul.f32 %v9931_v25, %v9931_v25 }
 0x166   :  { %14057 = vst [vmem:[#allocation73_spill] sm:$0xff] %v10595_v57  ;;  %9332 = vtanh.f32 %v1015_v3  ;;  %v10599_v1 = vpop.eup %9322  ;;  %1784 = vmatpush.msra.mxu1 %v10595_v57 }
 0x167   :  { %14058 = vst [vmem:[#allocation74_spill] sm:$0xff] %v10599_v1  ;;  %9334 = vtanh.f32 %v983_v40  ;;  %v10604_v11 = vpop.eup %9324  ;;  %1765 = vmatpush.msra.mxu0 %v10599_v1  ;;  %v2238_v25 = vsub.f32 1.0, %v2110_v46 }
 0x168   :  { %14059 = vst [vmem:[#allocation75_spill] sm:$0xff] %v10604_v11  ;;  %9336 = vtanh.f32 %v1012_v39  ;;  %v10609_v10 = vpop.eup %9326  ;;  %1785 = vmatpush.msra.mxu1 %v10604_v11 }
 0x169   :  { %14060 = vst [vmem:[#allocation76_spill] sm:$0xff] %v10609_v10  ;;  %9338 = vtanh.f32 %v980_v31  ;;  %v10612_v17 = vpop.eup %9328  ;;  %1766 = vmatpush.msra.mxu0 %v10609_v10 }
 0x16a   :  { %14061 = vst [vmem:[#allocation77_spill] sm:$0xff] %v10612_v17  ;;  %9340 = vtanh.f32 %v1009_v48  ;;  %v10614_v26 = vpop.f32.mrf.mxu2  ;;  %1786 = vmatpush.msra.mxu1 %v10612_v17  ;;  %v2206_v17 = vmul.f32 %v9965_v41, %v9965_v41 }
 0x16b   :  { %v10617_v40 = vpop.eup %9330  ;;  %9342 = vtanh.f32 %v977_v58  ;;  %v10619_v20 = vpop.f32.mrf.mxu3  ;;  %1767 = vmatpush.msra.mxu0 %v10582_v23 }
 0x16c   :  { %14062 = vst [vmem:[#allocation78_spill] sm:$0xff] %v10617_v40  ;;  %v10622_v19 = vpop.eup %9332  ;;  %9344 = vtanh.f32 %v1006_v60  ;;  %1804 = vmatpush.msra.mxu2 %v10617_v40  ;;  %1787 = vmatpush.msra.mxu1 %v10588_v12  ;;  %v2334_v11 = vsub.f32 1.0, %v2206_v17  ;;  %v1064_v12 = vadd.f32 %v1063_v62, %v9882_v2 }
 0x16d   :  { %14063 = vst [vmem:[#allocation79_spill] sm:$0xff] %v10622_v19  ;;  %v10626_v61 = vpop.eup %9334  ;;  %v1037_v39 = vpop.f32.mrf.mxu0  ;;  %1824 = vmatpush.msra.mxu3 %v10622_v19  ;;  %9107 = vmatmul.msk.f32.vlgmr.msra.gmra.mxu0 %vm1268_vm2, %v10264_v33 }
 0x16e   :  { %14064 = vst [vmem:[#allocation80_spill] sm:$0xff] %v10626_v61  ;;  %v10630_v3 = vpop.eup %9336  ;;  %v1066_v31 = vpop.f32.mrf.mxu1  ;;  %1805 = vmatpush.msra.mxu2 %v10626_v61  ;;  %9108 = vmatmul.msk.f32.vlgmr.msra.gmra.mxu1 %vm1268_vm2, %v10264_v33  ;;  %v1038_v17 = vadd.f32 %v1037_v39, %v9856_v59 }
 0x16f   :  { %14065 = vst [vmem:[#allocation81_spill] sm:$0xff] %v10630_v3  ;;  %v10635_v48 = vpop.eup %9338  ;;  %1825 = vmatpush.msra.mxu3 %v10630_v3 }
 0x170   :  { %14066 = vst [vmem:[#allocation82_spill] sm:$0xff] %v10635_v48  ;;  %v10640_v58 = vpop.eup %9340  ;;  %1806 = vmatpush.msra.mxu2 %v10635_v48 }
 0x171   :  { %14067 = vst [vmem:[#allocation83_spill] sm:$0xff] %v10640_v58  ;;  %v10643_v60 = vpop.eup %9342  ;;  %1826 = vmatpush.msra.mxu3 %v10640_v58  ;;  %v2174_v58 = vmul.f32 %v9955_v38, %v9955_v38 }
 0x172   :  { %14068 = vst [vmem:[#allocation84_spill] sm:$0xff] %v10643_v60  ;;  %v10646_v19 = vpop.eup %9344  ;;  %1807 = vmatpush.msra.mxu2 %v10643_v60  ;;  %v2142_v60 = vmul.f32 %v9941_v29, %v9941_v29 }
 0x173   :  { %14069 = vst [vmem:[#allocation85_spill] sm:$0xff] %v10646_v19  ;;  %1827 = vmatpush.msra.mxu3 %v10646_v19  ;;  %9109 = vmatmul.msk.f32.vlgmr.msra.gmra.mxu2 %vm1268_vm2, %v10264_v33  ;;  %v1035_v19 = vadd.f32 %v10586_v24, %v9882_v2  ;;  %v2302_v1 = vsub.f32 1.0, %v2174_v58  ;;  %v10668_v24 = vand.u32 4294901760, %v2334_v11 }
 0x174   :  { %v1095_v3 = vpop.f32.mrf.mxu2  ;;  %9110 = vmatmul.msk.f32.vlgmr.msra.gmra.mxu3 %vm1268_vm2, %v10264_v33  ;;  %v2270_v38 = vsub.f32 1.0, %v2142_v60 }
 0x175   :  { %v1124_v61 = vpop.f32.mrf.mxu3  ;;  %v1040_v40 = vpop.f32.mrf.mxu0  ;;  %9346 = vtanh.f32 %v1035_v19  ;;  %v10672_v58 = vand.u32 4294901760, %v2302_v1  ;;  %v1067_v19 = vadd.f32 %v1066_v31, %v9856_v59 }
 0x176   :  { %v1069_v48 = vpop.f32.mrf.mxu1  ;;  %v1041_v29 = vadd.f32 %v1040_v40, %v9896_v8  ;;  %9348 = vtanh.f32 %v1064_v12  ;;  %v10678_v40 = vand.u32 4294901760, %v2270_v38 }
 0x177   :  { %v1070_v62 = vadd.f32 %v1069_v48, %v9896_v8 }
 0x17b   :  { %v10684_v48 = vpop.eup %9346 }
 0x17c   :  { %v1098_v57 = vpop.f32.mrf.mxu2  ;;  %14070 = vst [vmem:[#allocation86_spill] sm:$0xff] %v10684_v48  ;;  %v10692_v31 = vpop.eup %9348 }
 0x17d   :  { %v1127_v23 = vpop.f32.mrf.mxu3  ;;  %v1043_v10 = vpop.f32.mrf.mxu0  ;;  %14071 = vst [vmem:[#allocation87_spill] sm:$0xff] %v10692_v31 }
 0x17e   :  { %v1044_v41 = vadd.f32 %v1043_v10, %v9872_v0  ;;  %v1072_v43 = vpop.f32.mrf.mxu1  ;;  %v2109_v10 = vld [vmem:[%s13828_s6] sm:$0x1] }
 0x17f   :  { %v1073_v28 = vadd.f32 %v1072_v43, %v9872_v0  ;;  %v10681_v43 = vsub.f32 %v2334_v11, %v10668_v24  ;;  %v2367_v39 = vsel %vm1268_vm2, %v2109_v10, 0  ;;  %v1099_v11 = vadd.f32 %v1098_v57, %v9896_v8 }
 0x180   :  { %9350 = vtanh.f32 %v1044_v41  ;;  %v10688_v41 = vsub.f32 %v2302_v1, %v10672_v58 }
 0x181   :  { %9352 = vtanh.f32 %v1073_v28  ;;  %v10690_v28 = vand.u32 4294901760, %v2238_v25  ;;  %v13911_v1 = vand.u32 4294901760, %v10681_v43 }
 0x182   :  { %9354 = vtanh.f32 %v1041_v29 }
 0x183   :  { %9356 = vtanh.f32 %v1070_v62  ;;  %v10697_v62 = vsub.f32 %v2270_v38, %v10678_v40  ;;  %v10719_v38 = vsub.f32 %v2238_v25, %v10690_v28  ;;  %v1122_v25 = vadd.f32 %v10619_v20, %v9882_v2 }
 0x184   :  { %v1101_v12 = vpop.f32.mrf.mxu2  ;;  %9358 = vtanh.f32 %v1038_v17  ;;  %v1128_v17 = vadd.f32 %v1127_v23, %v9896_v8  ;;  %v1125_v8 = vadd.f32 %v1124_v61, %v9856_v59  ;;  %v13910_v23 = vand.u32 4294901760, %v10688_v41 }
 0x185   :  { %v1102_v46 = vadd.f32 %v1101_v12, %v9872_v0  ;;  %v1130_v60 = vpop.f32.mrf.mxu3  ;;  %9360 = vtanh.f32 %v1067_v19  ;;  %v10703_v12 = vand.u32 4294901760, %v2367_v39  ;;  %v10709_v19 = vmul.f32 %v9969_v44, %v9969_v44 }
 0x186   :  { %v1131_v29 = vadd.f32 %v1130_v60, %v9872_v0  ;;  %v10699_v10 = vpop.eup %9350  ;;  %v1096_v0 = vadd.f32 %v1095_v3, %v9856_v59  ;;  %v1093_v44 = vadd.f32 %v10614_v26, %v9882_v2  ;;  %v13909_v3 = vand.u32 4294901760, %v10697_v62 }
 0x187   :  { %14072 = vst [vmem:[#allocation88_spill] sm:$0xff] %v10699_v10  ;;  %9362 = vtanh.f32 %v1102_v46  ;;  %v10705_v18 = vpop.eup %9352  ;;  %1844 = vmatpush.msrb.mxu0 %v10699_v10  ;;  %v10729_v59 = vmul.f32 %v9961_v42, %v9961_v42  ;;  %v2413_v26 = vsub.f32 %v10681_v43, %v13911_v1  ;;  %v10740_v60 = vsub.f32 %v2367_v39, %v10703_v12  ;;  %v14168_v10 = vld [vmem:[#allocation43_spill] sm:$0xff] }
 0x188   :  { %14073 = vst [vmem:[#allocation89_spill] sm:$0xff] %v10705_v18  ;;  %9364 = vtanh.f32 %v1131_v29  ;;  %v10713_v57 = vpop.eup %9354  ;;  %1864 = vmatpush.msrb.mxu1 %v10705_v18  ;;  %v2335_v42 = vsub.f32 1.0, %v10709_v19  ;;  %v2419_v2 = vsub.f32 %v10688_v41, %v13910_v23  ;;  %v2143_v39 = vmul.f32 %v9947_v32, %v9947_v32 }
 0x189   :  { %14074 = vst [vmem:[#allocation90_spill] sm:$0xff] %v10713_v57  ;;  %v10721_v46 = vpop.eup %9356  ;;  %9366 = vtanh.f32 %v1099_v11  ;;  %1845 = vmatpush.msrb.mxu0 %v10713_v57  ;;  %v13916_v19 = vand.u32 4294901760, %v10719_v38  ;;  %v2303_v32 = vsub.f32 1.0, %v10729_v59 }
 0x18a   :  { %14075 = vst [vmem:[#allocation91_spill] sm:$0xff] %v10721_v46  ;;  %v10731_v61 = vpop.eup %9358  ;;  %9368 = vtanh.f32 %v1128_v17  ;;  %1865 = vmatpush.msrb.mxu1 %v10721_v46  ;;  %v2425_v17 = vsub.f32 %v10697_v62, %v13909_v3  ;;  %v10774_v3 = vand.u32 4294901760, %v2335_v42 }
 0x18b   :  { %14076 = vst [vmem:[#allocation92_spill] sm:$0xff] %v10731_v61  ;;  %v10742_v11 = vpop.eup %9360  ;;  %9370 = vtanh.f32 %v1096_v0  ;;  %1846 = vmatpush.msrb.mxu0 %v10731_v61  ;;  %v2414_v0 = vand.u32 4294901760, %v2413_v26  ;;  %v2420_v26 = vand.u32 4294901760, %v2419_v2  ;;  %v2431_v1 = vsub.f32 %v10719_v38, %v13916_v19 }
 0x18c   :  { %14077 = vst [vmem:[#allocation93_spill] sm:$0xff] %v10740_v60  ;;  %9372 = vtanh.f32 %v1125_v8  ;;  %1866 = vmatpush.msrb.mxu1 %v10742_v11  ;;  %v10765_v8 = vand.u32 4294901760, %v10740_v60  ;;  %v2426_v2 = vand.u32 4294901760, %v2425_v17  ;;  %v2176_v17 = vmul.f32 %v9984_v45, %v9984_v45 }
 0x18d   :  { %14078 = vst [vmem:[#allocation94_spill] sm:$0xff] %v10742_v11  ;;  %v10746_v29 = vpop.eup %9362  ;;  %9374 = vtanh.f32 %v1093_v44  ;;  %1847 = vmatpush.msrb.mxu0 %v10684_v48 }
 0x18e   :  { %14079 = vst [vmem:[#allocation95_spill] sm:$0xff] %v10746_v29  ;;  %v10752_v20 = vpop.eup %9364  ;;  %1884 = vmatpush.msrb.mxu2 %v10746_v29  ;;  %9376 = vtanh.f32 %v1122_v25  ;;  %1867 = vmatpush.msrb.mxu1 %v10692_v31  ;;  %v2111_v25 = vmul.f32 %v9937_v27, %v9937_v27  ;;  %v2208_v27 = vmul.f32 %v9975_v35, %v9975_v35 }
 0x18f   :  { %14080 = vst [vmem:[#allocation96_spill] sm:$0xff] %v10752_v20  ;;  %1904 = vmatpush.msrb.mxu3 %v10752_v20  ;;  %v10768_v44 = vpop.eup %9366  ;;  %9111 = vmatmul.msk.f32.vlgmr.msrb.gmra.mxu0 %vm1268_vm2, %v10264_v33  ;;  %v2271_v20 = vsub.f32 1.0, %v2143_v39  ;;  %v10802_v39 = vsub.f32 %v2335_v42, %v10774_v3 }
 0x190   :  { %14081 = vst [vmem:[#allocation97_spill] sm:$0xff] %v10768_v44  ;;  %9112 = vmatmul.msk.f32.vlgmr.msrb.gmra.mxu1 %vm1268_vm2, %v10264_v33  ;;  %v10778_v23 = vpop.eup %9368  ;;  %2382 = vmatpush.msra.mxu0 %v10668_v24  ;;  %v2239_v19 = vsub.f32 1.0, %v2111_v25 }
 0x191   :  { %14082 = vst [vmem:[#allocation98_spill] sm:$0xff] %v10778_v23  ;;  %2415 = vmatpush.msra.mxu1 %v2414_v0  ;;  %v10781_v59 = vpop.eup %9370  ;;  %1885 = vmatpush.msrb.mxu2 %v10768_v44  ;;  %v2392_v0 = vsub.f32 %v10740_v60, %v10765_v8  ;;  %v10795_v44 = vand.u32 4294901760, %v2303_v32  ;;  %v13919_v45 = vand.u32 4294901760, %v10802_v39 }
 0x192   :  { %14083 = vst [vmem:[#allocation99_spill] sm:$0xff] %v10781_v59  ;;  %1905 = vmatpush.msrb.mxu3 %v10778_v23  ;;  %v10788_v29 = vpop.eup %9372  ;;  %2384 = vmatpush.msra.mxu0 %v10672_v58 }
 0x193   :  { %14084 = vst [vmem:[#allocation100_spill] sm:$0xff] %v10788_v29  ;;  %2421 = vmatpush.msra.mxu1 %v2420_v26  ;;  %v10797_v23 = vpop.eup %9374  ;;  %1886 = vmatpush.msrb.mxu2 %v10781_v59  ;;  %v2432_v26 = vand.u32 4294901760, %v2431_v1  ;;  %v10811_v59 = vand.u32 4294901760, %v2271_v20  ;;  %v10817_v42 = vand.u32 4294901760, %v2392_v0  ;;  %v10820_v25 = vsub.f32 %v2303_v32, %v10795_v44 }
 0x194   :  { %14085 = vst [vmem:[#allocation101_spill] sm:$0xff] %v10797_v23  ;;  %1906 = vmatpush.msrb.mxu3 %v10788_v29  ;;  %v10804_v35 = vpop.eup %9376  ;;  %2386 = vmatpush.msra.mxu0 %v10678_v40  ;;  %v10824_v1 = vand.u32 4294901760, %v2239_v19  ;;  %v2112_v0 = vmul.f32 %v10008_v55, %v10008_v55  ;;  %v14088_v55 = vand.u32 4294901760, %v10688_v41 }
 0x195   :  { %14086 = vst [vmem:[#allocation102_spill] sm:$0xff] %v10804_v35  ;;  %2427 = vmatpush.msra.mxu1 %v2426_v2  ;;  %1887 = vmatpush.msrb.mxu2 %v10797_v23  ;;  %v2336_v2 = vsub.f32 1.0, %v2208_v27  ;;  %v10834_v32 = vsub.f32 %v2271_v20, %v10811_v59  ;;  %v2304_v27 = vsub.f32 1.0, %v2176_v17 }
 0x196   :  { %1907 = vmatpush.msrb.mxu3 %v10804_v35  ;;  %9113 = vmatmul.msk.f32.vlgmr.msrb.gmra.mxu2 %vm1268_vm2, %v10264_v33  ;;  %v2144_v35 = vmul.f32 %v9998_v50, %v9998_v50  ;;  %v14089_v50 = vand.u32 4294901760, %v10697_v62 }
 0x197   :  { %9114 = vmatmul.msk.f32.vlgmr.msrb.gmra.mxu3 %vm1268_vm2, %v10264_v33  ;;  %2388 = vmatpush.msra.mxu0 %v10690_v28  ;;  %v14087_v33 = vand.u32 4294901760, %v10681_v43  ;;  %v2609_v17 = vand.u32 4294901760, %v10834_v32 }
 0x198   :  { %2433 = vmatpush.msra.mxu1 %v2432_v26  ;;  %2453 = vmatpush.msra.mxu2 %v10681_v43  ;;  %v10841_v26 = vand.u32 4294901760, %v2336_v2  ;;  %v10849_v43 = vsub.f32 %v2239_v19, %v10824_v1  ;;  %v2272_v20 = vsub.f32 1.0, %v2144_v35  ;;  %v14090_v19 = vand.u32 4294901760, %v10820_v25 }
 0x199   :  { %2482 = vmatpush.msra.mxu3 %v10668_v24  ;;  %2511 = vmatpush.msrb.mxu0 %v14087_v33  ;;  %v10857_v33 = vand.u32 4294901760, %v2304_v27  ;;  %v2240_v35 = vsub.f32 1.0, %v2112_v0 }
 0x19a   :  { %2542 = vmatpush.msrb.mxu1 %v10668_v24  ;;  %2394 = vmatmul.f32.vlgmr.msra.gmra.mxu0 %v10817_v42  ;;  %v2598_v24 = vsub.f32 %v10802_v39, %v13919_v45  ;;  %v13921_v45 = vand.u32 4294901760, %v10849_v43 }
 0x19b   :  { %2435 = vmatmul.f32.vlgmr.msra.gmra.mxu1 %v10703_v12  ;;  %2456 = vmatpush.msra.mxu2 %v10688_v41  ;;  %v2604_v41 = vsub.f32 %v10820_v25, %v14090_v19  ;;  %v10881_v0 = vsub.f32 %v2304_v27, %v10857_v33  ;;  %v2209_v19 = vmul.f32 %v9980_v36, %v9980_v36 }
 0x19c   :  { %2484 = vmatpush.msra.mxu3 %v10672_v58  ;;  %2515 = vmatpush.msrb.mxu0 %v14088_v55  ;;  %v2599_v55 = vand.u32 4294901760, %v2598_v24  ;;  %v2616_v24 = vsub.f32 %v10849_v43, %v13921_v45  ;;  %v2177_v36 = vmul.f32 %v9990_v47, %v9990_v47  ;;  %v2145_v47 = vmul.f32 %v10004_v52, %v10004_v52 }
 0x19d   :  { %2544 = vmatpush.msrb.mxu1 %v10672_v58  ;;  %2459 = vmatpush.msra.mxu2 %v10697_v62  ;;  %v10866_v58 = vsub.f32 %v2336_v2, %v10841_v26  ;;  %v14091_v62 = vand.u32 4294901760, %v10719_v38  ;;  %v2610_v2 = vsub.f32 %v10834_v32, %v2609_v17  ;;  %v14092_v45 = vand.u32 4294901760, %v10802_v39 }
 0x19e   :  { %2486 = vmatpush.msra.mxu3 %v10678_v40  ;;  %2519 = vmatpush.msrb.mxu0 %v14089_v50 }
 0x19f   :  { %2546 = vmatpush.msrb.mxu1 %v10678_v40  ;;  %2462 = vmatpush.msra.mxu2 %v10719_v38  ;;  %v10874_v40 = vand.u32 4294901760, %v2272_v20  ;;  %v2605_v38 = vand.u32 4294901760, %v2604_v41  ;;  %v13920_v50 = vand.u32 4294901760, %v10866_v58  ;;  %v2611_v41 = vand.u32 4294901760, %v2610_v2 }
 0x1a0   :  { %2488 = vmatpush.msra.mxu3 %v10690_v28  ;;  %2523 = vmatpush.msrb.mxu0 %v14091_v62  ;;  %v2617_v2 = vand.u32 4294901760, %v2616_v24 }
 0x1a1   :  { %2548 = vmatpush.msrb.mxu1 %v10690_v28  ;;  %2567 = vmatpush.msrb.mxu2 %v10774_v3  ;;  %v10886_v28 = vand.u32 4294901760, %v2240_v35  ;;  %v10895_v27 = vsub.f32 %v2272_v20, %v10874_v40  ;;  %v2783_v62 = vsub.f32 %v10866_v58, %v13920_v50  ;;  %v2337_v50 = vsub.f32 1.0, %v2209_v19 }
 0x1a2   :  { %2600 = vmatpush.msrb.mxu3 %v2599_v55  ;;  %2465 = vmatmul.f32.vlgmr.msra.gmra.mxu2 %v10740_v60  ;;  %v2788_v55 = vand.u32 4294901760, %v10881_v0  ;;  %v2113_v19 = vmul.f32 %v10012_v56, %v10012_v56 }
 0x1a3   :  { %2492 = vmatmul.f32.vlgmr.msra.gmra.mxu3 %v10765_v8  ;;  %2638 = vmatpush.msra.mxu0 %v10802_v39  ;;  %v10908_v20 = vsub.f32 %v2240_v35, %v10886_v28  ;;  %v2784_v24 = vand.u32 4294901760, %v2783_v62  ;;  %v10936_v39 = vand.u32 4294901760, %v2337_v50 }
 0x1a4   :  { %2667 = vmatpush.msra.mxu1 %v10774_v3  ;;  %2569 = vmatpush.msrb.mxu2 %v10795_v44  ;;  %v2789_v35 = vsub.f32 %v10881_v0, %v2788_v55 }
 0x1a5   :  { %2606 = vmatpush.msrb.mxu3 %v2605_v38  ;;  %2525 = vmatmul.f32.vlgmr.msrb.gmra.mxu0 %v10703_v12  ;;  %v2794_v38 = vand.u32 4294901760, %v10895_v27 }
 0x1a6   :  { %2550 = vmatmul.f32.vlgmr.msrb.gmra.mxu1 %v10703_v12  ;;  %2641 = vmatpush.msra.mxu0 %v10820_v25  ;;  %v2790_v62 = vand.u32 4294901760, %v2789_v35  ;;  %v2210_v35 = vmul.f32 %v10109_v53, %v10109_v53 }
 0x1a7   :  { %2669 = vmatpush.msra.mxu1 %v10795_v44  ;;  %2571 = vmatpush.msrb.mxu2 %v10811_v59  ;;  %v2795_v52 = vsub.f32 %v10895_v27, %v2794_v38 }
 0x1a8   :  { %2612 = vmatpush.msrb.mxu3 %v2611_v41  ;;  %2644 = vmatpush.msra.mxu0 %v10834_v32  ;;  %v2800_v41 = vand.u32 4294901760, %v10908_v20  ;;  %v2338_v32 = vsub.f32 1.0, %v2210_v35 }
 0x1a9   :  { %2671 = vmatpush.msra.mxu1 %v10811_v59  ;;  %2573 = vmatpush.msrb.mxu2 %v10824_v1 }
 0x1aa   :  { %2618 = vmatpush.msrb.mxu3 %v2617_v2  ;;  %2647 = vmatpush.msra.mxu0 %v10849_v43  ;;  %v2305_v2 = vsub.f32 1.0, %v2177_v36  ;;  %v2273_v36 = vsub.f32 1.0, %v2145_v47  ;;  %v2241_v47 = vsub.f32 1.0, %v2113_v19  ;;  %v2114_v19 = vmul.f32 %v10075_v6, %v10075_v6 }
 0x1ab   :  { %2673 = vmatpush.msra.mxu1 %v10824_v1  ;;  %2696 = vmatpush.msra.mxu2 %v14092_v45  ;;  %v2801_v45 = vsub.f32 %v10908_v20, %v2800_v41 }
 0x1ac   :  { %2727 = vmatpush.msra.mxu3 %v10774_v3  ;;  %2752 = vmatpush.msrb.mxu0 %v10841_v26  ;;  %v14093_v3 = vand.u32 4294901760, %v10820_v25  ;;  %v10945_v56 = vand.u32 4294901760, %v2305_v2  ;;  %v2796_v25 = vand.u32 4294901760, %v2795_v52  ;;  %v14094_v52 = vand.u32 4294901760, %v10849_v43 }
 0x1ad   :  { %2785 = vmatpush.msrb.mxu1 %v2784_v24  ;;  %2579 = vmatmul.f32.vlgmr.msrb.gmra.mxu2 %v10817_v42  ;;  %v2178_v24 = vmul.f32 %v10101_v15, %v10101_v15  ;;  %v2802_v53 = vand.u32 4294901760, %v2801_v45  ;;  %v2146_v15 = vmul.f32 %v10091_v34, %v10091_v34  ;;  %v10974_v43 = vand.u32 4294901760, %v2241_v47 }
 0x1ae   :  { %2620 = vmatmul.f32.vlgmr.msrb.gmra.mxu3 %v10703_v12  ;;  %2700 = vmatpush.msra.mxu2 %v14093_v3 }
 0x1af   :  { %2729 = vmatpush.msra.mxu3 %v10795_v44  ;;  %2754 = vmatpush.msrb.mxu0 %v10857_v33  ;;  %v10955_v44 = vsub.f32 %v2337_v50, %v10936_v39  ;;  %v10998_v3 = vsub.f32 %v2241_v47, %v10974_v43  ;;  %v2274_v45 = vsub.f32 1.0, %v2146_v15 }
 0x1b0   :  { %2791 = vmatpush.msrb.mxu1 %v2790_v62  ;;  %2650 = vmatmul.f32.vlgmr.msra.gmra.mxu0 %v10740_v60  ;;  %v10960_v62 = vand.u32 4294901760, %v2273_v36 }
 0x1b1   :  { %2677 = vmatmul.f32.vlgmr.msra.gmra.mxu1 %v10765_v8  ;;  %2704 = vmatpush.msra.mxu2 %v2609_v17  ;;  %v2967_v17 = vand.u32 4294901760, %v10955_v44  ;;  %v11019_v47 = vand.u32 4294901760, %v2274_v45 }
 0x1b2   :  { %2731 = vmatpush.msra.mxu3 %v10811_v59  ;;  %2756 = vmatpush.msrb.mxu0 %v10874_v40  ;;  %v10966_v59 = vsub.f32 %v2305_v2, %v10945_v56  ;;  %v10980_v50 = vsub.f32 %v2273_v36, %v10960_v62  ;;  %v2306_v2 = vsub.f32 1.0, %v2178_v24 }
 0x1b3   :  { %2797 = vmatpush.msrb.mxu1 %v2796_v25  ;;  %2708 = vmatpush.msra.mxu2 %v14094_v52  ;;  %v2985_v25 = vand.u32 4294901760, %v10998_v3  ;;  %v11041_v24 = vsub.f32 %v2274_v45, %v11019_v47 }
 0x1b4   :  { %2733 = vmatpush.msra.mxu3 %v10824_v1  ;;  %2758 = vmatpush.msrb.mxu0 %v10886_v28  ;;  %v14095_v1 = vand.u32 4294901760, %v10866_v58  ;;  %v2973_v34 = vand.u32 4294901760, %v10966_v59  ;;  %v2979_v6 = vand.u32 4294901760, %v10980_v50  ;;  %v11003_v36 = vand.u32 4294901760, %v2306_v2 }
 0x1b5   :  { %2803 = vmatpush.msrb.mxu1 %v2802_v53  ;;  %2823 = vmatpush.msrb.mxu2 %v10866_v58  ;;  %v10989_v58 = vand.u32 4294901760, %v2338_v32  ;;  %v2211_v53 = vmul.f32 %v10113_v4, %v10113_v4 }
 0x1b6   :  { %2852 = vmatpush.msrb.mxu3 %v10841_v26  ;;  %2881 = vmatpush.msra.mxu0 %v14095_v1  ;;  %v2179_v1 = vmul.f32 %v10105_v13, %v10105_v13  ;;  %v14097_v13 = vld [vmem:[#allocation10_spill] sm:$0xff] }
 0x1b7   :  { %2912 = vmatpush.msra.mxu1 %v10841_v26  ;;  %2826 = vmatpush.msrb.mxu2 %v10881_v0  ;;  %v2968_v26 = vsub.f32 %v10955_v44, %v2967_v17  ;;  %v11014_v0 = vsub.f32 %v2338_v32, %v10989_v58  ;;  %v2339_v45 = vsub.f32 1.0, %v2211_v53 }
 0x1b8   :  { %2854 = vmatpush.msrb.mxu3 %v10857_v33  ;;  %2710 = vmatmul.f32.vlgmr.msra.gmra.mxu2 %v10703_v12  ;;  %v2307_v53 = vsub.f32 1.0, %v2179_v1 }
 0x1b9   :  { %2735 = vmatmul.f32.vlgmr.msra.gmra.mxu3 %v10703_v12  ;;  %2885 = vmatpush.msra.mxu0 %v2788_v55  ;;  %v2242_v55 = vsub.f32 1.0, %v2114_v19  ;;  %v2969_v35 = vand.u32 4294901760, %v2968_v26  ;;  %v3164_v19 = vand.u32 4294901760, %v11041_v24 }
 0x1ba   :  { %2914 = vmatpush.msra.mxu1 %v10857_v33  ;;  %2829 = vmatpush.msrb.mxu2 %v10895_v27  ;;  %v2974_v33 = vsub.f32 %v10966_v59, %v2973_v34  ;;  %v11028_v27 = vsub.f32 %v2306_v2, %v11003_v36 }
 0x1bb   :  { %2856 = vmatpush.msrb.mxu3 %v10874_v40  ;;  %2764 = vmatmul.f32.vlgmr.msrb.gmra.mxu0 %v10817_v42 }
 0x1bc   :  { %2805 = vmatmul.f32.vlgmr.msrb.gmra.mxu1 %v10703_v12  ;;  %2889 = vmatpush.msra.mxu0 %v2794_v38  ;;  %v2975_v38 = vand.u32 4294901760, %v2974_v33  ;;  %v3158_v32 = vand.u32 4294901760, %v11028_v27  ;;  %v14096_v33 = vld [vmem:[#allocation9_spill] sm:$0xff] }
 0x1bd   :  { %2916 = vmatpush.msra.mxu1 %v10874_v40  ;;  %2832 = vmatpush.msrb.mxu2 %v10908_v20  ;;  %v2980_v40 = vsub.f32 %v10980_v50, %v2979_v6  ;;  %v3152_v20 = vand.u32 4294901760, %v11014_v0 }
 0x1be   :  { %2858 = vmatpush.msrb.mxu3 %v10886_v28  ;;  %2893 = vmatpush.msra.mxu0 %v2800_v41  ;;  %v11034_v41 = vand.u32 4294901760, %v2242_v55  ;;  %v3159_v26 = vsub.f32 %v11028_v27, %v3158_v32 }
 0x1bf   :  { %2918 = vmatpush.msra.mxu1 %v10886_v28  ;;  %2937 = vmatpush.msra.mxu2 %v10936_v39  ;;  %v2986_v28 = vsub.f32 %v10998_v3, %v2985_v25  ;;  %v2981_v52 = vand.u32 4294901760, %v2980_v40  ;;  %v3153_v15 = vsub.f32 %v11014_v0, %v3152_v20 }
 0x1c0   :  { %2970 = vmatpush.msra.mxu3 %v2969_v35  ;;  %3008 = vmatpush.msrb.mxu0 %v10955_v44  ;;  %v11055_v4 = vsub.f32 %v2242_v55, %v11034_v41  ;;  %v2115_v55 = vmul.f32 %v14096_v33, %v14096_v33  ;;  %v2147_v35 = vmul.f32 %v14097_v13, %v14097_v13 }
 0x1c1   :  { %3037 = vmatpush.msrb.mxu1 %v10936_v39  ;;  %2939 = vmatpush.msra.mxu2 %v10945_v56  ;;  %v2987_v2 = vand.u32 4294901760, %v2986_v28  ;;  %v3154_v40 = vand.u32 4294901760, %v3153_v15  ;;  %v3165_v28 = vsub.f32 %v11041_v24, %v3164_v19  ;;  %v14098_v15 = vld [vmem:[#allocation11_spill] sm:$0xff] }
 0x1c2   :  { %2976 = vmatpush.msra.mxu3 %v2975_v38  ;;  %3011 = vmatpush.msrb.mxu0 %v10966_v59  ;;  %v3170_v38 = vand.u32 4294901760, %v11055_v4  ;;  %v2275_v44 = vsub.f32 1.0, %v2147_v35  ;;  %v2212_v1 = vmul.f32 %v14098_v15, %v14098_v15 }
 0x1c3   :  { %3039 = vmatpush.msrb.mxu1 %v10945_v56  ;;  %2835 = vmatmul.f32.vlgmr.msrb.gmra.mxu2 %v10740_v60  ;;  %v3166_v59 = vand.u32 4294901760, %v3165_v28  ;;  %v11139_v28 = vld [vmem:[%s13823_s1] sm:$0xff] }
 0x1c4   :  { %2862 = vmatmul.f32.vlgmr.msrb.gmra.mxu3 %v10765_v8  ;;  %2941 = vmatpush.msra.mxu2 %v10960_v62  ;;  %v2340_v35 = vsub.f32 1.0, %v2212_v1  ;;  %14101 = vst [vmem:[#allocation9_spill] sm:$0xff] %v11139_v28 }
 0x1c5   :  { %2982 = vmatpush.msra.mxu3 %v2981_v52  ;;  %3014 = vmatpush.msrb.mxu0 %v10980_v50  ;;  %v3160_v52 = vand.u32 4294901760, %v3159_v26  ;;  %v11104_v26 = vand.u32 4294901760, %v2275_v44  ;;  %v14099_v50 = vld [vmem:[#allocation13_spill] sm:$0xff] }
 0x1c6   :  { %3041 = vmatpush.msrb.mxu1 %v10960_v62  ;;  %2895 = vmatmul.f32.vlgmr.msra.gmra.mxu0 %v10703_v12  ;;  %v11152_v15 = vand.u32 4294901760, %v2340_v35 }
 0x1c7   :  { %2920 = vmatmul.f32.vlgmr.msra.gmra.mxu1 %v10703_v12  ;;  %2943 = vmatpush.msra.mxu2 %v10974_v43 }
 0x1c8   :  { %2988 = vmatpush.msra.mxu3 %v2987_v2  ;;  %3017 = vmatpush.msrb.mxu0 %v10998_v3  ;;  %v11082_v2 = vand.u32 4294901760, %v2339_v45 }
 0x1c9   :  { %3043 = vmatpush.msrb.mxu1 %v10974_v43  ;;  %3066 = vmatpush.msrb.mxu2 %v2967_v17  ;;  %v2243_v17 = vsub.f32 1.0, %v2115_v55  ;;  %v14100_v55 = vld [vmem:[#allocation15_spill] sm:$0xff] }
 0x1ca   :  { %3097 = vmatpush.msrb.mxu3 %v10936_v39  ;;  %3122 = vmatpush.msra.mxu0 %v10989_v58  ;;  %v3171_v39 = vsub.f32 %v11055_v4, %v3170_v38 }
 0x1cb   :  { %3155 = vmatpush.msra.mxu1 %v3154_v40  ;;  %3070 = vmatpush.msrb.mxu2 %v2973_v34  ;;  %v11096_v34 = vand.u32 4294901760, %v2307_v53  ;;  %v11106_v33 = vand.u32 4294901760, %v2243_v17  ;;  %v11134_v40 = vpop.permute.xlu2 %1265 }
 0x1cc   :  { %3099 = vmatpush.msrb.mxu3 %v10945_v56  ;;  %3124 = vmatpush.msra.mxu0 %v11003_v36  ;;  %v11101_v56 = vsub.f32 %v2339_v45, %v11082_v2  ;;  %v11117_v45 = vmul.f32 %v14100_v55, %v14100_v55 }
 0x1cd   :  { %3161 = vmatpush.msra.mxu1 %v3160_v52  ;;  %3074 = vmatpush.msrb.mxu2 %v2979_v6  ;;  %v3172_v6 = vand.u32 4294901760, %v3171_v39  ;;  %v11122_v13 = vsub.f32 %v2307_v53, %v11096_v34  ;;  %v1289_v53 = vpop.f32.mrf.mxu0  ;;  %v14102_v52 = vld [vmem:[#allocation17_spill] sm:$0xff] }
 0x1ce   :  { %3101 = vmatpush.msrb.mxu3 %v10960_v62  ;;  %2949 = vmatmul.f32.vlgmr.msra.gmra.mxu2 %v10817_v42  ;;  %v11110_v62 = vmul.f32 %v14099_v50, %v14099_v50  ;;  %v13928_v3 = vand.u32 4294901760, %v11101_v56  ;;  %v11143_v39 = vmul.f32 %v14102_v52, %v14102_v52  ;;  %v2276_v1 = vsub.f32 1.0, %v11117_v45 }
 0x1cf   :  { %2990 = vmatmul.f32.vlgmr.msra.gmra.mxu3 %v10703_v12  ;;  %3126 = vmatpush.msra.mxu0 %v11019_v47  ;;  %v13923_v50 = vperm.slane %v11139_v28, 1 }
 0x1d0   :  { %3167 = vmatpush.msra.mxu1 %v3166_v59  ;;  %3078 = vmatpush.msrb.mxu2 %v2985_v25  ;;  %v11132_v25 = vsub.f32 %v2243_v17, %v11106_v33  ;;  %v13927_v17 = vand.u32 4294901760, %v11122_v13  ;;  %v1309_v59 = vpop.f32.mrf.mxu1 }
 0x1d1   :  { %3103 = vmatpush.msrb.mxu3 %v10974_v43  ;;  %3020 = vmatmul.f32.vlgmr.msrb.gmra.mxu0 %v10740_v60  ;;  %v11129_v43 = vsub.f32 %v2275_v44, %v11104_v26  ;;  %v2308_v44 = vsub.f32 1.0, %v11110_v62  ;;  %v1310_v62 = vadd.f32 %v1309_v59, %v11134_v40  ;;  %v13925_v59 = vperm.slane %v11139_v28, 3 }
 0x1d2   :  { %3047 = vmatmul.f32.vlgmr.msrb.gmra.mxu1 %v10765_v8  ;;  %3128 = vmatpush.msra.mxu0 %v11034_v41  ;;  %v3344_v45 = vsub.f32 %v11122_v13, %v13927_v17 }
 0x1d3   :  { %3173 = vmatpush.msra.mxu1 %v3172_v6  ;;  %3193 = vmatpush.msra.mxu2 %v11014_v0  ;;  %v1290_v0 = vadd.f32 %v1289_v53, %v11134_v40  ;;  %v13926_v6 = vand.u32 4294901760, %v11129_v43  ;;  %v1981_v55 = vmul.f32 %v13923_v50, %v1310_v62  ;;  %v14103_v62 = vld [vmem:[#allocation12_spill] sm:$0xff]  ;;  %v14104_v50 = vld [vmem:[#allocation14_spill] sm:$0xff] }
 0x1d4   :  { %3222 = vmatpush.msra.mxu3 %v10989_v58  ;;  %3251 = vmatpush.msrb.mxu0 %v3152_v20  ;;  %v13922_v20 = vperm.slane %v11139_v28, 0 }
 0x1d5   :  { %3282 = vmatpush.msrb.mxu1 %v10989_v58  ;;  %3196 = vmatpush.msra.mxu2 %v11028_v27  ;;  %v3338_v58 = vsub.f32 %v11101_v56, %v13928_v3  ;;  %v13924_v27 = vand.u32 4294901760, %v11132_v25  ;;  %v2044_v52 = vrot.slane %v1981_v55, 4  ;;  %v11206_v55 = vmul.f32 %v14103_v62, %v14103_v62 }
 0x1d6   :  { %3224 = vmatpush.msra.mxu3 %v11003_v36  ;;  %3255 = vmatpush.msrb.mxu0 %v3158_v32  ;;  %v2244_v32 = vsub.f32 1.0, %v11143_v39  ;;  %v11191_v53 = vmul.f32 %v13922_v20, %v1290_v0  ;;  %v1349_v39 = vpop.f32.mrf.mxu3 }
 0x1d7   :  { %3284 = vmatpush.msrb.mxu1 %v11003_v36  ;;  %3199 = vmatpush.msra.mxu2 %v11041_v24  ;;  %v11172_v36 = vand.u32 4294901760, %v2308_v44  ;;  %v11183_v24 = vsub.f32 %v2340_v35, %v11152_v15  ;;  %v3350_v35 = vsub.f32 %v11129_v43, %v13926_v6  ;;  %v1350_v0 = vadd.f32 %v1349_v39, %v11134_v40 }
 0x1d8   :  { %3226 = vmatpush.msra.mxu3 %v11019_v47  ;;  %3259 = vmatpush.msrb.mxu0 %v3164_v19  ;;  %v11185_v19 = vand.u32 4294901760, %v2276_v1  ;;  %v3345_v39 = vand.u32 4294901760, %v3344_v45  ;;  %v13931_v6 = vperm.slane %v11139_v28, 4  ;;  %v1389_v17 = vpop.f32.mrf.mxu1 }
 0x1d9   :  { %3286 = vmatpush.msrb.mxu1 %v11019_v47  ;;  %3080 = vmatmul.f32.vlgmr.msrb.gmra.mxu2 %v10703_v12  ;;  %v3339_v47 = vand.u32 4294901760, %v3338_v58  ;;  %v3356_v58 = vsub.f32 %v11132_v25, %v13924_v27  ;;  %v13930_v20 = vand.u32 4294901760, %v11183_v24  ;;  %v1983_v62 = vmul.f32 %v13925_v59, %v1350_v0  ;;  %v1369_v59 = vpop.f32.mrf.mxu0 }
 0x1da   :  { %3105 = vmatmul.f32.vlgmr.msrb.gmra.mxu3 %v10703_v12  ;;  %3202 = vmatpush.msra.mxu2 %v11055_v4  ;;  %v11212_v4 = vand.u32 4294901760, %v2244_v32  ;;  %v11224_v27 = vmul.f32 %v14104_v50, %v14104_v50  ;;  %v3351_v0 = vand.u32 4294901760, %v3350_v35  ;;  %v1370_v3 = vadd.f32 %v1369_v59, %v11134_v40 }
 0x1db   :  { %3228 = vmatpush.msra.mxu3 %v11034_v41  ;;  %3263 = vmatpush.msrb.mxu0 %v3170_v38  ;;  %v2061_v38 = vsel %vm2060_vm3, %v11191_v53, %v2044_v52  ;;  %v11229_v52 = vsub.f32 %v2276_v1, %v11185_v19  ;;  %v1390_v35 = vadd.f32 %v1389_v17, %v11134_v40  ;;  %v2341_v1 = vsub.f32 1.0, %v11206_v55 }
 0x1dc   :  { %3288 = vmatpush.msrb.mxu1 %v11034_v41  ;;  %3307 = vmatpush.msrb.mxu2 %v11082_v2  ;;  %v11210_v41 = vsub.f32 %v2308_v44, %v11172_v36  ;;  %2093 = vst [vmem:[#allocation2] sm:$0xff] %v2061_v38  ;;  %v13929_v44 = vperm.slane %v11139_v28, 2  ;;  %v2045_v38 = vrot.slane %v1983_v62, 4  ;;  %v3523_v62 = vsub.f32 %v11183_v24, %v13930_v20  ;;  %v14107_v20 = vld [vmem:[#allocation16_spill] sm:$0xff] }
 0x1dd   :  { %3340 = vmatpush.msrb.mxu3 %v3339_v47  ;;  %3134 = vmatmul.f32.vlgmr.msra.gmra.mxu0 %v10817_v42  ;;  %v1329_v47 = vpop.f32.mrf.mxu2  ;;  %v11247_v50 = vsub.f32 %v2244_v32, %v11212_v4  ;;  %v13933_v59 = vand.u32 4294901760, %v11229_v52  ;;  %v11264_v55 = vmul.f32 %v14107_v20, %v14107_v20 }
 0x1de   :  { %3175 = vmatmul.f32.vlgmr.msra.gmra.mxu1 %v10703_v12  ;;  %3378 = vmatpush.msra.mxu0 %v11101_v56  ;;  %v1330_v45 = vadd.f32 %v1329_v47, %v11134_v40 }
 0x1df   :  { %3407 = vmatpush.msra.mxu1 %v11082_v2  ;;  %3309 = vmatpush.msrb.mxu2 %v11096_v34  ;;  %v2277_v20 = vsub.f32 1.0, %v11264_v55 }
 0x1e0   :  { %3346 = vmatpush.msrb.mxu3 %v3345_v39  ;;  %3381 = vmatpush.msra.mxu0 %v11122_v13  ;;  %v1982_v47 = vmul.f32 %v13929_v44, %v1330_v45  ;;  %v3357_v39 = vand.u32 4294901760, %v3356_v58  ;;  %v1984_v58 = vmul.f32 %v13931_v6, %v1370_v3  ;;  %v14105_v45 = vperm.slane %v11139_v28, 5  ;;  %v14106_v44 = vld [vmem:[#allocation18_spill] sm:$0xff] }
 0x1e1   :  { %3409 = vmatpush.msra.mxu1 %v11096_v34  ;;  %3311 = vmatpush.msrb.mxu2 %v11104_v26  ;;  %v11260_v32 = vmul.f32 %v14106_v44, %v14106_v44  ;;  %v14108_v3 = vand.u32 4294901760, %v11210_v41  ;;  %v14109_v6 = vand.u32 4294901760, %v11101_v56 }
 0x1e2   :  { %3352 = vmatpush.msrb.mxu3 %v3351_v0  ;;  %3384 = vmatpush.msra.mxu0 %v11129_v43  ;;  %v2062_v17 = vsel %vm2060_vm3, %v1982_v47, %v2045_v38  ;;  %v1985_v0 = vmul.f32 %v14105_v45, %v1390_v35  ;;  %v2309_v47 = vsub.f32 1.0, %v11224_v27  ;;  %v1429_v35 = vpop.f32.mrf.mxu3  ;;  %v13932_v45 = vperm.slane %v11139_v28, 7 }
 0x1e3   :  { %3411 = vmatpush.msra.mxu1 %v11104_v26  ;;  %3313 = vmatpush.msrb.mxu2 %v11106_v33  ;;  %2094 = vst [vmem:[#allocation2 + $0x8] sm:$0xff] %v2062_v17  ;;  %v3529_v38 = vsub.f32 %v11210_v41, %v14108_v3  ;;  %v1430_v17 = vadd.f32 %v1429_v35, %v11134_v40  ;;  %v3524_v27 = vand.u32 4294901760, %v3523_v62  ;;  %v2245_v35 = vsub.f32 1.0, %v11260_v32 }
 0x1e4   :  { %3358 = vmatpush.msrb.mxu3 %v3357_v39  ;;  %3205 = vmatmul.f32.vlgmr.msra.gmra.mxu2 %v10740_v60  ;;  %v2046_v44 = vrot.slane %v1985_v0, 4  ;;  %v11277_v39 = vand.u32 4294901760, %v2341_v1  ;;  %v3535_v0 = vsub.f32 %v11229_v52, %v13933_v59  ;;  %v11296_v62 = vmul.f32 %v10209_v22, %v10209_v22 }
 0x1e5   :  { %3232 = vmatmul.f32.vlgmr.msra.gmra.mxu3 %v10765_v8  ;;  %3387 = vmatpush.msra.mxu0 %v11132_v25  ;;  %v1987_v56 = vmul.f32 %v13932_v45, %v1430_v17  ;;  %v11301_v55 = vand.u32 4294901760, %v2309_v47  ;;  %v14111_v17 = vand.u32 4294901760, %v11247_v50  ;;  %v8554_v22 = vmul.f32 %v11191_v53, %v11191_v53 }
 0x1e6   :  { %3413 = vmatpush.msra.mxu1 %v11106_v33  ;;  %3436 = vmatpush.msra.mxu2 %v14109_v6  ;;  %v2063_v3 = vsel %vm2060_vm3, %v1984_v58, %v2046_v44  ;;  %v13942_v6 = vperm.slane %v11139_v28, 6  ;;  %v14110_v58 = vand.u32 4294901760, %v11122_v13  ;;  %v3530_v44 = vand.u32 4294901760, %v3529_v38  ;;  %v1449_v38 = vpop.f32.mrf.mxu0 }
 0x1e7   :  { %3467 = vmatpush.msra.mxu3 %v11082_v2  ;;  %3265 = vmatmul.f32.vlgmr.msrb.gmra.mxu0 %v10703_v12  ;;  %2095 = vst [vmem:[#allocation2 + $0x10] sm:$0xff] %v2063_v3  ;;  %v1409_v2 = vpop.f32.mrf.mxu2  ;;  %v3541_v3 = vsub.f32 %v11247_v50, %v14111_v17  ;;  %v11311_v13 = vsub.f32 %v2341_v1, %v11277_v39  ;;  %v3536_v45 = vand.u32 4294901760, %v3535_v0  ;;  %v11327_v59 = vand.u32 4294901760, %v2277_v20 }
 0x1e8   :  { %3290 = vmatmul.f32.vlgmr.msrb.gmra.mxu1 %v10703_v12  ;;  %3440 = vmatpush.msra.mxu2 %v14110_v58  ;;  %v1410_v32 = vadd.f32 %v1409_v2, %v11134_v40  ;;  %v2047_v58 = vrot.slane %v1987_v56, 4  ;;  %v1469_v2 = vpop.f32.mrf.mxu1  ;;  %v1450_v53 = vadd.f32 %v1449_v38, %v11134_v40  ;;  %v11329_v29 = vand.u32 4294901760, %v2245_v35 }
 0x1e9   :  { %3469 = vmatpush.msra.mxu3 %v11096_v34  ;;  %3492 = vmatpush.msrb.mxu0 %v11152_v15  ;;  %v11316_v34 = vld [vmem:[%s13823_s1 + $0x8] sm:$0xff]  ;;  %v1470_v56 = vadd.f32 %v1469_v2, %v11134_v40  ;;  %v11340_v38 = vsub.f32 %v2309_v47, %v11301_v55  ;;  %v11355_v47 = vmul.f32 %v10253_v7, %v10253_v7 }
 0x1ea   :  { %3525 = vmatpush.msrb.mxu1 %v3524_v27  ;;  %14112 = vst [vmem:[#allocation10_spill] sm:$0xff] %v11316_v34  ;;  %v14113_v27 = vand.u32 4294901760, %v11129_v43  ;;  %v1986_v17 = vmul.f32 %v13942_v6, %v1410_v32  ;;  %v13935_v1 = vperm.slane %v11316_v34, 0  ;;  %v13936_v43 = vperm.slane %v11316_v34, 1 }
 0x1eb   :  { %3471 = vmatpush.msra.mxu3 %v11104_v26  ;;  %3494 = vmatpush.msrb.mxu0 %v11172_v36  ;;  %v11334_v26 = vmul.f32 %v10274_v54, %v10274_v54  ;;  %v14114_v32 = vand.u32 4294901760, %v11132_v25  ;;  %v8586_v25 = vsel %vm2060_vm3, %v8554_v22, 0.0  ;;  %v11365_v22 = vsub.f32 %v2245_v35, %v11329_v29 }
 0x1ec   :  { %3444 = vmatpush.msra.mxu2 %v14113_v27  ;;  %3531 = vmatpush.msrb.mxu1 %v3530_v44  ;;  %v2064_v0 = vsel %vm2060_vm3, %v1986_v17, %v2047_v58  ;;  %v3542_v44 = vand.u32 4294901760, %v3541_v3  ;;  %v1988_v2 = vmul.f32 %v13935_v1, %v1450_v53  ;;  %v1989_v54 = vmul.f32 %v13936_v43, %v1470_v56  ;;  %v1509_v58 = vpop.f32.mrf.mxu3 }
 0x1ed   :  { %3473 = vmatpush.msra.mxu3 %v11106_v33  ;;  %3496 = vmatpush.msrb.mxu0 %v11185_v19  ;;  %2096 = vst [vmem:[#allocation2 + $0x18] sm:$0xff] %v2064_v0  ;;  %v11351_v33 = vmul.f32 %v10225_v37, %v10225_v37  ;;  %v11362_v3 = vsub.f32 %v2277_v20, %v11327_v59  ;;  %v13937_v7 = vperm.slane %v11316_v34, 3  ;;  %v8587_v27 = vrot.slane %v8586_v25, 4 }
 0x1ee   :  { %3448 = vmatpush.msra.mxu2 %v14114_v32  ;;  %3537 = vmatpush.msrb.mxu1 %v3536_v45  ;;  %v3707_v45 = vand.u32 4294901760, %v11311_v13  ;;  %v2048_v37 = vrot.slane %v1989_v54, 4  ;;  %v1510_v17 = vadd.f32 %v1509_v58, %v11134_v40  ;;  %v3713_v20 = vand.u32 4294901760, %v11340_v38 }
 0x1ef   :  { %3319 = vmatmul.f32.vlgmr.msrb.gmra.mxu2 %v10817_v42  ;;  %3360 = vmatmul.f32.vlgmr.msrb.gmra.mxu3 %v10703_v12  ;;  %v2342_v35 = vsub.f32 1.0, %v11334_v26  ;;  %v2246_v56 = vsub.f32 1.0, %v11296_v62  ;;  %v2310_v32 = vsub.f32 1.0, %v11355_v47  ;;  %v2278_v0 = vsub.f32 1.0, %v11351_v33  ;;  %v1489_v54 = vpop.f32.mrf.mxu2 }
 0x1f0   :  { %3498 = vmatpush.msrb.mxu0 %v11212_v4  ;;  %3543 = vmatpush.msrb.mxu1 %v3542_v44  ;;  %v2065_v53 = vsel %vm2060_vm3, %v1988_v2, %v2048_v37  ;;  %v1991_v44 = vmul.f32 %v13937_v7, %v1510_v17  ;;  %v13938_v58 = vperm.slane %v11316_v34, 2  ;;  %v14115_v26 = vand.u32 4294901760, %v11183_v24 }
 0x1f1   :  { %3563 = vmatpush.msrb.mxu2 %v11183_v24  ;;  %3592 = vmatpush.msrb.mxu3 %v11152_v15  ;;  %2097 = vst [vmem:[#allocation2 + $0x20] sm:$0xff] %v2065_v53  ;;  %v3708_v62 = vsub.f32 %v11311_v13, %v3707_v45  ;;  %v3719_v2 = vand.u32 4294901760, %v11362_v3  ;;  %v3725_v47 = vand.u32 4294901760, %v11365_v22  ;;  %v1490_v33 = vadd.f32 %v1489_v54, %v11134_v40  ;;  %v1529_v24 = vpop.f32.mrf.mxu0 }
 0x1f2   :  { %3390 = vmatmul.f32.vlgmr.msra.gmra.mxu0 %v10740_v60  ;;  %3417 = vmatmul.f32.vlgmr.msra.gmra.mxu1 %v10765_v8  ;;  %v8588_v37 = vadd.f32 %v8587_v27, %v8586_v25  ;;  %v2049_v17 = vrot.slane %v1991_v44, 4  ;;  %v13939_v53 = vperm.slane %v11316_v34, 4  ;;  %v14116_v1 = vand.u32 4294901760, %v11210_v41 }
 0x1f3   :  { %3566 = vmatpush.msrb.mxu2 %v11210_v41  ;;  %3594 = vmatpush.msrb.mxu3 %v11172_v36  ;;  %v11400_v43 = vand.u32 4294901760, %v2342_v35  ;;  %v1990_v54 = vmul.f32 %v13938_v58, %v1490_v33  ;;  %v1530_v7 = vadd.f32 %v1529_v24, %v11134_v40  ;;  %v3714_v41 = vsub.f32 %v11340_v38, %v3713_v20 }
 0x1f4   :  { %3621 = vmatpush.msra.mxu0 %v14115_v26  ;;  %3652 = vmatpush.msra.mxu1 %v11152_v15  ;;  %v1549_v15 = vpop.f32.mrf.mxu1  ;;  %v13940_v26 = vperm.slane %v11316_v34, 5  ;;  %v14117_v27 = vand.u32 4294901760, %v11229_v52  ;;  %v11418_v44 = vand.u32 4294901760, %v2246_v56  ;;  %v3709_v58 = vand.u32 4294901760, %v3708_v62  ;;  %v1589_v62 = vpop.f32.mrf.mxu3 }
 0x1f5   :  { %3569 = vmatpush.msrb.mxu2 %v11229_v52  ;;  %3596 = vmatpush.msrb.mxu3 %v11185_v19  ;;  %v1550_v25 = vadd.f32 %v1549_v15, %v11134_v40  ;;  %v2066_v33 = vsel %vm2060_vm3, %v1990_v54, %v2049_v17  ;;  %v1992_v24 = vmul.f32 %v13939_v53, %v1530_v7  ;;  %v14118_v17 = vand.u32 4294901760, %v11247_v50 }
 0x1f6   :  { %3625 = vmatpush.msra.mxu0 %v14116_v1  ;;  %3654 = vmatpush.msra.mxu1 %v11172_v36  ;;  %v11411_v1 = vand.u32 4294901760, %v2310_v32  ;;  %v11413_v36 = vand.u32 4294901760, %v2278_v0  ;;  %v3720_v52 = vsub.f32 %v11362_v3, %v3719_v2  ;;  %2098 = vst [vmem:[#allocation2 + $0x28] sm:$0xff] %v2066_v33  ;;  %v11437_v7 = vsub.f32 %v2342_v35, %v11400_v43 }
 0x1f7   :  { %3572 = vmatpush.msrb.mxu2 %v11247_v50  ;;  %3598 = vmatpush.msrb.mxu3 %v11212_v4  ;;  %v1993_v15 = vmul.f32 %v13940_v26, %v1550_v25  ;;  %v8589_v54 = vrot.slane %v8588_v37, 2  ;;  %v3715_v53 = vand.u32 4294901760, %v3714_v41  ;;  %v11451_v35 = vsub.f32 %v2246_v56, %v11418_v44  ;;  %v1569_v41 = vpop.f32.mrf.mxu2 }
 0x1f8   :  { %3629 = vmatpush.msra.mxu0 %v14117_v27  ;;  %3656 = vmatpush.msra.mxu1 %v11185_v19  ;;  %v3726_v19 = vsub.f32 %v11365_v22, %v3725_v47  ;;  %v13941_v27 = vperm.slane %v11316_v34, 7  ;;  %v11442_v26 = vsub.f32 %v2310_v32, %v11411_v1  ;;  %v11445_v50 = vsub.f32 %v2278_v0, %v11413_v36 }
 0x1f9   :  { %3450 = vmatmul.f32.vlgmr.msra.gmra.mxu2 %v10703_v12  ;;  %3475 = vmatmul.f32.vlgmr.msra.gmra.mxu3 %v10703_v12  ;;  %v2050_v25 = vrot.slane %v1993_v15, 4  ;;  %v13943_v15 = vperm.slane %v11316_v34, 6  ;;  %v13948_v56 = vand.u32 4294901760, %v11437_v7  ;;  %v11491_v6 = vmul.f32 %v10257_v63, %v10257_v63 }
 0x1fa   :  { %3633 = vmatpush.msra.mxu0 %v14118_v17  ;;  %3658 = vmatpush.msra.mxu1 %v11212_v4  ;;  %v1590_v4 = vadd.f32 %v1589_v62, %v11134_v40  ;;  %v3727_v32 = vand.u32 4294901760, %v3726_v19  ;;  %v11460_v17 = vmul.f32 %v10281_v51, %v10281_v51  ;;  %v13946_v19 = vand.u32 4294901760, %v11445_v50  ;;  %v11472_v51 = vld [vmem:[%s13823_s1 + $0x10] sm:$0xff] }
 0x1fb   :  { %3677 = vmatpush.msra.mxu2 %v11277_v39  ;;  %3710 = vmatpush.msra.mxu3 %v3709_v58  ;;  %v2067_v33 = vsel %vm2060_vm3, %v1992_v24, %v2050_v25  ;;  %v3721_v58 = vand.u32 4294901760, %v3720_v52  ;;  %v1570_v24 = vadd.f32 %v1569_v41, %v11134_v40  ;;  %v13947_v52 = vand.u32 4294901760, %v11442_v26  ;;  %14119 = vst [vmem:[#allocation11_spill] sm:$0xff] %v11472_v51 }
 0x1fc   :  { %3504 = vmatmul.f32.vlgmr.msrb.gmra.mxu0 %v10817_v42  ;;  %3545 = vmatmul.f32.vlgmr.msrb.gmra.mxu1 %v10703_v12  ;;  %2099 = vst [vmem:[#allocation2 + $0x30] sm:$0xff] %v2067_v33  ;;  %v1995_v0 = vmul.f32 %v13941_v27, %v1590_v4  ;;  %v8456_v25 = vlaneseq  ;;  %v1609_v4 = vpop.f32.mrf.mxu0  ;;  %v1629_v33 = vpop.f32.mrf.mxu1  ;;  %v11483_v41 = vmul.f32 %v10213_v16, %v10213_v16 }
 0x1fd   :  { %3679 = vmatpush.msra.mxu2 %v11301_v55  ;;  %3716 = vmatpush.msra.mxu3 %v3715_v53  ;;  %v8590_v53 = vadd.f32 %v8589_v54, %v8588_v37  ;;  %v1994_v37 = vmul.f32 %v13943_v15, %v1570_v24  ;;  %v1610_v54 = vadd.f32 %v1609_v4, %v11134_v40  ;;  %v13944_v24 = vperm.slane %v11472_v51, 1 }
 0x1fe   :  { %3748 = vmatpush.msrb.mxu0 %v11311_v13  ;;  %3777 = vmatpush.msrb.mxu1 %v11277_v39  ;;  %v2051_v62 = vrot.slane %v1995_v0, 4  ;;  %v1630_v0 = vadd.f32 %v1629_v33, %v11134_v40  ;;  %v11487_v27 = vmul.f32 %v10231_v14, %v10231_v14  ;;  %v3893_v16 = vsub.f32 %v11437_v7, %v13948_v56 }
 0x1ff   :  { %3681 = vmatpush.msra.mxu2 %v11327_v59  ;;  %3722 = vmatpush.msra.mxu3 %v3721_v58  ;;  %v13945_v58 = vperm.slane %v11472_v51, 0  ;;  %v8591_v4 = vrot.slane %v8590_v53, 1  ;;  %v2343_v14 = vsub.f32 1.0, %v11460_v17  ;;  %v8457_v63 = vand.u32 127, %v8456_v25 }
 0x200   :  { %3751 = vmatpush.msrb.mxu0 %v11340_v38  ;;  %3779 = vmatpush.msrb.mxu1 %v11301_v55  ;;  %v2068_v33 = vsel %vm2060_vm3, %v1994_v37, %v2051_v62  ;;  %v1997_v15 = vmul.f32 %v13944_v24, %v1630_v0  ;;  %v3899_v17 = vsub.f32 %v11442_v26, %v13947_v52  ;;  %v3910_v25 = vand.u32 4294901760, %v11451_v35  ;;  %v1669_v37 = vpop.f32.mrf.mxu3 }
 0x201   :  { %3683 = vmatpush.msra.mxu2 %v11329_v29  ;;  %3728 = vmatpush.msra.mxu3 %v3727_v32  ;;  %2100 = vst [vmem:[#allocation2 + $0x38] sm:$0xff] %v2068_v33  ;;  %v1996_v32 = vmul.f32 %v13945_v58, %v1610_v54  ;;  %v3905_v62 = vsub.f32 %v11445_v50, %v13946_v19  ;;  %v13962_v54 = vperm.slane %v11472_v51, 3  ;;  %v2311_v0 = vsub.f32 1.0, %v11491_v6 }
 0x202   :  { %3754 = vmatpush.msrb.mxu0 %v11362_v3  ;;  %3781 = vmatpush.msrb.mxu1 %v11327_v59  ;;  %v2052_v33 = vrot.slane %v1997_v15, 4  ;;  %v2247_v24 = vsub.f32 1.0, %v11483_v41  ;;  %v1670_v58 = vadd.f32 %v1669_v37, %v11134_v40  ;;  %v3894_v19 = vand.u32 4294901760, %v3893_v16  ;;  %v11631_v41 = vld [vmem:[%s13823_s1 + $0x18] sm:$0xff] }
 0x203   :  { %3575 = vmatmul.f32.vlgmr.msrb.gmra.mxu2 %v10740_v60  ;;  %3602 = vmatmul.f32.vlgmr.msrb.gmra.mxu3 %v10765_v8  ;;  %v8592_v52 = vadd.f32 %v8591_v4, %v8590_v53  ;;  %v11526_v56 = vand.u32 4294901760, %v2343_v14  ;;  %v2279_v13 = vsub.f32 1.0, %v11487_v27  ;;  %vm8522_vm4 = vcmp.lt.s32.totalorder %v8457_v63, 8  ;;  %14121 = vst [vmem:[#allocation13_spill] sm:$0xff] %v11631_v41 }
 0x204   :  { %3757 = vmatpush.msrb.mxu0 %v11365_v22  ;;  %3783 = vmatpush.msrb.mxu1 %v11329_v29  ;;  %v1999_v6 = vmul.f32 %v13962_v54, %v1670_v58  ;;  %v13961_v15 = vperm.slane %v11472_v51, 2  ;;  %v3900_v53 = vand.u32 4294901760, %v3899_v17  ;;  %v3906_v16 = vand.u32 4294901760, %v3905_v62  ;;  %v1689_v58 = vpop.f32.mrf.mxu0  ;;  %v1709_v4 = vpop.f32.mrf.mxu1 }
 0x205   :  { %3806 = vmatpush.msrb.mxu2 %v3707_v45  ;;  %3837 = vmatpush.msrb.mxu3 %v11277_v39  ;;  %v2069_v39 = vsel %vm2060_vm3, %v1996_v32, %v2052_v33  ;;  %v1649_v45 = vpop.f32.mrf.mxu2  ;;  %v3911_v38 = vsub.f32 %v11451_v35, %v3910_v25  ;;  %v13960_v32 = vperm.slane %v11472_v51, 5  ;;  %v8810_v17 = vsel %vm8522_vm4, %v8592_v52, 0.0 }
 0x206   :  { %3635 = vmatmul.f32.vlgmr.msra.gmra.mxu0 %v10703_v12  ;;  %3660 = vmatmul.f32.vlgmr.msra.gmra.mxu1 %v10703_v12  ;;  %2101 = vst [vmem:[#allocation2 + $0x40] sm:$0xff] %v2069_v39  ;;  %v2053_v27 = vrot.slane %v1999_v6, 4  ;;  %v11558_v62 = vsub.f32 %v2343_v14, %v11526_v56  ;;  %v11560_v37 = vand.u32 4294901760, %v2279_v13  ;;  %v11570_v22 = vmul.f32 %v10241_v21, %v10241_v21 }
 0x207   :  { %3810 = vmatpush.msrb.mxu2 %v3713_v20  ;;  %3839 = vmatpush.msrb.mxu3 %v11301_v55  ;;  %v1650_v55 = vadd.f32 %v1649_v45, %v11134_v40  ;;  %v11544_v20 = vand.u32 4294901760, %v2311_v0  ;;  %v11584_v21 = vand.u32 4294901760, %v2247_v24  ;;  %v11589_v45 = vmul.f32 %v10266_v9, %v10266_v9 }
 0x208   :  { %3862 = vmatpush.msra.mxu0 %v11400_v43  ;;  %3895 = vmatpush.msra.mxu1 %v3894_v19  ;;  %v13959_v19 = vperm.slane %v11472_v51, 4  ;;  %v1749_v6 = vpop.f32.mrf.mxu3  ;;  %v11602_v9 = vmul.f32 %v10217_v5, %v10217_v5 }
 0x209   :  { %3814 = vmatpush.msrb.mxu2 %v3719_v2  ;;  %3841 = vmatpush.msrb.mxu3 %v11327_v59  ;;  %v1998_v3 = vmul.f32 %v13961_v15, %v1650_v55  ;;  %v1690_v2 = vadd.f32 %v1689_v58, %v11134_v40  ;;  %v1710_v59 = vadd.f32 %v1709_v4, %v11134_v40  ;;  %v13958_v58 = vperm.slane %v11472_v51, 6 }
 0x20a   :  { %3864 = vmatpush.msra.mxu0 %v11411_v1  ;;  %3901 = vmatpush.msra.mxu1 %v3900_v53  ;;  %v11580_v14 = vsub.f32 %v2311_v0, %v11544_v20  ;;  %v4077_v53 = vand.u32 4294901760, %v11558_v62  ;;  %v11594_v0 = vsub.f32 %v2279_v13, %v11560_v37  ;;  %v14120_v4 = vand.u32 4294901760, %v11437_v7 }
 0x20b   :  { %3818 = vmatpush.msrb.mxu2 %v3725_v47  ;;  %3843 = vmatpush.msrb.mxu3 %v11329_v29  ;;  %v2070_v52 = vsel %vm2060_vm3, %v1998_v3, %v2053_v27  ;;  %v2000_v63 = vmul.f32 %v13959_v19, %v1690_v2  ;;  %v2001_v33 = vmul.f32 %v13960_v32, %v1710_v59  ;;  %v3912_v47 = vand.u32 4294901760, %v3911_v38 }
 0x20c   :  { %3866 = vmatpush.msra.mxu0 %v11413_v36  ;;  %3907 = vmatpush.msra.mxu1 %v3906_v16  ;;  %v11574_v29 = vmul.f32 %v10292_v49, %v10292_v49  ;;  %2102 = vst [vmem:[#allocation2 + $0x48] sm:$0xff] %v2070_v52  ;;  %v13957_v49 = vperm.slane %v11472_v51, 7  ;;  %v1750_v16 = vadd.f32 %v1749_v6, %v11134_v40  ;;  %v4083_v5 = vand.u32 4294901760, %v11580_v14 }
 0x20d   :  { %8873 = vadd.xlane.f32.xlu2 %v8810_v17  ;;  %3689 = vmatmul.f32.vlgmr.msra.gmra.mxu2 %v10817_v42  ;;  %v2054_v39 = vrot.slane %v2001_v33, 4  ;;  %v1729_v27 = vpop.f32.mrf.mxu2  ;;  %v11617_v17 = vsub.f32 %v2247_v24, %v11584_v21  ;;  %v2280_v3 = vsub.f32 1.0, %v11570_v22  ;;  %v4089_v59 = vand.u32 4294901760, %v11594_v0  ;;  %v1769_v24 = vpop.f32.mrf.mxu0 }
 0x20e   :  { %3730 = vmatmul.f32.vlgmr.msra.gmra.mxu3 %v10703_v12  ;;  %3868 = vmatpush.msra.mxu0 %v11418_v44  ;;  %v2344_v55 = vsub.f32 1.0, %v11574_v29  ;;  %v2003_v13 = vmul.f32 %v13957_v49, %v1750_v16  ;;  %v1730_v2 = vadd.f32 %v1729_v27, %v11134_v40  ;;  %v2312_v52 = vsub.f32 1.0, %v11589_v45  ;;  %v1789_v33 = vpop.f32.mrf.mxu1  ;;  %v14136_v49 = vld [vmem:[#allocation23_spill] sm:$0xff] }
 0x20f   :  { %3913 = vmatpush.msra.mxu1 %v3912_v47  ;;  %3933 = vmatpush.msra.mxu2 %v11437_v7  ;;  %v2071_v38 = vsel %vm2060_vm3, %v2000_v63, %v2054_v39  ;;  %v4078_v7 = vsub.f32 %v11558_v62, %v4077_v53  ;;  %v1770_v29 = vadd.f32 %v1769_v24, %v11134_v40  ;;  %v13956_v47 = vperm.slane %v11631_v41, 0 }
 0x210   :  { %3962 = vmatpush.msra.mxu3 %v11400_v43  ;;  %3760 = vmatmul.f32.vlgmr.msrb.gmra.mxu0 %v10740_v60  ;;  %2103 = vst [vmem:[#allocation2 + $0x50] sm:$0xff] %v2071_v38  ;;  %v2055_v63 = vrot.slane %v2003_v13, 4  ;;  %v2002_v22 = vmul.f32 %v13958_v58, %v1730_v2  ;;  %v1790_v39 = vadd.f32 %v1789_v33, %v11134_v40  ;;  %v11643_v6 = vand.u32 4294901760, %v2344_v55 }
 0x211   :  { %3787 = vmatmul.f32.vlgmr.msrb.gmra.mxu1 %v10765_v8  ;;  %3936 = vmatpush.msra.mxu2 %v11442_v26  ;;  %v13950_v45 = vperm.slane %v11631_v41, 1  ;;  %v4084_v16 = vsub.f32 %v11580_v14, %v4083_v5  ;;  %v4095_v38 = vand.u32 4294901760, %v11617_v17  ;;  %v2248_v13 = vsub.f32 1.0, %v11602_v9 }
 0x212   :  { %3964 = vmatpush.msra.mxu3 %v11411_v1  ;;  %3991 = vmatpush.msrb.mxu0 %v14120_v4  ;;  %v11657_v27 = vand.u32 4294901760, %v2312_v52  ;;  %v4079_v9 = vand.u32 4294901760, %v4078_v7  ;;  %v11669_v2 = vand.u32 4294901760, %v2280_v3  ;;  %v13949_v24 = vperm.slane %v11631_v41, 3 }
 0x213   :  { %4022 = vmatpush.msrb.mxu1 %v11400_v43  ;;  %3939 = vmatpush.msra.mxu2 %v11445_v50  ;;  %v14122_v43 = vand.u32 4294901760, %v11442_v26  ;;  %v14123_v26 = vand.u32 4294901760, %v11445_v50  ;;  %v2004_v50 = vmul.f32 %v13956_v47, %v1770_v29  ;;  %v2005_v4 = vmul.f32 %v13950_v45, %v1790_v39 }
 0x214   :  { %3966 = vmatpush.msra.mxu3 %v11413_v36  ;;  %v11675_v33 = vsub.f32 %v2344_v55, %v11643_v6  ;;  %v11686_v29 = vand.u32 4294901760, %v2248_v13  ;;  %v11691_v55 = vsub.f32 %v2312_v52, %v11657_v27  ;;  %v2123_v58 = vmul.f32 %v14136_v49, %v14136_v49 }
 0x215   :  { %3995 = vmatpush.msrb.mxu0 %v14122_v43  ;;  %4024 = vmatpush.msrb.mxu1 %v11411_v1  ;;  %v2072_v1 = vsel %vm2060_vm3, %v2002_v22, %v2055_v63  ;;  %v1829_v63 = vpop.f32.mrf.mxu3  ;;  %v2056_v43 = vrot.slane %v2005_v4, 4  ;;  %v4085_v22 = vand.u32 4294901760, %v4084_v16  ;;  %v13955_v16 = vperm.slane %v11631_v41, 2 }
 0x216   :  { %3942 = vmatpush.msra.mxu2 %v11451_v35  ;;  %3968 = vmatpush.msra.mxu3 %v11418_v44  ;;  %2104 = vst [vmem:[#allocation2 + $0x58] sm:$0xff] %v2072_v1  ;;  %v1830_v35 = vadd.f32 %v1829_v63, %v11134_v40  ;;  %v1809_v1 = vpop.f32.mrf.mxu2  ;;  %v4262_v52 = vand.u32 4294901760, %v11675_v33  ;;  %v11720_v45 = vsub.f32 %v2248_v13, %v11686_v29 }
 0x217   :  { %3999 = vmatpush.msrb.mxu0 %v14123_v26  ;;  %4026 = vmatpush.msrb.mxu1 %v11413_v36  ;;  %v4090_v36 = vsub.f32 %v11594_v0, %v4089_v59  ;;  %v2073_v39 = vsel %vm2060_vm3, %v2004_v50, %v2056_v43  ;;  %v1810_v63 = vadd.f32 %v1809_v1, %v11134_v40  ;;  %v1849_v43 = vpop.f32.mrf.mxu0 }
 0x218   :  { %3820 = vmatmul.f32.vlgmr.msrb.gmra.mxu2 %v10703_v12  ;;  %3845 = vmatmul.f32.vlgmr.msrb.gmra.mxu3 %v10703_v12  ;;  %v2007_v26 = vmul.f32 %v13949_v24, %v1830_v35  ;;  %2105 = vst [vmem:[#allocation2 + $0x60] sm:$0xff] %v2073_v39  ;;  %v13951_v35 = vperm.slane %v11631_v41, 4  ;;  %v1850_v39 = vadd.f32 %v1849_v43, %v11134_v40  ;;  %v14125_v24 = vld [vmem:[#allocation20_spill] sm:$0xff]  ;;  %v14126_v43 = vld [vmem:[#allocation19_spill] sm:$0xff] }
 0x219   :  { %4003 = vmatpush.msrb.mxu0 %v3910_v25  ;;  %4028 = vmatpush.msrb.mxu1 %v11418_v44  ;;  %v14124_v25 = vld [vmem:[#allocation21_spill] sm:$0xff]  ;;  %v4096_v44 = vsub.f32 %v11617_v17, %v4095_v38  ;;  %v4091_v4 = vand.u32 4294901760, %v4090_v36  ;;  %v2006_v36 = vmul.f32 %v13955_v16, %v1810_v63  ;;  %v4263_v13 = vsub.f32 %v11675_v33, %v4262_v52 }
 0x21a   :  { %4047 = vmatpush.msrb.mxu2 %v11526_v56  ;;  %v11680_v7 = vmul.f32 %v14124_v25, %v14124_v25  ;;  %4080 = vmatpush.msrb.mxu3 %v4079_v9  ;;  %v11699_v9 = vsub.f32 %v2280_v3, %v11669_v2  ;;  %v2057_v50 = vrot.slane %v2007_v26, 4  ;;  %v1869_v25 = vpop.f32.mrf.mxu1  ;;  %v11714_v26 = vmul.f32 %v14125_v24, %v14125_v24 }
 0x21b   :  { %3874 = vmatmul.f32.vlgmr.msra.gmra.mxu0 %v10817_v42  ;;  %3915 = vmatmul.f32.vlgmr.msra.gmra.mxu1 %v10703_v12  ;;  %v4097_v3 = vand.u32 4294901760, %v4096_v44  ;;  %v1870_v1 = vadd.f32 %v1869_v25, %v11134_v40  ;;  %v2008_v63 = vmul.f32 %v13951_v35, %v1850_v39  ;;  %v11730_v25 = vmul.f32 %v14126_v43, %v14126_v43 }
 0x21c   :  { %4049 = vmatpush.msrb.mxu2 %v11544_v20  ;;  %4086 = vmatpush.msrb.mxu3 %v4085_v22  ;;  %v13954_v22 = vperm.slane %v11631_v41, 5  ;;  %v2074_v44 = vsel %vm2060_vm3, %v2006_v36, %v2057_v50  ;;  %v4274_v50 = vand.u32 4294901760, %v11699_v9  ;;  %v13952_v35 = vperm.slane %v11631_v41, 7 }
 0x21d   :  { %4118 = vmatpush.msra.mxu0 %v11558_v62  ;;  %4147 = vmatpush.msra.mxu1 %v11526_v56  ;;  %2106 = vst [vmem:[#allocation2 + $0x68] sm:$0xff] %v2074_v44  ;;  %v11750_v44 = vmul.f32 %v10221_v30, %v10221_v30  ;;  %v4264_v62 = vand.u32 4294901760, %v4263_v13  ;;  %v2281_v30 = vsub.f32 1.0, %v11730_v25  ;;  %v1909_v43 = vpop.f32.mrf.mxu3 }
 0x21e   :  { %4051 = vmatpush.msrb.mxu2 %v11560_v37  ;;  %4092 = vmatpush.msrb.mxu3 %v4091_v4  ;;  %v4268_v4 = vand.u32 4294901760, %v11691_v55  ;;  %v2009_v24 = vmul.f32 %v13954_v22, %v1870_v1  ;;  %v4280_v1 = vand.u32 4294901760, %v11720_v45  ;;  %v14134_v22 = vld [vmem:[#allocation27_spill] sm:$0xff] }
 0x21f   :  { %4121 = vmatpush.msra.mxu0 %v11580_v14  ;;  %4149 = vmatpush.msra.mxu1 %v11544_v20  ;;  %v2187_v16 = vmul.f32 %v14134_v22, %v14134_v22 }
 0x220   :  { %4053 = vmatpush.msrb.mxu2 %v11584_v21  ;;  %4098 = vmatpush.msrb.mxu3 %v4097_v3  ;;  %v2345_v3 = vsub.f32 1.0, %v11680_v7  ;;  %v2058_v36 = vrot.slane %v2009_v24, 4  ;;  %v4269_v39 = vsub.f32 %v11691_v55, %v4268_v4  ;;  %v2313_v7 = vsub.f32 1.0, %v11714_v26 }
 0x221   :  { %4124 = vmatpush.msra.mxu0 %v11594_v0  ;;  %4151 = vmatpush.msra.mxu1 %v11560_v37  ;;  %v4281_v13 = vsub.f32 %v11720_v45, %v4280_v1 }
 0x222   :  { %3945 = vmatmul.f32.vlgmr.msra.gmra.mxu2 %v10740_v60  ;;  %3972 = vmatmul.f32.vlgmr.msra.gmra.mxu3 %v10765_v8  ;;  %v2075_v24 = vsel %vm2060_vm3, %v2008_v63, %v2058_v36  ;;  %v11766_v26 = vand.u32 4294901760, %v2345_v3  ;;  %v1910_v63 = vadd.f32 %v1909_v43, %v11134_v40  ;;  %v4270_v25 = vand.u32 4294901760, %v4269_v39  ;;  %v14128_v43 = vld [vmem:[#allocation26_spill] sm:$0xff] }
 0x223   :  { %4127 = vmatpush.msra.mxu0 %v11617_v17  ;;  %4153 = vmatpush.msra.mxu1 %v11584_v21  ;;  %2107 = vst [vmem:[#allocation2 + $0x70] sm:$0xff] %v2075_v24  ;;  %v11780_v36 = vand.u32 4294901760, %v2313_v7  ;;  %v2249_v24 = vsub.f32 1.0, %v11750_v44  ;;  %v11794_v39 = vand.u32 4294901760, %v2281_v30 }
 0x224   :  { %4176 = vmatpush.msra.mxu2 %v4077_v53  ;;  %4207 = vmatpush.msra.mxu3 %v11526_v56  ;;  %v4275_v53 = vsub.f32 %v11699_v9, %v4274_v50  ;;  %v1889_v56 = vpop.f32.mrf.mxu2 }
 0x225   :  { %4005 = vmatmul.f32.vlgmr.msrb.gmra.mxu0 %v10703_v12  ;;  %4030 = vmatmul.f32.vlgmr.msrb.gmra.mxu1 %v10703_v12  ;;  %v1890_v14 = vadd.f32 %v1889_v56, %v11134_v40  ;;  %v2011_v40 = vmul.f32 %v13952_v35, %v1910_v63  ;;  %v14127_v56 = vld [vmem:[#allocation28_spill] sm:$0xff] }
 0x226   :  { %4180 = vmatpush.msra.mxu2 %v4083_v5  ;;  %4209 = vmatpush.msra.mxu3 %v11544_v20  ;;  %v13953_v5 = vperm.slane %v11631_v41, 6  ;;  %v11776_v20 = vpop.f32.mrf.mxu0  ;;  %v4276_v0 = vand.u32 4294901760, %v4275_v53  ;;  %v2218_v17 = vmul.f32 %v14127_v56, %v14127_v56  ;;  %v14130_v56 = vld [vmem:[#allocation22_spill] sm:$0xff] }
 0x227   :  { %4232 = vmatpush.msrb.mxu0 %v11643_v6  ;;  %4265 = vmatpush.msrb.mxu1 %v4264_v62  ;;  %v2059_v62 = vrot.slane %v2011_v40, 4 }
 0x228   :  { %4184 = vmatpush.msra.mxu2 %v4089_v59  ;;  %4211 = vmatpush.msra.mxu3 %v11560_v37  ;;  %v11787_v59 = vpop.f32.mrf.mxu1  ;;  %v11792_v37 = vsub.f32 %v2345_v3, %v11766_v26  ;;  %v2010_v44 = vmul.f32 %v13953_v5, %v1890_v14  ;;  %v11806_v3 = vand.u32 4294901760, %v2249_v24  ;;  %v2186_v14 = vmul.f32 %v14128_v43, %v14128_v43 }
 0x229   :  { %4234 = vmatpush.msrb.mxu0 %v11657_v27  ;;  %4271 = vmatpush.msrb.mxu1 %v4270_v25  ;;  %v14129_v25 = vld [vmem:[#allocation24_spill] sm:$0xff]  ;;  %v2346_v40 = vsub.f32 1.0, %v2218_v17 }
 0x22a   :  { %4188 = vmatpush.msra.mxu2 %v4095_v38  ;;  %4213 = vmatpush.msra.mxu3 %v11584_v21  ;;  %v4282_v38 = vand.u32 4294901760, %v4281_v13  ;;  %v11804_v21 = vsub.f32 %v2313_v7, %v11780_v36  ;;  %v2076_v53 = vsel %vm2060_vm3, %v2010_v44, %v2059_v62  ;;  %v4447_v63 = vand.u32 4294901760, %v11792_v37  ;;  %v11824_v44 = vpop.f32.mrf.mxu3 }
 0x22b   :  { %4236 = vmatpush.msrb.mxu0 %v11669_v2  ;;  %4277 = vmatpush.msrb.mxu1 %v4276_v0  ;;  %2108 = vst [vmem:[#allocation2 + $0x78] sm:$0xff] %v2076_v53  ;;  %v11816_v7 = vsub.f32 %v2281_v30, %v11794_v39  ;;  %v2154_v13 = vmul.f32 %v14129_v25, %v14129_v25  ;;  %v2314_v17 = vsub.f32 1.0, %v2186_v14 }
 0x22c   :  { %4059 = vmatmul.f32.vlgmr.msrb.gmra.mxu2 %v10817_v42  ;;  %4100 = vmatmul.f32.vlgmr.msrb.gmra.mxu3 %v10703_v12  ;;  %v11822_v0 = vpop.f32.mrf.mxu2  ;;  %v4453_v30 = vand.u32 4294901760, %v11804_v21  ;;  %v11831_v62 = vsub.f32 %v2249_v24, %v11806_v3 }
 0x22d   :  { %4238 = vmatpush.msrb.mxu0 %v11686_v29  ;;  %4283 = vmatpush.msrb.mxu1 %v4282_v38  ;;  %v2122_v38 = vmul.f32 %v14130_v56, %v14130_v56  ;;  %v2282_v24 = vsub.f32 1.0, %v2154_v13 }
 0x22e   :  { %4303 = vmatpush.msrb.mxu2 %v11675_v33  ;;  %4332 = vmatpush.msrb.mxu3 %v11643_v6  ;;  %v11837_v53 = vpop.f32.mrf.mxu0  ;;  %v4448_v33 = vsub.f32 %v11792_v37, %v4447_v63 }
 0x22f   :  { %4130 = vmatmul.f32.vlgmr.msra.gmra.mxu0 %v10740_v60  ;;  %4157 = vmatmul.f32.vlgmr.msra.gmra.mxu1 %v10765_v8  ;;  %14131 = vst [vmem:[#allocation15_spill] sm:$0xff] %v11837_v53  ;;  %v2250_v14 = vsub.f32 1.0, %v2122_v38  ;;  %v11874_v25 = vand.u32 4294901760, %v2282_v24  ;;  %v14182_v53 = vld [vmem:[#allocation48_spill] sm:$0xff] }
 0x230   :  { %4306 = vmatpush.msrb.mxu2 %v11691_v55  ;;  %4334 = vmatpush.msrb.mxu3 %v11657_v27  ;;  %v11850_v43 = vpop.f32.mrf.mxu1  ;;  %v4454_v55 = vsub.f32 %v11804_v21, %v4453_v30 }
 0x231   :  { %4361 = vmatpush.msra.mxu0 %v4262_v52  ;;  %4392 = vmatpush.msra.mxu1 %v11643_v6  ;;  %v4459_v52 = vand.u32 4294901760, %v11816_v7  ;;  %v11848_v6 = vand.u32 4294901760, %v2346_v40  ;;  %14132 = vst [vmem:[#allocation17_spill] sm:$0xff] %v11850_v43  ;;  %v14169_v43 = vld [vmem:[#allocation39_spill] sm:$0xff] }
 0x232   :  { %4309 = vmatpush.msrb.mxu2 %v11699_v9  ;;  %4336 = vmatpush.msrb.mxu3 %v11669_v2  ;;  %v4449_v9 = vand.u32 4294901760, %v4448_v33  ;;  %v4455_v13 = vand.u32 4294901760, %v4454_v55  ;;  %v11889_v56 = vpop.f32.mrf.mxu3  ;;  %v11896_v55 = vsub.f32 %v2282_v24, %v11874_v25 }
 0x233   :  { %4365 = vmatpush.msra.mxu0 %v4268_v4  ;;  %4394 = vmatpush.msra.mxu1 %v11657_v27  ;;  %v4465_v4 = vand.u32 4294901760, %v11831_v62  ;;  %v11861_v27 = vand.u32 4294901760, %v2314_v17 }
 0x234   :  { %4312 = vmatpush.msrb.mxu2 %v11720_v45  ;;  %4338 = vmatpush.msrb.mxu3 %v11686_v29 }
 0x235   :  { %4369 = vmatpush.msra.mxu0 %v4274_v50  ;;  %4396 = vmatpush.msra.mxu1 %v11669_v2  ;;  %v4460_v50 = vsub.f32 %v11816_v7, %v4459_v52  ;;  %v11872_v2 = vsub.f32 %v2346_v40, %v11848_v6  ;;  %v4466_v45 = vsub.f32 %v11831_v62, %v4465_v4  ;;  %v11887_v40 = vpop.f32.mrf.mxu2 }
 0x236   :  { %4190 = vmatmul.f32.vlgmr.msra.gmra.mxu2 %v10703_v12  ;;  %4215 = vmatmul.f32.vlgmr.msra.gmra.mxu3 %v10703_v12 }
 0x237   :  { %4373 = vmatpush.msra.mxu0 %v4280_v1  ;;  %4398 = vmatpush.msra.mxu1 %v11686_v29  ;;  %v11883_v29 = vsub.f32 %v2314_v17, %v11861_v27  ;;  %v11885_v1 = vand.u32 4294901760, %v2250_v14  ;;  %v4461_v38 = vand.u32 4294901760, %v4460_v50  ;;  %v4632_v33 = vand.u32 4294901760, %v11872_v2  ;;  %v11898_v17 = vpop.f32.mrf.mxu0 }
 0x238   :  { %4417 = vmatpush.msra.mxu2 %v11766_v26  ;;  %4450 = vmatpush.msra.mxu3 %v4449_v9  ;;  %v14133_v9 = vld [vmem:[#allocation29_spill] sm:$0xff]  ;;  %v11909_v24 = vpop.f32.mrf.mxu1 }
 0x239   :  { %4244 = vmatmul.f32.vlgmr.msrb.gmra.mxu0 %v10817_v42  ;;  %4285 = vmatmul.f32.vlgmr.msrb.gmra.mxu1 %v10703_v12  ;;  %v2219_v35 = vmul.f32 %v14133_v9, %v14133_v9  ;;  %v4638_v50 = vand.u32 4294901760, %v11883_v29  ;;  %v11907_v5 = vsub.f32 %v2250_v14, %v11885_v1  ;;  %v14135_v14 = vld [vmem:[#allocation25_spill] sm:$0xff] }
 0x23a   :  { %4419 = vmatpush.msra.mxu2 %v11780_v36  ;;  %4456 = vmatpush.msra.mxu3 %v4455_v13  ;;  %v4467_v13 = vand.u32 4294901760, %v4466_v45  ;;  %v4633_v45 = vsub.f32 %v11872_v2, %v4632_v33  ;;  %v2155_v9 = vmul.f32 %v14135_v14, %v14135_v14  ;;  %v2315_v14 = vsub.f32 1.0, %v2187_v16 }
 0x23b   :  { %4488 = vmatpush.msrb.mxu0 %v11792_v37  ;;  %4517 = vmatpush.msrb.mxu1 %v11766_v26  ;;  %v2347_v22 = vsub.f32 1.0, %v2219_v35  ;;  %v4650_v47 = vand.u32 4294901760, %v11907_v5 }
 0x23c   :  { %4421 = vmatpush.msra.mxu2 %v11794_v39  ;;  %4462 = vmatpush.msra.mxu3 %v4461_v38  ;;  %v4644_v38 = vand.u32 4294901760, %v11896_v55  ;;  %v4634_v35 = vand.u32 4294901760, %v4633_v45  ;;  %v11943_v19 = vpop.f32.mrf.mxu3  ;;  %v2283_v16 = vsub.f32 1.0, %v2155_v9  ;;  %v2251_v45 = vsub.f32 1.0, %v2123_v58 }
 0x23d   :  { %4491 = vmatpush.msrb.mxu0 %v11804_v21  ;;  %4519 = vmatpush.msrb.mxu1 %v11780_v36  ;;  %14137 = vst [vmem:[#allocation12_spill] sm:$0xff] %v11943_v19  ;;  %v11947_v49 = vand.u32 4294901760, %v2347_v22  ;;  %v4651_v21 = vsub.f32 %v11907_v5, %v4650_v47 }
 0x23e   :  { %4423 = vmatpush.msra.mxu2 %v11806_v3  ;;  %4468 = vmatpush.msra.mxu3 %v4467_v13  ;;  %v4639_v13 = vsub.f32 %v11883_v29, %v4638_v50  ;;  %v4645_v37 = vsub.f32 %v11896_v55, %v4644_v38 }
 0x23f   :  { %4494 = vmatpush.msrb.mxu0 %v11816_v7  ;;  %4521 = vmatpush.msrb.mxu1 %v11794_v39  ;;  %v11967_v9 = vsub.f32 %v2347_v22, %v11947_v49  ;;  %v4652_v58 = vand.u32 4294901760, %v4651_v21  ;;  %v14140_v21 = vld [vmem:[#allocation34_spill] sm:$0xff] }
 0x240   :  { %4315 = vmatmul.f32.vlgmr.msrb.gmra.mxu2 %v10740_v60  ;;  %4342 = vmatmul.f32.vlgmr.msrb.gmra.mxu3 %v10765_v8  ;;  %v4646_v7 = vand.u32 4294901760, %v4645_v37 }
 0x241   :  { %4497 = vmatpush.msrb.mxu0 %v11831_v62  ;;  %4523 = vmatpush.msrb.mxu1 %v11806_v3  ;;  %v11979_v62 = vand.u32 4294901760, %v2251_v45  ;;  %v13966_v37 = vand.u32 4294901760, %v11967_v9 }
 0x242   :  { %4546 = vmatpush.msrb.mxu2 %v4447_v63  ;;  %4577 = vmatpush.msrb.mxu3 %v11766_v26  ;;  %v11941_v63 = vpop.f32.mrf.mxu2  ;;  %v4640_v26 = vand.u32 4294901760, %v4639_v13  ;;  %v14138_v13 = vld [vmem:[#allocation30_spill] sm:$0xff] }
 0x243   :  { %4375 = vmatmul.f32.vlgmr.msra.gmra.mxu0 %v10703_v12  ;;  %4400 = vmatmul.f32.vlgmr.msra.gmra.mxu1 %v10703_v12 }
 0x244   :  { %4550 = vmatpush.msrb.mxu2 %v4453_v30  ;;  %4579 = vmatpush.msrb.mxu3 %v11780_v36  ;;  %v11954_v30 = vpop.f32.mrf.mxu0  ;;  %v11958_v36 = vand.u32 4294901760, %v2315_v14 }
 0x245   :  { %4602 = vmatpush.msra.mxu0 %v11848_v6  ;;  %4635 = vmatpush.msra.mxu1 %v4634_v35  ;;  %v2220_v35 = vmul.f32 %v14138_v13, %v14138_v13 }
 0x246   :  { %4554 = vmatpush.msrb.mxu2 %v4459_v52  ;;  %4581 = vmatpush.msrb.mxu3 %v11794_v39  ;;  %v11962_v52 = vpop.f32.mrf.mxu1  ;;  %v11969_v39 = vand.u32 4294901760, %v2283_v16 }
 0x247   :  { %4604 = vmatpush.msra.mxu0 %v11861_v27  ;;  %4641 = vmatpush.msra.mxu1 %v4640_v26 }
 0x248   :  { %4558 = vmatpush.msrb.mxu2 %v4465_v4  ;;  %4583 = vmatpush.msrb.mxu3 %v11806_v3  ;;  %v11977_v3 = vsub.f32 %v2315_v14, %v11958_v36  ;;  %v14139_v4 = vld [vmem:[#allocation32_spill] sm:$0xff]  ;;  %v11988_v26 = vsub.f32 %v2283_v16, %v11969_v39  ;;  %v2156_v14 = vmul.f32 %v14140_v21, %v14140_v21 }
 0x249   :  { %4606 = vmatpush.msra.mxu0 %v11874_v25  ;;  %4647 = vmatpush.msra.mxu1 %v4646_v7  ;;  %v2188_v22 = vmul.f32 %v14139_v4, %v14139_v4  ;;  %v2348_v7 = vsub.f32 1.0, %v2220_v35  ;;  %v12003_v4 = vsub.f32 %v2251_v45, %v11979_v62  ;;  %v14141_v21 = vld [vmem:[#allocation36_spill] sm:$0xff] }
 0x24a   :  { %4429 = vmatmul.f32.vlgmr.msra.gmra.mxu2 %v10817_v42  ;;  %4470 = vmatmul.f32.vlgmr.msra.gmra.mxu3 %v10703_v12  ;;  %v11994_v13 = vpop.f32.mrf.mxu2  ;;  %v13965_v16 = vand.u32 4294901760, %v11977_v3  ;;  %v2124_v32 = vmul.f32 %v14141_v21, %v14141_v21  ;;  %v2284_v45 = vsub.f32 1.0, %v2156_v14 }
 0x24b   :  { %4608 = vmatpush.msra.mxu0 %v11885_v1  ;;  %4653 = vmatpush.msra.mxu1 %v4652_v58  ;;  %v11996_v58 = vpop.f32.mrf.mxu3  ;;  %v2316_v35 = vsub.f32 1.0, %v2188_v22 }
 0x24c   :  { %4673 = vmatpush.msra.mxu2 %v11872_v2  ;;  %4702 = vmatpush.msra.mxu3 %v11848_v6  ;;  %v12009_v15 = vpop.f32.mrf.mxu0  ;;  %v4818_v2 = vsub.f32 %v11967_v9, %v13966_v37  ;;  %v2252_v14 = vsub.f32 1.0, %v2124_v32  ;;  %v12046_v21 = vand.u32 4294901760, %v2284_v45  ;;  %v14144_v37 = vld [vmem:[#allocation33_spill] sm:$0xff] }
 0x24d   :  { %4500 = vmatmul.f32.vlgmr.msrb.gmra.mxu0 %v10740_v60  ;;  %4527 = vmatmul.f32.vlgmr.msrb.gmra.mxu1 %v10765_v8 }
 0x24e   :  { %4676 = vmatpush.msra.mxu2 %v11883_v29  ;;  %4704 = vmatpush.msra.mxu3 %v11861_v27  ;;  %v12022_v22 = vpop.f32.mrf.mxu1  ;;  %v4824_v29 = vsub.f32 %v11977_v3, %v13965_v16  ;;  %v12068_v54 = vsub.f32 %v2284_v45, %v12046_v21 }
 0x24f   :  { %4731 = vmatpush.msrb.mxu0 %v4632_v33  ;;  %4762 = vmatpush.msrb.mxu1 %v11848_v6  ;;  %v13964_v33 = vand.u32 4294901760, %v11988_v26  ;;  %v12020_v6 = vand.u32 4294901760, %v2348_v7  ;;  %14142 = vst [vmem:[#allocation14_spill] sm:$0xff] %v12022_v22 }
 0x250   :  { %4679 = vmatpush.msra.mxu2 %v11896_v55  ;;  %4706 = vmatpush.msra.mxu3 %v11874_v25  ;;  %v4819_v55 = vand.u32 4294901760, %v4818_v2  ;;  %v4825_v32 = vand.u32 4294901760, %v4824_v29 }
 0x251   :  { %4735 = vmatpush.msrb.mxu0 %v4638_v50  ;;  %4764 = vmatpush.msrb.mxu1 %v11861_v27  ;;  %v13963_v50 = vand.u32 4294901760, %v12003_v4  ;;  %v12033_v27 = vand.u32 4294901760, %v2316_v35 }
 0x252   :  { %4682 = vmatpush.msra.mxu2 %v11907_v5  ;;  %4708 = vmatpush.msra.mxu3 %v11885_v1 }
 0x253   :  { %4739 = vmatpush.msrb.mxu0 %v4644_v38  ;;  %4766 = vmatpush.msrb.mxu1 %v11874_v25  ;;  %v4830_v38 = vsub.f32 %v11988_v26, %v13964_v33  ;;  %v12044_v25 = vsub.f32 %v2348_v7, %v12020_v6  ;;  %v12055_v5 = vsub.f32 %v2316_v35, %v12033_v27  ;;  %v12059_v7 = vpop.f32.mrf.mxu2  ;;  %v12061_v2 = vpop.f32.mrf.mxu3 }
 0x254   :  { %4560 = vmatmul.f32.vlgmr.msrb.gmra.mxu2 %v10703_v12  ;;  %4585 = vmatmul.f32.vlgmr.msrb.gmra.mxu3 %v10703_v12  ;;  %v12070_v35 = vpop.f32.mrf.mxu0 }
 0x255   :  { %4743 = vmatpush.msrb.mxu0 %v4650_v47  ;;  %4768 = vmatpush.msrb.mxu1 %v11885_v1  ;;  %v4836_v47 = vsub.f32 %v12003_v4, %v13963_v50  ;;  %v12057_v1 = vand.u32 4294901760, %v2252_v14  ;;  %v4831_v29 = vand.u32 4294901760, %v4830_v38  ;;  %v14143_v50 = vld [vmem:[#allocation31_spill] sm:$0xff]  ;;  %v14148_v41 = vand.u32 4294901760, %v12055_v5 }
 0x256   :  { %4787 = vmatpush.msrb.mxu2 %v11947_v49  ;;  %4820 = vmatpush.msrb.mxu3 %v4819_v55  ;;  %v2221_v33 = vmul.f32 %v14143_v50, %v14143_v50  ;;  %v12081_v45 = vpop.f32.mrf.mxu1  ;;  %v2189_v55 = vmul.f32 %v14144_v37, %v14144_v37  ;;  %v14145_v50 = vand.u32 4294901760, %v12044_v25 }
 0x257   :  { %4614 = vmatmul.f32.vlgmr.msra.gmra.mxu0 %v10817_v42  ;;  %4655 = vmatmul.f32.vlgmr.msra.gmra.mxu1 %v10703_v12  ;;  %v12079_v16 = vsub.f32 %v2252_v14, %v12057_v1  ;;  %v14146_v14 = vld [vmem:[#allocation35_spill] sm:$0xff]  ;;  %v5009_v23 = vsub.f32 %v12055_v5, %v14148_v41 }
 0x258   :  { %4789 = vmatpush.msrb.mxu2 %v11958_v36  ;;  %4826 = vmatpush.msrb.mxu3 %v4825_v32  ;;  %v4837_v32 = vand.u32 4294901760, %v4836_v47  ;;  %v5003_v47 = vsub.f32 %v12044_v25, %v14145_v50  ;;  %v2157_v38 = vmul.f32 %v14146_v14, %v14146_v14  ;;  %v2349_v37 = vsub.f32 1.0, %v2221_v33 }
 0x259   :  { %4858 = vmatpush.msra.mxu0 %v11967_v9  ;;  %4887 = vmatpush.msra.mxu1 %v11947_v49  ;;  %v2317_v14 = vsub.f32 1.0, %v2189_v55  ;;  %v14150_v33 = vand.u32 4294901760, %v11977_v3  ;;  %v14165_v48 = vand.u32 4294901760, %v12079_v16 }
 0x25a   :  { %4791 = vmatpush.msrb.mxu2 %v11969_v39  ;;  %4832 = vmatpush.msrb.mxu3 %v4831_v29  ;;  %v14149_v29 = vld [vmem:[#allocation37_spill] sm:$0xff]  ;;  %v2285_v55 = vsub.f32 1.0, %v2157_v38  ;;  %v14154_v38 = vand.u32 4294901760, %v12003_v4 }
 0x25b   :  { %4861 = vmatpush.msra.mxu0 %v11977_v3  ;;  %4889 = vmatpush.msra.mxu1 %v11958_v36  ;;  %v2125_v51 = vmul.f32 %v14149_v29, %v14149_v29  ;;  %v14152_v3 = vand.u32 4294901760, %v11988_v26  ;;  %v14153_v29 = vand.u32 4294901760, %v12079_v16 }
 0x25c   :  { %4793 = vmatpush.msrb.mxu2 %v11979_v62  ;;  %4838 = vmatpush.msrb.mxu3 %v4837_v32  ;;  %v14147_v32 = vand.u32 4294901760, %v11967_v9  ;;  %v5004_v9 = vand.u32 4294901760, %v5003_v47  ;;  %v12113_v31 = vpop.f32.mrf.mxu2  ;;  %v5010_v47 = vand.u32 4294901760, %v5009_v23 }
 0x25d   :  { %4864 = vmatpush.msra.mxu0 %v11988_v26  ;;  %4891 = vmatpush.msra.mxu1 %v11969_v39  ;;  %v12115_v50 = vpop.f32.mrf.mxu3  ;;  %v2253_v11 = vsub.f32 1.0, %v2125_v51 }
 0x25e   :  { %4685 = vmatmul.f32.vlgmr.msra.gmra.mxu2 %v10740_v60  ;;  %4712 = vmatmul.f32.vlgmr.msra.gmra.mxu3 %v10765_v8 }
 0x25f   :  { %4867 = vmatpush.msra.mxu0 %v12003_v4  ;;  %4893 = vmatpush.msra.mxu1 %v11979_v62  ;;  %v12151_v4 = vand.u32 4294901760, %v2253_v11 }
 0x260   :  { %4916 = vmatpush.msra.mxu2 %v14147_v32  ;;  %4947 = vmatpush.msra.mxu3 %v11947_v49  ;;  %v14151_v32 = vand.u32 4294901760, %v12068_v54  ;;  %v12119_v49 = vand.u32 4294901760, %v2349_v37 }
 0x261   :  { %4745 = vmatmul.f32.vlgmr.msrb.gmra.mxu0 %v10703_v12  ;;  %4770 = vmatmul.f32.vlgmr.msrb.gmra.mxu1 %v10703_v12 }
 0x262   :  { %4920 = vmatpush.msra.mxu2 %v14150_v33  ;;  %v5015_v41 = vsub.f32 %v12068_v54, %v14151_v32  ;;  %4949 = vmatpush.msra.mxu3 %v11958_v36  ;;  %v5021_v33 = vsub.f32 %v12079_v16, %v14153_v29  ;;  %v12126_v32 = vpop.f32.mrf.mxu0  ;;  %v12130_v36 = vand.u32 4294901760, %v2317_v14  ;;  %v12139_v23 = vsub.f32 %v2349_v37, %v12119_v49  ;;  %v14156_v37 = vld [vmem:[#allocation42_spill] sm:$0xff] }
 0x263   :  { %4972 = vmatpush.msrb.mxu0 %v12020_v6  ;;  %5005 = vmatpush.msrb.mxu1 %v5004_v9  ;;  %v12134_v9 = vpop.f32.mrf.mxu1 }
 0x264   :  { %4924 = vmatpush.msra.mxu2 %v14152_v3  ;;  %4951 = vmatpush.msra.mxu3 %v11969_v39  ;;  %v5016_v26 = vand.u32 4294901760, %v5015_v41  ;;  %v12141_v39 = vand.u32 4294901760, %v2285_v55  ;;  %v14155_v3 = vld [vmem:[#allocation40_spill] sm:$0xff]  ;;  %v5022_v51 = vand.u32 4294901760, %v5021_v33  ;;  %v2190_v41 = vmul.f32 %v14156_v37, %v14156_v37 }
 0x265   :  { %4974 = vmatpush.msrb.mxu0 %v12033_v27  ;;  %5011 = vmatpush.msrb.mxu1 %v5010_v47  ;;  %v2222_v29 = vmul.f32 %v14155_v3, %v14155_v3  ;;  %v14158_v37 = vand.u32 4294901760, %v12044_v25  ;;  %v12175_v47 = vsub.f32 %v2253_v11, %v12151_v4 }
 0x266   :  { %4928 = vmatpush.msra.mxu2 %v14154_v38  ;;  %4953 = vmatpush.msra.mxu3 %v11979_v62  ;;  %v12149_v62 = vsub.f32 %v2317_v14, %v12130_v36  ;;  %v12160_v33 = vsub.f32 %v2285_v55, %v12141_v39  ;;  %v14157_v38 = vld [vmem:[#allocation44_spill] sm:$0xff] }
 0x267   :  { %4976 = vmatpush.msrb.mxu0 %v12046_v21  ;;  %5017 = vmatpush.msrb.mxu1 %v5016_v26  ;;  %v2158_v14 = vmul.f32 %v14157_v38, %v14157_v38  ;;  %v2350_v26 = vsub.f32 1.0, %v2222_v29  ;;  %v12166_v3 = vpop.f32.mrf.mxu2  ;;  %v14159_v38 = vld [vmem:[#allocation38_spill] sm:$0xff]  ;;  %v2318_v29 = vsub.f32 1.0, %v2190_v41  ;;  %v13978_v55 = vand.u32 4294901760, %v12175_v47 }
 0x268   :  { %4799 = vmatmul.f32.vlgmr.msrb.gmra.mxu2 %v10817_v42  ;;  %4840 = vmatmul.f32.vlgmr.msrb.gmra.mxu3 %v10703_v12  ;;  %v2126_v46 = vmul.f32 %v14159_v38, %v14159_v38 }
 0x269   :  { %4978 = vmatpush.msrb.mxu0 %v12057_v1  ;;  %5023 = vmatpush.msrb.mxu1 %v5022_v51  ;;  %v12168_v51 = vpop.f32.mrf.mxu3  ;;  %v2286_v41 = vsub.f32 1.0, %v2158_v14 }
 0x26a   :  { %5043 = vmatpush.msrb.mxu2 %v12044_v25  ;;  %5072 = vmatpush.msrb.mxu3 %v12020_v6  ;;  %v12181_v18 = vpop.f32.mrf.mxu0  ;;  %v14160_v25 = vand.u32 4294901760, %v12055_v5  ;;  %v2254_v14 = vsub.f32 1.0, %v2126_v46 }
 0x26b   :  { %4870 = vmatmul.f32.vlgmr.msra.gmra.mxu0 %v10740_v60  ;;  %4897 = vmatmul.f32.vlgmr.msra.gmra.mxu1 %v10765_v8  ;;  %v12194_v38 = vpop.f32.mrf.mxu1 }
 0x26c   :  { %5046 = vmatpush.msrb.mxu2 %v12055_v5  ;;  %5074 = vmatpush.msrb.mxu3 %v12033_v27  ;;  %14162 = vst [vmem:[#allocation18_spill] sm:$0xff] %v12194_v38  ;;  %v14163_v5 = vand.u32 4294901760, %v12068_v54 }
 0x26d   :  { %5101 = vmatpush.msra.mxu0 %v14158_v37  ;;  %5132 = vmatpush.msra.mxu1 %v12020_v6  ;;  %v14161_v37 = vand.u32 4294901760, %v12139_v23  ;;  %v12192_v6 = vand.u32 4294901760, %v2350_v26 }
 0x26e   :  { %5049 = vmatpush.msrb.mxu2 %v12068_v54  ;;  %5076 = vmatpush.msrb.mxu3 %v12046_v21 }
 0x26f   :  { %5105 = vmatpush.msra.mxu0 %v14160_v25  ;;  %v5188_v11 = vsub.f32 %v12139_v23, %v14161_v37  ;;  %5134 = vmatpush.msra.mxu1 %v12033_v27  ;;  %v14164_v25 = vand.u32 4294901760, %v12149_v62  ;;  %v12205_v27 = vand.u32 4294901760, %v2318_v29 }
 0x270   :  { %5052 = vmatpush.msrb.mxu2 %v12079_v16  ;;  %5078 = vmatpush.msrb.mxu3 %v12057_v1 }
 0x271   :  { %5109 = vmatpush.msra.mxu0 %v14163_v5  ;;  %v5194_v37 = vsub.f32 %v12149_v62, %v14164_v25  ;;  %5136 = vmatpush.msra.mxu1 %v12046_v21  ;;  %v5189_v54 = vand.u32 4294901760, %v5188_v11  ;;  %v14166_v5 = vand.u32 4294901760, %v12160_v33  ;;  %v12216_v21 = vsub.f32 %v2350_v26, %v12192_v6 }
 0x272   :  { %4930 = vmatmul.f32.vlgmr.msra.gmra.mxu2 %v10703_v12  ;;  %4955 = vmatmul.f32.vlgmr.msra.gmra.mxu3 %v10703_v12  ;;  %v12218_v25 = vand.u32 4294901760, %v2286_v41  ;;  %v12227_v16 = vsub.f32 %v2318_v29, %v12205_v27  ;;  %v12231_v26 = vpop.f32.mrf.mxu2  ;;  %v12233_v11 = vpop.f32.mrf.mxu3 }
 0x273   :  { %5113 = vmatpush.msra.mxu0 %v14165_v48  ;;  %v5200_v61 = vsub.f32 %v12160_v33, %v14166_v5  ;;  %5138 = vmatpush.msra.mxu1 %v12057_v1  ;;  %v5195_v46 = vand.u32 4294901760, %v5194_v37  ;;  %v5206_v48 = vsub.f32 %v12175_v47, %v13978_v55  ;;  %v12229_v1 = vand.u32 4294901760, %v2254_v14  ;;  %v12242_v29 = vpop.f32.mrf.mxu0  ;;  %v14167_v55 = vld [vmem:[#allocation41_spill] sm:$0xff]  ;;  %v12255_v34 = vpop.f32.mrf.mxu1 }
 0x274   :  { %5157 = vmatpush.msra.mxu2 %v12119_v49  ;;  %5190 = vmatpush.msra.mxu3 %v5189_v54  ;;  %v12240_v5 = vsub.f32 %v2286_v41, %v12218_v25  ;;  %v2223_v57 = vmul.f32 %v14167_v55, %v14167_v55  ;;  %v2127_v55 = vmul.f32 %v14169_v43, %v14169_v43 }
 0x275   :  { %4984 = vmatmul.f32.vlgmr.msrb.gmra.mxu0 %v10817_v42  ;;  %5025 = vmatmul.f32.vlgmr.msrb.gmra.mxu1 %v10703_v12  ;;  %v5201_v37 = vand.u32 4294901760, %v5200_v61  ;;  %v2191_v61 = vmul.f32 %v14168_v10, %v14168_v10  ;;  %v12253_v41 = vsub.f32 %v2254_v14, %v12229_v1 }
 0x276   :  { %5159 = vmatpush.msra.mxu2 %v12130_v36  ;;  %5196 = vmatpush.msra.mxu3 %v5195_v46  ;;  %v5207_v46 = vand.u32 4294901760, %v5206_v48  ;;  %v14170_v48 = vld [vmem:[#allocation45_spill] sm:$0xff]  ;;  %v2351_v43 = vsub.f32 1.0, %v2223_v57  ;;  %v2255_v57 = vsub.f32 1.0, %v2127_v55 }
 0x277   :  { %5228 = vmatpush.msrb.mxu0 %v12139_v23  ;;  %5257 = vmatpush.msrb.mxu1 %v12119_v49  ;;  %v2159_v10 = vmul.f32 %v14170_v48, %v14170_v48  ;;  %v14173_v48 = vand.u32 4294901760, %v12227_v16  ;;  %v2319_v19 = vsub.f32 1.0, %v2191_v61 }
 0x278   :  { %5161 = vmatpush.msra.mxu2 %v12141_v39  ;;  %5202 = vmatpush.msra.mxu3 %v5201_v37  ;;  %v14171_v37 = vand.u32 4294901760, %v12216_v21 }
 0x279   :  { %5231 = vmatpush.msrb.mxu0 %v12149_v62  ;;  %5259 = vmatpush.msrb.mxu1 %v12130_v36  ;;  %v5379_v38 = vsub.f32 %v12227_v16, %v14173_v48  ;;  %v14176_v48 = vand.u32 4294901760, %v12240_v5  ;;  %v2287_v61 = vsub.f32 1.0, %v2159_v10 }
 0x27a   :  { %5163 = vmatpush.msra.mxu2 %v12151_v4  ;;  %5208 = vmatpush.msra.mxu3 %v5207_v46  ;;  %v5373_v14 = vsub.f32 %v12216_v21, %v14171_v37  ;;  %v14172_v46 = vand.u32 4294901760, %v12139_v23  ;;  %v14174_v37 = vld [vmem:[#allocation52_spill] sm:$0xff]  ;;  %v14175_v23 = vand.u32 4294901760, %v12149_v62  ;;  %v14178_v62 = vand.u32 4294901760, %v12160_v33 }
 0x27b   :  { %5234 = vmatpush.msrb.mxu0 %v12160_v33  ;;  %5261 = vmatpush.msrb.mxu1 %v12141_v39  ;;  %v12279_v54 = vmul.f32 %v14174_v37, %v14174_v37  ;;  %v5385_v28 = vsub.f32 %v12240_v5, %v14176_v48  ;;  %v12302_v48 = vand.u32 4294901760, %v2319_v19  ;;  %v14181_v33 = vand.u32 4294901760, %v12175_v47 }
 0x27c   :  { %5055 = vmatmul.f32.vlgmr.msrb.gmra.mxu2 %v10740_v60  ;;  %5082 = vmatmul.f32.vlgmr.msrb.gmra.mxu3 %v10765_v8  ;;  %v12289_v22 = vpop.f32.mrf.mxu2  ;;  %v12291_v37 = vpop.f32.mrf.mxu3 }
 0x27d   :  { %5237 = vmatpush.msrb.mxu0 %v12175_v47  ;;  %5263 = vmatpush.msrb.mxu1 %v12151_v4  ;;  %14177 = vst [vmem:[#allocation16_spill] sm:$0xff] %v12291_v37  ;;  %v3505_v37 = vpop.f32.mrf.mxu0  ;;  %v12328_v47 = vsub.f32 %v2319_v19, %v12302_v48 }
 0x27e   :  { %5286 = vmatpush.msrb.mxu2 %v14172_v46  ;;  %5317 = vmatpush.msrb.mxu3 %v12119_v49  ;;  %v5374_v46 = vand.u32 4294901760, %v5373_v14  ;;  %v12295_v49 = vand.u32 4294901760, %v2351_v43  ;;  %v5380_v14 = vand.u32 4294901760, %v5379_v38  ;;  %v5386_v38 = vand.u32 4294901760, %v5385_v28 }
 0x27f   :  { %5115 = vmatmul.f32.vlgmr.msra.gmra.mxu0 %v10703_v12  ;;  %5140 = vmatmul.f32.vlgmr.msra.gmra.mxu1 %v10703_v12 }
 0x280   :  { %5290 = vmatpush.msrb.mxu2 %v14175_v23  ;;  %5319 = vmatpush.msrb.mxu3 %v12130_v36  ;;  %v8874_v55 = vpop.xlane.xlu2 %8873  ;;  %v14179_v23 = vand.u32 4294901760, %v12253_v41  ;;  %v12306_v36 = vand.u32 4294901760, %v2255_v57 }
 0x281   :  { %5342 = vmatpush.msra.mxu0 %v12192_v6  ;;  %5375 = vmatpush.msra.mxu1 %v5374_v46  ;;  %8875 = vst [vmem:[#allocation6] sm:$0x1] %v8874_v55  ;;  %v2256_v46 = vsub.f32 1.0, %v12279_v54  ;;  %v12315_v55 = vmul.f32 %v14182_v53, %v14182_v53  ;;  %v14183_v54 = vld [vmem:[#allocation46_spill] sm:$0xff] }
 0x282   :  { %5294 = vmatpush.msrb.mxu2 %v14178_v62  ;;  %v5391_v10 = vsub.f32 %v12253_v41, %v14179_v23  ;;  %5321 = vmatpush.msrb.mxu3 %v12141_v39  ;;  %14180 = vst [vmem:[#allocation21_spill] sm:$0xff] %v12306_v36  ;;  %v12311_v62 = vand.u32 4294901760, %v2287_v61  ;;  %v3546_v23 = vpop.f32.mrf.mxu1  ;;  %v12320_v39 = vsub.f32 %v2351_v43, %v12295_v49  ;;  %v14184_v43 = vld [vmem:[#allocation50_spill] sm:$0xff] }
 0x283   :  { %5344 = vmatpush.msra.mxu0 %v12205_v27  ;;  %5381 = vmatpush.msra.mxu1 %v5380_v14  ;;  %v12324_v14 = vmul.f32 %v14183_v54, %v14183_v54  ;;  %v12333_v53 = vsub.f32 %v2255_v57, %v12306_v36  ;;  %v14186_v57 = vld [vmem:[#allocation51_spill] sm:$0xff] }
 0x284   :  { %5298 = vmatpush.msrb.mxu2 %v14181_v33  ;;  %5323 = vmatpush.msrb.mxu3 %v12151_v4  ;;  %v5392_v28 = vand.u32 4294901760, %v5391_v10  ;;  %v12335_v4 = vand.u32 4294901760, %v2256_v46  ;;  %v12339_v33 = vmul.f32 %v14184_v43, %v14184_v43  ;;  %v12345_v19 = vsub.f32 %v2287_v61, %v12311_v62  ;;  %v14185_v10 = vld [vmem:[#allocation53_spill] sm:$0xff] }
 0x285   :  { %5346 = vmatpush.msra.mxu0 %v12218_v25  ;;  %5387 = vmatpush.msra.mxu1 %v5386_v38  ;;  %v2992_v38 = vadd.f32 %v12061_v2, %v12059_v7  ;;  %v12349_v54 = vmul.f32 %v14185_v10, %v14185_v10  ;;  %v12353_v36 = vmul.f32 %v14186_v57, %v14186_v57  ;;  %v2320_v2 = vsub.f32 1.0, %v12315_v55 }
 0x286   :  { %5169 = vmatmul.f32.vlgmr.msra.gmra.mxu2 %v10817_v42  ;;  %5210 = vmatmul.f32.vlgmr.msra.gmra.mxu3 %v10703_v12  ;;  %v2622_v61 = vadd.f32 %v11889_v56, %v11887_v40  ;;  %v5563_v43 = vand.u32 4294901760, %v12328_v47  ;;  %v2352_v10 = vsub.f32 1.0, %v12324_v14  ;;  %v3576_v57 = vpop.f32.mrf.mxu2  ;;  %v14189_v40 = vand.u32 4294901760, %v12216_v21 }
 0x287   :  { %5348 = vmatpush.msra.mxu0 %v12229_v1  ;;  %5393 = vmatpush.msra.mxu1 %v5392_v28  ;;  %14187 = vst [vmem:[#allocation20_spill] sm:$0xff] %v12353_v36  ;;  %v2807_v28 = vadd.f32 %v11962_v52, %v11954_v30  ;;  %v3603_v36 = vpop.f32.mrf.mxu3  ;;  %v3362_v56 = vadd.f32 %v12233_v11, %v12231_v26  ;;  %v5575_v30 = vand.u32 4294901760, %v12333_v53  ;;  %v14190_v11 = vand.u32 4294901760, %v12227_v16 }
 0x288   :  { %5413 = vmatpush.msra.mxu2 %v12216_v21  ;;  %5442 = vmatpush.msra.mxu3 %v12192_v6  ;;  %v12378_v52 = vsub.f32 %v2256_v46, %v12335_v4  ;;  %v3022_v14 = vadd.f32 %v12070_v35, %v2992_v38  ;;  %v2288_v21 = vsub.f32 1.0, %v12339_v33  ;;  %v3177_v26 = vadd.f32 %v12134_v9, %v12126_v32 }
 0x289   :  { %5240 = vmatmul.f32.vlgmr.msrb.gmra.mxu0 %v10740_v60  ;;  %5267 = vmatmul.f32.vlgmr.msrb.gmra.mxu1 %v10765_v8  ;;  %v14188_v60 = vld [vmem:[#allocation49_spill] sm:$0xff]  ;;  %v2837_v55 = vadd.f32 %v11994_v13, %v2807_v28  ;;  %v14191_v13 = vand.u32 4294901760, %v12320_v39  ;;  %v3547_v46 = vadd.f32 %v3546_v23, %v3505_v37  ;;  %v2437_v33 = vadd.f32 %v11787_v59, %v11776_v20 }
 0x28a   :  { %5416 = vmatpush.msra.mxu2 %v12227_v16  ;;  %v12369_v7 = vmul.f32 %v14188_v60, %v14188_v60  ;;  %5444 = vmatpush.msra.mxu3 %v12205_v27  ;;  %v5569_v60 = vand.u32 4294901760, %v12345_v19  ;;  %v2652_v38 = vadd.f32 %v11898_v17, %v2622_v61  ;;  %v5564_v32 = vsub.f32 %v12328_v47, %v5563_v43  ;;  %v12408_v16 = vpop.f32.mrf.mxu1 }
 0x28b   :  { %5471 = vmatpush.msrb.mxu0 %v14189_v40  ;;  %5502 = vmatpush.msrb.mxu1 %v12192_v6  ;;  %v12386_v40 = vpop.f32.mrf.mxu0  ;;  %v5558_v35 = vsub.f32 %v12320_v39, %v14191_v13  ;;  %v12396_v6 = vand.u32 4294901760, %v2320_v2  ;;  %v12406_v9 = vand.u32 4294901760, %v2352_v10  ;;  %v3207_v28 = vadd.f32 %v12166_v3, %v3177_v26 }
 0x28c   :  { %5419 = vmatpush.msra.mxu2 %v12240_v5  ;;  %5446 = vmatpush.msra.mxu3 %v12218_v25  ;;  %v14192_v20 = vand.u32 4294901760, %v12240_v5  ;;  %v3392_v59 = vadd.f32 %v12242_v29, %v3362_v56  ;;  %v3577_v17 = vadd.f32 %v3576_v57, %v3547_v46  ;;  %v2864_v37 = vadd.f32 %v11996_v58, %v2837_v55  ;;  %v14194_v55 = vld [vmem:[#allocation47_spill] sm:$0xff] }
 0x28d   :  { %5475 = vmatpush.msrb.mxu0 %v14190_v11  ;;  %5504 = vmatpush.msrb.mxu1 %v12205_v27  ;;  %v2467_v27 = vadd.f32 %v11822_v0, %v2437_v33  ;;  %v3049_v23 = vadd.f32 %v12081_v45, %v3022_v14  ;;  %v14193_v3 = vand.u32 4294901760, %v12253_v41  ;;  %v5559_v5 = vand.u32 4294901760, %v5558_v35 }
 0x28e   :  { %5422 = vmatpush.msra.mxu2 %v12253_v41  ;;  %5448 = vmatpush.msra.mxu3 %v12229_v1  ;;  %v5570_v29 = vsub.f32 %v12345_v19, %v5569_v60  ;;  %v5576_v0 = vsub.f32 %v12333_v53, %v5575_v30  ;;  %v12430_v58 = vsub.f32 %v2320_v2, %v12396_v6  ;;  %v12439_v61 = vand.u32 4294901760, %v2288_v21 }
 0x28f   :  { %5479 = vmatpush.msrb.mxu0 %v14192_v20  ;;  %5506 = vmatpush.msrb.mxu1 %v12218_v25  ;;  %v2679_v45 = vadd.f32 %v11909_v24, %v2652_v38  ;;  %v3082_v25 = vadd.f32 %v12113_v31, %v3049_v23  ;;  %v12437_v41 = vsub.f32 %v2352_v10, %v12406_v9  ;;  %v5565_v2 = vand.u32 4294901760, %v5564_v32  ;;  %v14199_v23 = vld [vmem:[#allocation12_spill] sm:$0xff] }
 0x290   :  { %5300 = vmatmul.f32.vlgmr.msrb.gmra.mxu2 %v10703_v12  ;;  %5325 = vmatmul.f32.vlgmr.msrb.gmra.mxu3 %v10703_v12  ;;  %v3234_v57 = vadd.f32 %v12168_v51, %v3207_v28  ;;  %v3419_v56 = vadd.f32 %v12255_v34, %v3392_v59  ;;  %v3604_v24 = vadd.f32 %v3603_v36, %v3577_v17  ;;  %v5760_v51 = vand.u32 4294901760, %v12378_v52  ;;  %v3690_v14 = vpop.f32.mrf.mxu2  ;;  %v14196_v28 = vld [vmem:[#allocation15_spill] sm:$0xff]  ;;  %v14197_v59 = vld [vmem:[#allocation14_spill] sm:$0xff] }
 0x291   :  { %5483 = vmatpush.msrb.mxu0 %v14193_v3  ;;  %5508 = vmatpush.msrb.mxu1 %v12229_v1  ;;  %v12446_v31 = vmul.f32 %v14194_v55, %v14194_v55  ;;  %v2494_v1 = vadd.f32 %v11824_v44, %v2467_v27  ;;  %v2897_v10 = vadd.f32 %v12009_v15, %v2864_v37  ;;  %v3731_v26 = vpop.f32.mrf.mxu3  ;;  %v5571_v34 = vand.u32 4294901760, %v5570_v29  ;;  %v14195_v44 = vld [vmem:[#allocation58_spill] sm:$0xff]  ;;  %v14198_v27 = vld [vmem:[#allocation21_spill] sm:$0xff]  ;;  %v14204_v55 = vld [vmem:[#allocation20_spill] sm:$0xff] }
 0x292   :  { %5527 = vmatpush.msrb.mxu2 %v12295_v49  ;;  %5560 = vmatpush.msrb.mxu3 %v5559_v5  ;;  %v2712_v11 = vadd.f32 %v11941_v63, %v2679_v45  ;;  %v3452_v36 = vadd.f32 %v12289_v22, %v3419_v56  ;;  %v3732_v13 = vadd.f32 %v3731_v26, %v3690_v14  ;;  %v5742_v46 = vand.u32 4294901760, %v12437_v41  ;;  %v3788_v37 = vpop.f32.mrf.mxu1  ;;  %v14201_v45 = vld [vmem:[#allocation9_spill] sm:$0xff] }
 0x293   :  { %5354 = vmatmul.f32.vlgmr.msra.gmra.mxu0 %v10817_v42  ;;  %5395 = vmatmul.f32.vlgmr.msra.gmra.mxu1 %v10703_v12  ;;  %v12458_v15 = vmul.f32 %v14195_v44, %v14195_v44  ;;  %v3107_v35 = vadd.f32 %v12115_v50, %v3082_v25  ;;  %v12465_v63 = vsub.f32 %v2288_v21, %v12439_v61  ;;  %v3761_v33 = vpop.f32.mrf.mxu0  ;;  %v5577_v22 = vand.u32 4294901760, %v5576_v0 }
 0x294   :  { %5529 = vmatpush.msrb.mxu2 %v12302_v48  ;;  %5566 = vmatpush.msrb.mxu3 %v5565_v2  ;;  %v3267_v38 = vadd.f32 %v12181_v18, %v3234_v57  ;;  %v5748_v32 = vand.u32 4294901760, %v12430_v58  ;;  %v3637_v50 = vadd.f32 %v12386_v40, %v3604_v24  ;;  %v2527_v20 = vadd.f32 %v14196_v28, %v2494_v1  ;;  %v14200_v40 = vld [vmem:[#allocation16_spill] sm:$0xff]  ;;  %v14203_v2 = vld [vmem:[#allocation93_spill] sm:$0xff]  ;;  %v14205_v1 = vld [vmem:[#allocation18_spill] sm:$0xff] }
 0x295   :  { %5598 = vmatpush.msra.mxu0 %v12320_v39  ;;  %5627 = vmatpush.msra.mxu1 %v12295_v49  ;;  %v2922_v17 = vadd.f32 %v14197_v59, %v2897_v10  ;;  %v12478_v18 = vsub.f32 %v12378_v52, %v5760_v51  ;;  %v2353_v21 = vsub.f32 1.0, %v12446_v31  ;;  %v2737_v3 = vadd.f32 %v14199_v23, %v2712_v11  ;;  %v14206_v11 = vld [vmem:[#allocation17_spill] sm:$0xff] }
 0x296   :  { %5531 = vmatpush.msrb.mxu2 %v12311_v62  ;;  %5572 = vmatpush.msrb.mxu3 %v5571_v34  ;;  %v3477_v5 = vadd.f32 %v14200_v40, %v3452_v36  ;;  %v3762_v29 = vadd.f32 %v3761_v33, %v3732_v13  ;;  %v2257_v0 = vsub.f32 1.0, %v12349_v54  ;;  %v14202_v25 = vperm.slane %v14201_v45, 3 }
 0x297   :  { %5601 = vmatpush.msra.mxu0 %v12328_v47  ;;  %5629 = vmatpush.msra.mxu1 %v12302_v48  ;;  %v5743_v56 = vsub.f32 %v12437_v41, %v5742_v46  ;;  %v5754_v24 = vand.u32 4294901760, %v12465_v63  ;;  %v2289_v31 = vsub.f32 1.0, %v14204_v55  ;;  %v3292_v10 = vadd.f32 %v14205_v1, %v3267_v38  ;;  %v14214_v1 = vld [vmem:[#allocation56_spill] sm:$0xff] }
 0x298   :  { %5533 = vmatpush.msrb.mxu2 %v14198_v27  ;;  %5578 = vmatpush.msrb.mxu3 %v5577_v22  ;;  %v8292_v57 = vmul.f32 %v3107_v35, %v14202_v25  ;;  %v5749_v14 = vsub.f32 %v12430_v58, %v5748_v32  ;;  %v3662_v26 = vadd.f32 %v12408_v16, %v3637_v50  ;;  %v14207_v36 = vperm.slane %v14201_v45, 2 }
 0x299   :  { %5604 = vmatpush.msra.mxu0 %v12345_v19  ;;  %5631 = vmatpush.msra.mxu1 %v12311_v62  ;;  %v2552_v34 = vadd.f32 %v14206_v11, %v2527_v20  ;;  %v14208_v44 = vand.u32 4294901760, %v12320_v39  ;;  %v12507_v35 = vand.u32 4294901760, %v2353_v21  ;;  %v2321_v33 = vsub.f32 1.0, %v12369_v7 }
 0x29a   :  { %5425 = vmatmul.f32.vlgmr.msra.gmra.mxu2 %v14203_v2  ;;  %5452 = vmatmul.f32.vlgmr.msra.gmra.mxu3 %v10765_v8  ;;  %v8291_v13 = vmul.f32 %v2922_v17, %v14207_v36  ;;  %v14209_v38 = vperm.slane %v14201_v45, 1  ;;  %v14210_v16 = vperm.slane %v14201_v45, 5  ;;  %v12518_v28 = vand.u32 4294901760, %v2257_v0  ;;  %v12557_v36 = vpop.f32.mrf.mxu1 }
 0x29b   :  { %5607 = vmatpush.msra.mxu0 %v12333_v53  ;;  %5633 = vmatpush.msra.mxu1 %v14198_v27  ;;  %v3789_v39 = vadd.f32 %v3788_v37, %v3762_v29  ;;  %v8324_v20 = vsub.f32 0.0, %v8292_v57  ;;  %v5744_v7 = vand.u32 4294901760, %v5743_v56  ;;  %v12526_v59 = vand.u32 4294901760, %v2289_v31  ;;  %v3821_v17 = vpop.f32.mrf.mxu2  ;;  %v3846_v23 = vpop.f32.mrf.mxu3 }
 0x29c   :  { %5656 = vmatpush.msra.mxu2 %v14208_v44  ;;  %v8290_v22 = vmul.f32 %v2737_v3, %v14209_v38  ;;  %5687 = vmatpush.msra.mxu3 %v12295_v49  ;;  %v8294_v50 = vmul.f32 %v3477_v5, %v14210_v16  ;;  %v5755_v49 = vsub.f32 %v12465_v63, %v5754_v24  ;;  %v14211_v3 = vperm.slane %v14201_v45, 4 }
 0x29d   :  { %5485 = vmatmul.f32.vlgmr.msrb.gmra.mxu0 %v10703_v12  ;;  %5510 = vmatmul.f32.vlgmr.msrb.gmra.mxu1 %v10703_v12  ;;  %v5750_v37 = vand.u32 4294901760, %v5749_v14  ;;  %v14212_v47 = vperm.slane %v14201_v45, 6  ;;  %v3822_v5 = vadd.f32 %v3821_v17, %v3789_v39  ;;  %v14213_v29 = vperm.slane %v14201_v45, 0 }
 0x29e   :  { %5660 = vmatpush.msra.mxu2 %v5563_v43  ;;  %v8293_v40 = vmul.f32 %v3292_v10, %v14211_v3  ;;  %5689 = vmatpush.msra.mxu3 %v12302_v48  ;;  %v8323_v57 = vsub.f32 0.0, %v8291_v13  ;;  %v12539_v56 = vsub.f32 %v2353_v21, %v12507_v35  ;;  %v12541_v55 = vand.u32 4294901760, %v2321_v33  ;;  %v12543_v48 = vpop.f32.mrf.mxu0 }
 0x29f   :  { %5712 = vmatpush.msrb.mxu0 %v12406_v9  ;;  %v8295_v43 = vmul.f32 %v3662_v26, %v14212_v47  ;;  %v8289_v25 = vmul.f32 %v2552_v34, %v14213_v29  ;;  %5745 = vmatpush.msrb.mxu1 %v5744_v7  ;;  %v12547_v10 = vmul.f32 %v14214_v1, %v14214_v1  ;;  %v8322_v14 = vsub.f32 0.0, %v8290_v22 }
 0x2a0   :  { %5664 = vmatpush.msra.mxu2 %v5569_v60  ;;  %v8326_v26 = vsub.f32 0.0, %v8294_v50  ;;  %5691 = vmatpush.msra.mxu3 %v12311_v62  ;;  %v3847_v11 = vadd.f32 %v3846_v23, %v3822_v5  ;;  %v8387_v19 = vrot.slane %v8324_v20, 5  ;;  %v5756_v60 = vand.u32 4294901760, %v5755_v49  ;;  %v14216_v20 = vld [vmem:[#allocation60_spill] sm:$0xff] }
 0x2a1   :  { %5714 = vmatpush.msrb.mxu0 %v12396_v6  ;;  %5751 = vmatpush.msrb.mxu1 %v5750_v37  ;;  %v5762_v21 = vand.u32 4294901760, %v12478_v18  ;;  %v12555_v34 = vsub.f32 %v2289_v31, %v12526_v59  ;;  %v8325_v13 = vsub.f32 0.0, %v8293_v40  ;;  %v8327_v62 = vsub.f32 0.0, %v8295_v43 }
 0x2a2   :  { %5668 = vmatpush.msra.mxu2 %v5575_v30  ;;  %5693 = vmatpush.msra.mxu3 %v14198_v27  ;;  %v14215_v44 = vperm.slane %v14201_v45, 7  ;;  %v8321_v53 = vsub.f32 0.0, %v8289_v25  ;;  %v8386_v30 = vrot.slane %v8323_v57, 6  ;;  %v5927_v18 = vand.u32 4294901760, %v12539_v56 }
 0x2a3   :  { %5716 = vmatpush.msrb.mxu0 %v12439_v61  ;;  %5757 = vmatpush.msrb.mxu1 %v5756_v60  ;;  %v12566_v31 = vsub.f32 %v2321_v33, %v12541_v55  ;;  %v8385_v22 = vrot.slane %v8322_v14, 7  ;;  %v8389_v16 = vrot.slane %v8326_v26, 3  ;;  %v8388_v50 = vrot.slane %v8325_v13, 4 }
 0x2a4   :  { %v8296_v38 = vmul.f32 %v3847_v11, %v14215_v44  ;;  %5539 = vmatmul.f32.vlgmr.msrb.gmra.mxu2 %v10817_v42  ;;  %5580 = vmatmul.f32.vlgmr.msrb.gmra.mxu3 %v10703_v12  ;;  %v8416_v45 = vsel %vm8415_vm5, %v8386_v30, %v8387_v19  ;;  %v8390_v33 = vrot.slane %v8327_v62, 2  ;;  %v12576_v7 = vmul.f32 %v14216_v20, %v14216_v20  ;;  %v14222_v20 = vld [vmem:[#allocation61_spill] sm:$0xff] }
 0x2a5   :  { %5718 = vmatpush.msrb.mxu0 %v12335_v4  ;;  %5763 = vmatpush.msrb.mxu1 %v5762_v21  ;;  %v12583_v49 = vsub.f32 %v2257_v0, %v12518_v28  ;;  %v2354_v17 = vsub.f32 1.0, %v12547_v10  ;;  %v12586_v23 = vpop.f32.mrf.mxu2  ;;  %v12588_v3 = vpop.f32.mrf.mxu3  ;;  %v8414_v40 = vsel %vm8413_vm6, %v8321_v53, %v8385_v22  ;;  %v8420_v37 = vsel %vm8419_vm8, %v8388_v50, %v8389_v16  ;;  %v14217_v0 = vld [vmem:[#allocation54_spill] sm:$0xff] }
 0x2a6   :  { %v8328_v27 = vsub.f32 0.0, %v8296_v38  ;;  %5783 = vmatpush.msrb.mxu2 %v12437_v41  ;;  %5812 = vmatpush.msrb.mxu3 %v12406_v9  ;;  %v5933_v47 = vand.u32 4294901760, %v12566_v31  ;;  %v2130_v43 = vmul.f32 %v14217_v0, %v14217_v0  ;;  %v8418_v5 = vsel %vm8417_vm7, %v8414_v40, %v8416_v45  ;;  %v12604_v57 = vpop.f32.mrf.mxu0  ;;  %v12619_v10 = vpop.f32.mrf.mxu1  ;;  %v14220_v38 = vld [vmem:[#allocation57_spill] sm:$0xff]  ;;  %v14221_v45 = vld [vmem:[#allocation59_spill] sm:$0xff] }
 0x2a7   :  { %5610 = vmatmul.f32.vlgmr.msra.gmra.mxu0 %v14203_v2  ;;  %5637 = vmatmul.f32.vlgmr.msra.gmra.mxu1 %v10765_v8  ;;  %v2322_v25 = vsub.f32 1.0, %v12458_v15  ;;  %14218 = vst [vmem:[#allocation19_spill] sm:$0xff] %v12604_v57  ;;  %v5928_v41 = vsub.f32 %v12539_v56, %v5927_v18  ;;  %v12616_v15 = vand.u32 4294901760, %v2354_v17  ;;  %v2290_v1 = vsub.f32 1.0, %v12576_v7 }
 0x2a8   :  { %v8391_v39 = vrot.slane %v8328_v27, 1  ;;  %5786 = vmatpush.msrb.mxu2 %v12430_v58  ;;  %5814 = vmatpush.msrb.mxu3 %v12396_v6  ;;  %14219 = vst [vmem:[#allocation28_spill] sm:$0xff] %v12619_v10  ;;  %v5934_v58 = vsub.f32 %v12566_v31, %v5933_v47  ;;  %v2258_v14 = vsub.f32 1.0, %v2130_v43  ;;  %v2227_v53 = vmul.f32 %v14220_v38, %v14220_v38 }
 0x2a9   :  { %5841 = vmatpush.msra.mxu0 %v5742_v46  ;;  %5872 = vmatpush.msra.mxu1 %v12406_v9  ;;  %v5939_v46 = vand.u32 4294901760, %v12555_v34  ;;  %v12643_v26 = vand.u32 4294901760, %v2290_v1  ;;  %v2195_v50 = vmul.f32 %v14221_v45, %v14221_v45  ;;  %v2163_v7 = vmul.f32 %v14222_v20, %v14222_v20  ;;  %v14227_v20 = vld [vmem:[#allocation68_spill] sm:$0xff] }
 0x2aa   :  { %v8422_v54 = vsel %vm8421_vm9, %v8390_v33, %v8391_v39  ;;  %5789 = vmatpush.msrb.mxu2 %v12465_v63  ;;  %5816 = vmatpush.msrb.mxu3 %v12439_v61  ;;  %v5929_v63 = vand.u32 4294901760, %v5928_v41  ;;  %v5935_v11 = vand.u32 4294901760, %v5934_v58  ;;  %v14224_v58 = vld [vmem:[#allocation62_spill] sm:$0xff] }
 0x2ab   :  { %v8424_v29 = vsel %vm8423_vm10, %v8420_v37, %v8422_v54  ;;  %5845 = vmatpush.msra.mxu0 %v5748_v32  ;;  %5874 = vmatpush.msra.mxu1 %v12396_v6  ;;  %v5945_v6 = vand.u32 4294901760, %v12583_v49  ;;  %v12630_v32 = vand.u32 4294901760, %v2322_v25  ;;  %v12665_v62 = vsub.f32 %v2290_v1, %v12643_v26  ;;  %v14223_v54 = vld [vmem:[#allocation55_spill] sm:$0xff] }
 0x2ac   :  { %v8425_v9 = vsel %vm2060_vm3, %v8418_v5, %v8424_v29  ;;  %5792 = vmatpush.msrb.mxu2 %v12378_v52  ;;  %5818 = vmatpush.msrb.mxu3 %v12335_v4  ;;  %v2131_v0 = vmul.f32 %v14223_v54, %v14223_v54  ;;  %v2323_v43 = vsub.f32 1.0, %v2195_v50 }
 0x2ad   :  { %8451 = vst [vmem:[#allocation4] sm:$0xff] %v8425_v9  ;;  %5849 = vmatpush.msra.mxu0 %v5754_v24  ;;  %5876 = vmatpush.msra.mxu1 %v12439_v61  ;;  %v5940_v24 = vsub.f32 %v12555_v34, %v5939_v46  ;;  %v12641_v61 = vsub.f32 %v2354_v17, %v12616_v15  ;;  %v6124_v39 = vand.u32 4294901760, %v12665_v62  ;;  %v2355_v17 = vsub.f32 1.0, %v2227_v53 }
 0x2ae   :  { %5670 = vmatmul.f32.vlgmr.msra.gmra.mxu2 %v10703_v12  ;;  %5695 = vmatmul.f32.vlgmr.msra.gmra.mxu3 %v10703_v12  ;;  %v5946_v52 = vsub.f32 %v12583_v49, %v5945_v6  ;;  %v12667_v44 = vpop.f32.mrf.mxu0  ;;  %v12678_v27 = vpop.f32.mrf.mxu1  ;;  %v2259_v9 = vsub.f32 1.0, %v2131_v0 }
 0x2af   :  { %5853 = vmatpush.msra.mxu0 %v5760_v51  ;;  %5878 = vmatpush.msra.mxu1 %v12335_v4  ;;  %v12652_v4 = vsub.f32 %v2322_v25, %v12630_v32  ;;  %v12654_v51 = vand.u32 4294901760, %v2258_v14  ;;  %v12656_v19 = vpop.f32.mrf.mxu2  ;;  %v12658_v60 = vpop.f32.mrf.mxu3  ;;  %v5941_v21 = vand.u32 4294901760, %v5940_v24  ;;  %v6112_v13 = vand.u32 4294901760, %v12641_v61 }
 0x2b0   :  { %5897 = vmatpush.msra.mxu2 %v12507_v35  ;;  %5930 = vmatpush.msra.mxu3 %v5929_v63  ;;  %v5947_v30 = vand.u32 4294901760, %v5946_v52  ;;  %v2291_v25 = vsub.f32 1.0, %v2163_v7  ;;  %v14225_v63 = vld [vmem:[#allocation64_spill] sm:$0xff]  ;;  %v2132_v7 = vmul.f32 %v14227_v20, %v14227_v20 }
 0x2b1   :  { %5724 = vmatmul.f32.vlgmr.msrb.gmra.mxu0 %v10817_v42  ;;  %5765 = vmatmul.f32.vlgmr.msrb.gmra.mxu1 %v10703_v12  ;;  %v6118_v22 = vand.u32 4294901760, %v12652_v4  ;;  %v12676_v16 = vsub.f32 %v2258_v14, %v12654_v51  ;;  %v6113_v33 = vsub.f32 %v12641_v61, %v6112_v13  ;;  %v2228_v14 = vmul.f32 %v14224_v58, %v14224_v58 }
 0x2b2   :  { %5899 = vmatpush.msra.mxu2 %v12541_v55  ;;  %5936 = vmatpush.msra.mxu3 %v5935_v11  ;;  %v2196_v24 = vmul.f32 %v14225_v63, %v14225_v63 }
 0x2b3   :  { %5968 = vmatpush.msrb.mxu0 %v12539_v56  ;;  %5997 = vmatpush.msrb.mxu1 %v12507_v35  ;;  %v6119_v40 = vsub.f32 %v12652_v4, %v6118_v22  ;;  %v6130_v37 = vand.u32 4294901760, %v12676_v16  ;;  %v6114_v56 = vand.u32 4294901760, %v6113_v33  ;;  %v2356_v53 = vsub.f32 1.0, %v2228_v14  ;;  %v14229_v14 = vld [vmem:[#allocation63_spill] sm:$0xff] }
 0x2b4   :  { %5901 = vmatpush.msra.mxu2 %v12526_v59  ;;  %5942 = vmatpush.msra.mxu3 %v5941_v21  ;;  %v14226_v21 = vld [vmem:[#allocation66_spill] sm:$0xff] }
 0x2b5   :  { %5971 = vmatpush.msrb.mxu0 %v12566_v31  ;;  %5999 = vmatpush.msrb.mxu1 %v12541_v55  ;;  %v6120_v31 = vand.u32 4294901760, %v6119_v40  ;;  %v2164_v38 = vmul.f32 %v14226_v21, %v14226_v21 }
 0x2b6   :  { %5903 = vmatpush.msra.mxu2 %v12518_v28  ;;  %5948 = vmatpush.msra.mxu3 %v5947_v30  ;;  %v12723_v41 = vpop.f32.mrf.mxu0 }
 0x2b7   :  { %5974 = vmatpush.msrb.mxu0 %v12555_v34  ;;  %6001 = vmatpush.msrb.mxu1 %v12526_v59  ;;  %v2292_v54 = vsub.f32 1.0, %v2164_v38 }
 0x2b8   :  { %5795 = vmatmul.f32.vlgmr.msrb.gmra.mxu2 %v14203_v2  ;;  %5822 = vmatmul.f32.vlgmr.msrb.gmra.mxu3 %v10765_v8 }
 0x2b9   :  { %5977 = vmatpush.msrb.mxu0 %v12583_v49  ;;  %6003 = vmatpush.msrb.mxu1 %v12518_v28  ;;  %v12710_v5 = vpop.f32.mrf.mxu2  ;;  %v12712_v29 = vpop.f32.mrf.mxu3 }
 0x2ba   :  { %6026 = vmatpush.msrb.mxu2 %v5927_v18  ;;  %6057 = vmatpush.msrb.mxu3 %v12507_v35  ;;  %v6125_v18 = vsub.f32 %v12665_v62, %v6124_v39  ;;  %v12716_v35 = vand.u32 4294901760, %v2355_v17 }
 0x2bb   :  { %5855 = vmatmul.f32.vlgmr.msra.gmra.mxu0 %v10703_v12  ;;  %5880 = vmatmul.f32.vlgmr.msra.gmra.mxu1 %v10703_v12 }
 0x2bc   :  { %6030 = vmatpush.msrb.mxu2 %v5933_v47  ;;  %6059 = vmatpush.msrb.mxu3 %v12541_v55  ;;  %v6131_v47 = vsub.f32 %v12676_v16, %v6130_v37  ;;  %v12727_v55 = vand.u32 4294901760, %v2323_v43  ;;  %v6126_v34 = vand.u32 4294901760, %v6125_v18  ;;  %v12736_v1 = vsub.f32 %v2355_v17, %v12716_v35 }
 0x2bd   :  { %6082 = vmatpush.msra.mxu0 %v12616_v15  ;;  %6115 = vmatpush.msra.mxu1 %v6114_v56  ;;  %v2324_v17 = vsub.f32 1.0, %v2196_v24  ;;  %v12815_v56 = vand.u32 4294901760, %v2292_v54 }
 0x2be   :  { %6034 = vmatpush.msrb.mxu2 %v5939_v46  ;;  %6061 = vmatpush.msrb.mxu3 %v12526_v59  ;;  %v12731_v46 = vpop.f32.mrf.mxu1  ;;  %v12738_v59 = vand.u32 4294901760, %v2291_v25  ;;  %v6132_v49 = vand.u32 4294901760, %v6131_v47  ;;  %v6297_v11 = vand.u32 4294901760, %v12736_v1 }
 0x2bf   :  { %6084 = vmatpush.msra.mxu0 %v12630_v32  ;;  %6121 = vmatpush.msra.mxu1 %v6120_v31 }
 0x2c0   :  { %6038 = vmatpush.msrb.mxu2 %v5945_v6  ;;  %6063 = vmatpush.msrb.mxu3 %v12518_v28  ;;  %v12746_v28 = vsub.f32 %v2323_v43, %v12727_v55  ;;  %v12748_v6 = vand.u32 4294901760, %v2259_v9  ;;  %v12757_v52 = vsub.f32 %v2291_v25, %v12738_v59  ;;  %v12778_v40 = vpop.f32.mrf.mxu0  ;;  %v2260_v43 = vsub.f32 1.0, %v2132_v7 }
 0x2c1   :  { %6086 = vmatpush.msra.mxu0 %v12643_v26  ;;  %6127 = vmatpush.msra.mxu1 %v6126_v34  ;;  %v12837_v34 = vsub.f32 %v2292_v54, %v12815_v56 }
 0x2c2   :  { %5909 = vmatmul.f32.vlgmr.msra.gmra.mxu2 %v10817_v42  ;;  %5950 = vmatmul.f32.vlgmr.msra.gmra.mxu3 %v10703_v12  ;;  %v6303_v50 = vand.u32 4294901760, %v12746_v28  ;;  %v12772_v33 = vsub.f32 %v2259_v9, %v12748_v6 }
 0x2c3   :  { %6088 = vmatpush.msra.mxu0 %v12654_v51  ;;  %6133 = vmatpush.msra.mxu1 %v6132_v49  ;;  %v12763_v30 = vpop.f32.mrf.mxu2  ;;  %v12765_v45 = vpop.f32.mrf.mxu3  ;;  %v2229_v49 = vmul.f32 %v14229_v14, %v14229_v14 }
 0x2c4   :  { %6153 = vmatpush.msra.mxu2 %v12641_v61  ;;  %6182 = vmatpush.msra.mxu3 %v12616_v15  ;;  %v6298_v61 = vsub.f32 %v12736_v1, %v6297_v11 }
 0x2c5   :  { %5980 = vmatmul.f32.vlgmr.msrb.gmra.mxu0 %v14203_v2  ;;  %6007 = vmatmul.f32.vlgmr.msrb.gmra.mxu1 %v10765_v8 }
 0x2c6   :  { %6156 = vmatpush.msra.mxu2 %v12652_v4  ;;  %6184 = vmatpush.msra.mxu3 %v12630_v32  ;;  %v12791_v0 = vpop.f32.mrf.mxu1  ;;  %v6304_v4 = vsub.f32 %v12746_v28, %v6303_v50 }
 0x2c7   :  { %6211 = vmatpush.msrb.mxu0 %v6112_v13  ;;  %6242 = vmatpush.msrb.mxu1 %v12616_v15  ;;  %v6309_v13 = vand.u32 4294901760, %v12757_v52  ;;  %v12789_v15 = vand.u32 4294901760, %v2356_v53  ;;  %14228 = vst [vmem:[#allocation26_spill] sm:$0xff] %v12791_v0 }
 0x2c8   :  { %6159 = vmatpush.msra.mxu2 %v12665_v62  ;;  %6186 = vmatpush.msra.mxu3 %v12643_v26  ;;  %v6299_v62 = vand.u32 4294901760, %v6298_v61  ;;  %v6305_v18 = vand.u32 4294901760, %v6304_v4  ;;  %v14231_v61 = vld [vmem:[#allocation67_spill] sm:$0xff]  ;;  %v2357_v4 = vsub.f32 1.0, %v2229_v49 }
 0x2c9   :  { %6215 = vmatpush.msrb.mxu0 %v6118_v22  ;;  %6244 = vmatpush.msrb.mxu1 %v12630_v32  ;;  %v6315_v22 = vand.u32 4294901760, %v12772_v33  ;;  %v12802_v32 = vand.u32 4294901760, %v2324_v17  ;;  %v2165_v54 = vmul.f32 %v14231_v61, %v14231_v61 }
 0x2ca   :  { %6162 = vmatpush.msra.mxu2 %v12676_v16  ;;  %6188 = vmatpush.msra.mxu3 %v12654_v51  ;;  %v12839_v58 = vpop.f32.mrf.mxu0 }
 0x2cb   :  { %6219 = vmatpush.msrb.mxu0 %v6124_v39  ;;  %6246 = vmatpush.msrb.mxu1 %v12643_v26  ;;  %v6310_v39 = vsub.f32 %v12757_v52, %v6309_v13  ;;  %v12813_v26 = vsub.f32 %v2356_v53, %v12789_v15  ;;  %v6316_v16 = vsub.f32 %v12772_v33, %v6315_v22  ;;  %v14230_v53 = vld [vmem:[#allocation65_spill] sm:$0xff]  ;;  %v2293_v49 = vsub.f32 1.0, %v2165_v54  ;;  %v14234_v54 = vld [vmem:[#allocation74_spill] sm:$0xff] }
 0x2cc   :  { %6040 = vmatmul.f32.vlgmr.msrb.gmra.mxu2 %v10703_v12  ;;  %6065 = vmatmul.f32.vlgmr.msrb.gmra.mxu3 %v10703_v12  ;;  %v2197_v20 = vmul.f32 %v14230_v53, %v14230_v53 }
 0x2cd   :  { %6223 = vmatpush.msrb.mxu0 %v6130_v37  ;;  %6248 = vmatpush.msrb.mxu1 %v12654_v51  ;;  %v12824_v51 = vsub.f32 %v2324_v17, %v12802_v32  ;;  %v12826_v37 = vand.u32 4294901760, %v2260_v43  ;;  %v12828_v25 = vpop.f32.mrf.mxu2  ;;  %v12830_v31 = vpop.f32.mrf.mxu3  ;;  %v6311_v47 = vand.u32 4294901760, %v6310_v39  ;;  %v6482_v9 = vand.u32 4294901760, %v12813_v26  ;;  %v14232_v39 = vld [vmem:[#allocation69_spill] sm:$0xff] }
 0x2ce   :  { %6267 = vmatpush.msrb.mxu2 %v12716_v35  ;;  %6300 = vmatpush.msrb.mxu3 %v6299_v62  ;;  %v6317_v63 = vand.u32 4294901760, %v6316_v16  ;;  %v12850_v38 = vpop.f32.mrf.mxu1  ;;  %v6494_v17 = vand.u32 4294901760, %v12837_v34  ;;  %v2325_v16 = vsub.f32 1.0, %v2197_v20 }
 0x2cf   :  { %6094 = vmatmul.f32.vlgmr.msra.gmra.mxu0 %v10817_v42  ;;  %6135 = vmatmul.f32.vlgmr.msra.gmra.mxu1 %v10703_v12  ;;  %v6488_v24 = vand.u32 4294901760, %v12824_v51  ;;  %v12848_v21 = vsub.f32 %v2260_v43, %v12826_v37  ;;  %v6483_v7 = vsub.f32 %v12813_v26, %v6482_v9 }
 0x2d0   :  { %6269 = vmatpush.msrb.mxu2 %v12727_v55  ;;  %6306 = vmatpush.msrb.mxu3 %v6305_v18  ;;  %v2133_v18 = vmul.f32 %v14232_v39, %v14232_v39 }
 0x2d1   :  { %6338 = vmatpush.msra.mxu0 %v12736_v1  ;;  %6367 = vmatpush.msra.mxu1 %v12716_v35  ;;  %v6489_v43 = vsub.f32 %v12824_v51, %v6488_v24  ;;  %v6500_v62 = vand.u32 4294901760, %v12848_v21  ;;  %v6484_v1 = vand.u32 4294901760, %v6483_v7  ;;  %v14233_v7 = vld [vmem:[#allocation72_spill] sm:$0xff] }
 0x2d2   :  { %6271 = vmatpush.msrb.mxu2 %v12738_v59  ;;  %6312 = vmatpush.msrb.mxu3 %v6311_v47  ;;  %v2261_v53 = vsub.f32 1.0, %v2133_v18  ;;  %v2230_v61 = vmul.f32 %v14233_v7, %v14233_v7  ;;  %v14235_v18 = vld [vmem:[#allocation76_spill] sm:$0xff] }
 0x2d3   :  { %6341 = vmatpush.msra.mxu0 %v12746_v28  ;;  %6369 = vmatpush.msra.mxu1 %v12727_v55  ;;  %v6490_v28 = vand.u32 4294901760, %v6489_v43 }
 0x2d4   :  { %6273 = vmatpush.msrb.mxu2 %v12748_v6  ;;  %6318 = vmatpush.msrb.mxu3 %v6317_v63  ;;  %v12895_v63 = vpop.f32.mrf.mxu0 }
 0x2d5   :  { %6344 = vmatpush.msra.mxu0 %v12757_v52  ;;  %6371 = vmatpush.msra.mxu1 %v12738_v59 }
 0x2d6   :  { %6165 = vmatmul.f32.vlgmr.msra.gmra.mxu2 %v14203_v2  ;;  %6192 = vmatmul.f32.vlgmr.msra.gmra.mxu3 %v10765_v8 }
 0x2d7   :  { %6347 = vmatpush.msra.mxu0 %v12772_v33  ;;  %6373 = vmatpush.msra.mxu1 %v12748_v6  ;;  %v12882_v47 = vpop.f32.mrf.mxu2  ;;  %v12884_v14 = vpop.f32.mrf.mxu3 }
 0x2d8   :  { %6396 = vmatpush.msra.mxu2 %v6297_v11  ;;  %6427 = vmatpush.msra.mxu3 %v12716_v35  ;;  %v6495_v11 = vsub.f32 %v12837_v34, %v6494_v17  ;;  %v12888_v35 = vand.u32 4294901760, %v2357_v4 }
 0x2d9   :  { %6225 = vmatmul.f32.vlgmr.msrb.gmra.mxu0 %v10703_v12  ;;  %6250 = vmatmul.f32.vlgmr.msrb.gmra.mxu1 %v10703_v12 }
 0x2da   :  { %6400 = vmatpush.msra.mxu2 %v6303_v50  ;;  %6429 = vmatpush.msra.mxu3 %v12727_v55  ;;  %v6501_v50 = vsub.f32 %v12848_v21, %v6500_v62  ;;  %v12899_v55 = vand.u32 4294901760, %v2325_v16  ;;  %v6496_v52 = vand.u32 4294901760, %v6495_v11  ;;  %v12908_v20 = vsub.f32 %v2357_v4, %v12888_v35 }
 0x2db   :  { %6452 = vmatpush.msrb.mxu0 %v12789_v15  ;;  %6485 = vmatpush.msrb.mxu1 %v6484_v1  ;;  %v2198_v4 = vmul.f32 %v14234_v54, %v14234_v54  ;;  %v2358_v1 = vsub.f32 1.0, %v2230_v61 }
 0x2dc   :  { %6404 = vmatpush.msra.mxu2 %v6309_v13  ;;  %6431 = vmatpush.msra.mxu3 %v12738_v59  ;;  %v12903_v13 = vpop.f32.mrf.mxu1  ;;  %v12910_v59 = vand.u32 4294901760, %v2293_v49  ;;  %v6502_v33 = vand.u32 4294901760, %v6501_v50  ;;  %v13992_v43 = vand.u32 4294901760, %v12908_v20 }
 0x2dd   :  { %6454 = vmatpush.msrb.mxu0 %v12802_v32  ;;  %6491 = vmatpush.msrb.mxu1 %v6490_v28  ;;  %v2326_v61 = vsub.f32 1.0, %v2198_v4 }
 0x2de   :  { %6408 = vmatpush.msra.mxu2 %v6315_v22  ;;  %6433 = vmatpush.msra.mxu3 %v12748_v6  ;;  %v12918_v6 = vsub.f32 %v2325_v16, %v12899_v55  ;;  %v12920_v22 = vand.u32 4294901760, %v2261_v53  ;;  %v12929_v39 = vsub.f32 %v2293_v49, %v12910_v59  ;;  %v2166_v16 = vmul.f32 %v14235_v18, %v14235_v18 }
 0x2df   :  { %6456 = vmatpush.msrb.mxu0 %v12815_v56  ;;  %6497 = vmatpush.msrb.mxu1 %v6496_v52  ;;  %v14236_v52 = vld [vmem:[#allocation70_spill] sm:$0xff] }
 0x2e0   :  { %6279 = vmatmul.f32.vlgmr.msrb.gmra.mxu2 %v10817_v42  ;;  %6320 = vmatmul.f32.vlgmr.msrb.gmra.mxu3 %v10703_v12  ;;  %v13991_v49 = vand.u32 4294901760, %v12918_v6  ;;  %v12944_v50 = vsub.f32 %v2261_v53, %v12920_v22  ;;  %v2134_v7 = vmul.f32 %v14236_v52, %v14236_v52  ;;  %v2294_v53 = vsub.f32 1.0, %v2166_v16 }
 0x2e1   :  { %6458 = vmatpush.msrb.mxu0 %v12826_v37  ;;  %6503 = vmatpush.msrb.mxu1 %v6502_v33  ;;  %v12935_v11 = vpop.f32.mrf.mxu2  ;;  %v12937_v28 = vpop.f32.mrf.mxu3 }
 0x2e2   :  { %6523 = vmatpush.msrb.mxu2 %v12813_v26  ;;  %6552 = vmatpush.msrb.mxu3 %v12789_v15  ;;  %v12950_v33 = vpop.f32.mrf.mxu0  ;;  %v6668_v26 = vsub.f32 %v12908_v20, %v13992_v43  ;;  %v2262_v4 = vsub.f32 1.0, %v2134_v7  ;;  %v12987_v18 = vand.u32 4294901760, %v2294_v53  ;;  %v14245_v43 = vand.u32 4294901760, %v12918_v6 }
 0x2e3   :  { %6350 = vmatmul.f32.vlgmr.msra.gmra.mxu0 %v14203_v2  ;;  %6377 = vmatmul.f32.vlgmr.msra.gmra.mxu1 %v10765_v8 }
 0x2e4   :  { %6526 = vmatpush.msrb.mxu2 %v12824_v51  ;;  %6554 = vmatpush.msrb.mxu3 %v12802_v32  ;;  %v12963_v54 = vpop.f32.mrf.mxu1  ;;  %v6674_v51 = vsub.f32 %v12918_v6, %v13991_v49  ;;  %v14240_v49 = vld [vmem:[#allocation75_spill] sm:$0xff] }
 0x2e5   :  { %6581 = vmatpush.msra.mxu0 %v6482_v9  ;;  %6612 = vmatpush.msra.mxu1 %v12789_v15  ;;  %v13990_v9 = vand.u32 4294901760, %v12929_v39  ;;  %v12961_v15 = vand.u32 4294901760, %v2358_v1  ;;  %14237 = vst [vmem:[#allocation24_spill] sm:$0xff] %v12963_v54 }
 0x2e6   :  { %6529 = vmatpush.msrb.mxu2 %v12837_v34  ;;  %6556 = vmatpush.msrb.mxu3 %v12815_v56  ;;  %v6669_v34 = vand.u32 4294901760, %v6668_v26  ;;  %v6675_v16 = vand.u32 4294901760, %v6674_v51  ;;  %v14238_v26 = vld [vmem:[#allocation73_spill] sm:$0xff] }
 0x2e7   :  { %6585 = vmatpush.msra.mxu0 %v6488_v24  ;;  %6614 = vmatpush.msra.mxu1 %v12802_v32  ;;  %v13989_v24 = vand.u32 4294901760, %v12944_v50  ;;  %v12974_v32 = vand.u32 4294901760, %v2326_v61  ;;  %v2231_v51 = vmul.f32 %v14238_v26, %v14238_v26  ;;  %v2199_v26 = vmul.f32 %v14240_v49, %v14240_v49 }
 0x2e8   :  { %6532 = vmatpush.msrb.mxu2 %v12848_v21  ;;  %6558 = vmatpush.msrb.mxu3 %v12826_v37 }
 0x2e9   :  { %6589 = vmatpush.msra.mxu0 %v6494_v17  ;;  %6616 = vmatpush.msra.mxu1 %v12815_v56  ;;  %v6680_v17 = vsub.f32 %v12929_v39, %v13990_v9  ;;  %v12985_v56 = vsub.f32 %v2358_v1, %v12961_v15  ;;  %v6686_v21 = vsub.f32 %v12944_v50, %v13989_v24  ;;  %v14239_v9 = vld [vmem:[#allocation71_spill] sm:$0xff]  ;;  %v2327_v57 = vsub.f32 1.0, %v2199_v26 }
 0x2ea   :  { %6410 = vmatmul.f32.vlgmr.msra.gmra.mxu2 %v10703_v12  ;;  %6435 = vmatmul.f32.vlgmr.msra.gmra.mxu3 %v10703_v12  ;;  %v13013_v24 = vpop.f32.mrf.mxu0 }
 0x2eb   :  { %6593 = vmatpush.msra.mxu0 %v6500_v62  ;;  %6618 = vmatpush.msra.mxu1 %v12826_v37  ;;  %v12996_v37 = vsub.f32 %v2326_v61, %v12974_v32  ;;  %v12998_v62 = vand.u32 4294901760, %v2262_v4  ;;  %v13000_v1 = vpop.f32.mrf.mxu2  ;;  %v13002_v52 = vpop.f32.mrf.mxu3  ;;  %v6681_v7 = vand.u32 4294901760, %v6680_v17  ;;  %v2135_v17 = vmul.f32 %v14239_v9, %v14239_v9 }
 0x2ec   :  { %6637 = vmatpush.msra.mxu2 %v12888_v35  ;;  %6670 = vmatpush.msra.mxu3 %v6669_v34  ;;  %v13011_v34 = vsub.f32 %v2294_v53, %v12987_v18  ;;  %v13026_v61 = vpop.f32.mrf.mxu1  ;;  %v14242_v49 = vand.u32 4294901760, %v12985_v56 }
 0x2ed   :  { %6464 = vmatmul.f32.vlgmr.msrb.gmra.mxu0 %v10817_v42  ;;  %6505 = vmatmul.f32.vlgmr.msrb.gmra.mxu1 %v10703_v12  ;;  %v13024_v53 = vsub.f32 %v2262_v4, %v12998_v62  ;;  %v2359_v4 = vsub.f32 1.0, %v2231_v51 }
 0x2ee   :  { %6639 = vmatpush.msra.mxu2 %v12899_v55  ;;  %6676 = vmatpush.msra.mxu3 %v6675_v16  ;;  %v6687_v16 = vand.u32 4294901760, %v6686_v21  ;;  %v6853_v9 = vsub.f32 %v12985_v56, %v14242_v49  ;;  %v2263_v49 = vsub.f32 1.0, %v2135_v17 }
 0x2ef   :  { %6708 = vmatpush.msrb.mxu0 %v12908_v20  ;;  %6737 = vmatpush.msrb.mxu1 %v12888_v35 }
 0x2f0   :  { %6641 = vmatpush.msra.mxu2 %v12910_v59  ;;  %6682 = vmatpush.msra.mxu3 %v6681_v7  ;;  %v14241_v7 = vld [vmem:[#allocation77_spill] sm:$0xff] }
 0x2f1   :  { %6711 = vmatpush.msrb.mxu0 %v12918_v6  ;;  %6739 = vmatpush.msrb.mxu1 %v12899_v55  ;;  %v2167_v21 = vmul.f32 %v14241_v7, %v14241_v7  ;;  %v14244_v7 = vand.u32 4294901760, %v12996_v37 }
 0x2f2   :  { %6643 = vmatpush.msra.mxu2 %v12920_v22  ;;  %6688 = vmatpush.msra.mxu3 %v6687_v16  ;;  %v14243_v16 = vand.u32 4294901760, %v12908_v20  ;;  %v6854_v20 = vand.u32 4294901760, %v6853_v9  ;;  %v13069_v9 = vand.u32 4294901760, %v2263_v49 }
 0x2f3   :  { %6714 = vmatpush.msrb.mxu0 %v12929_v39  ;;  %6741 = vmatpush.msrb.mxu1 %v12910_v59  ;;  %v6859_v10 = vsub.f32 %v12996_v37, %v14244_v7  ;;  %v2295_v51 = vsub.f32 1.0, %v2167_v21  ;;  %v13054_v7 = vand.u32 4294901760, %v2359_v4  ;;  %v13067_v21 = vand.u32 4294901760, %v2327_v57 }
 0x2f4   :  { %6535 = vmatmul.f32.vlgmr.msrb.gmra.mxu2 %v14203_v2  ;;  %6562 = vmatmul.f32.vlgmr.msrb.gmra.mxu3 %v10765_v8 }
 0x2f5   :  { %6717 = vmatpush.msrb.mxu0 %v12944_v50  ;;  %6743 = vmatpush.msrb.mxu1 %v12920_v22  ;;  %v13056_v54 = vpop.f32.mrf.mxu2  ;;  %v13058_v17 = vpop.f32.mrf.mxu3  ;;  %v6860_v6 = vand.u32 4294901760, %v6859_v10 }
 0x2f6   :  { %6766 = vmatpush.msrb.mxu2 %v14243_v16  ;;  %6797 = vmatpush.msrb.mxu3 %v12888_v35  ;;  %v14246_v16 = vand.u32 4294901760, %v13011_v34  ;;  %14247 = vst [vmem:[#allocation22_spill] sm:$0xff] %v13058_v17  ;;  %v14248_v35 = vand.u32 4294901760, %v12929_v39  ;;  %v14250_v39 = vand.u32 4294901760, %v12944_v50  ;;  %v13088_v50 = vsub.f32 %v2327_v57, %v13067_v21 }
 0x2f7   :  { %6595 = vmatmul.f32.vlgmr.msra.gmra.mxu0 %v10703_v12  ;;  %6620 = vmatmul.f32.vlgmr.msra.gmra.mxu1 %v10703_v12  ;;  %v4472_v57 = vadd.f32 %v12830_v31, %v12828_v25 }
 0x2f8   :  { %6770 = vmatpush.msrb.mxu2 %v14245_v43  ;;  %v6865_v0 = vsub.f32 %v13011_v34, %v14246_v16  ;;  %6799 = vmatpush.msrb.mxu3 %v12899_v55  ;;  %v14249_v43 = vand.u32 4294901760, %v13024_v53  ;;  %v4985_v16 = vpop.f32.mrf.mxu0  ;;  %v13073_v55 = vand.u32 4294901760, %v2295_v51 }
 0x2f9   :  { %6822 = vmatpush.msra.mxu0 %v12961_v15  ;;  %6855 = vmatpush.msra.mxu1 %v6854_v20  ;;  %v13078_v20 = vsub.f32 %v2359_v4, %v13054_v7  ;;  %v4502_v31 = vadd.f32 %v12839_v58, %v4472_v57  ;;  %v14258_v58 = vand.u32 4294901760, %v12996_v37 }
 0x2fa   :  { %6774 = vmatpush.msrb.mxu2 %v14248_v35  ;;  %v6871_v26 = vsub.f32 %v13024_v53, %v14249_v43  ;;  %6801 = vmatpush.msrb.mxu3 %v12910_v59  ;;  %v6866_v10 = vand.u32 4294901760, %v6865_v0  ;;  %v5026_v35 = vpop.f32.mrf.mxu1  ;;  %v14251_v43 = vld [vmem:[#allocation78_spill] sm:$0xff]  ;;  %v13091_v0 = vsub.f32 %v2263_v49, %v13069_v9  ;;  %v13096_v4 = vsub.f32 %v2295_v51, %v13073_v55  ;;  %v14255_v49 = vld [vmem:[#allocation83_spill] sm:$0xff] }
 0x2fb   :  { %6824 = vmatpush.msra.mxu0 %v12974_v32  ;;  %6861 = vmatpush.msra.mxu1 %v6860_v6  ;;  %v13082_v17 = vmul.f32 %v14251_v43, %v14251_v43  ;;  %v5027_v57 = vadd.f32 %v5026_v35, %v4985_v16 }
 0x2fc   :  { %6778 = vmatpush.msrb.mxu2 %v14250_v39  ;;  %6803 = vmatpush.msrb.mxu3 %v12920_v22  ;;  %v6872_v59 = vand.u32 4294901760, %v6871_v26  ;;  %v14252_v22 = vld [vmem:[#allocation82_spill] sm:$0xff]  ;;  %v14253_v39 = vld [vmem:[#allocation80_spill] sm:$0xff]  ;;  %v7049_v25 = vand.u32 4294901760, %v13096_v4 }
 0x2fd   :  { %6826 = vmatpush.msra.mxu0 %v12987_v18  ;;  %6867 = vmatpush.msra.mxu1 %v6866_v10  ;;  %v13100_v6 = vmul.f32 %v14252_v22, %v14252_v22  ;;  %v13104_v26 = vmul.f32 %v14253_v39, %v14253_v39  ;;  %v2360_v51 = vsub.f32 1.0, %v13082_v17  ;;  %v14254_v10 = vld [vmem:[#allocation84_spill] sm:$0xff]  ;;  %v4102_v22 = vadd.f32 %v12658_v60, %v12656_v19 }
 0x2fe   :  { %6649 = vmatmul.f32.vlgmr.msra.gmra.mxu2 %v10817_v42  ;;  %6690 = vmatmul.f32.vlgmr.msra.gmra.mxu3 %v10703_v12  ;;  %v13115_v43 = vmul.f32 %v14254_v10, %v14254_v10  ;;  %v13125_v17 = vmul.f32 %v14255_v49, %v14255_v49  ;;  %v4287_v10 = vadd.f32 %v12731_v46, %v12723_v41  ;;  %v14256_v19 = vand.u32 4294901760, %v12985_v56 }
 0x2ff   :  { %6828 = vmatpush.msra.mxu0 %v12998_v62  ;;  %6873 = vmatpush.msra.mxu1 %v6872_v59  ;;  %v5056_v59 = vpop.f32.mrf.mxu2  ;;  %v5083_v39 = vpop.f32.mrf.mxu3  ;;  %v4842_v60 = vadd.f32 %v13002_v52, %v13000_v1  ;;  %v14257_v49 = vand.u32 4294901760, %v13078_v20  ;;  %v2328_v46 = vsub.f32 1.0, %v13104_v26  ;;  %v4657_v52 = vadd.f32 %v12903_v13, %v12895_v63 }
 0x300   :  { %6893 = vmatpush.msra.mxu2 %v12985_v56  ;;  %6922 = vmatpush.msra.mxu3 %v12961_v15  ;;  %v2296_v56 = vsub.f32 1.0, %v13100_v6  ;;  %v4317_v1 = vadd.f32 %v12763_v30, %v4287_v10  ;;  %v14259_v6 = vand.u32 4294901760, %v13088_v50  ;;  %v14260_v63 = vand.u32 4294901760, %v13091_v0 }
 0x301   :  { %6720 = vmatmul.f32.vlgmr.msrb.gmra.mxu0 %v14203_v2  ;;  %6747 = vmatmul.f32.vlgmr.msrb.gmra.mxu1 %v10765_v8  ;;  %v7038_v41 = vsub.f32 %v13078_v20, %v14257_v49  ;;  %v4132_v49 = vadd.f32 %v12667_v44, %v4102_v22  ;;  %v4687_v16 = vadd.f32 %v12935_v11, %v4657_v52  ;;  %v14261_v44 = vand.u32 4294901760, %v13011_v34 }
 0x302   :  { %6896 = vmatpush.msra.mxu2 %v12996_v37  ;;  %6924 = vmatpush.msra.mxu3 %v12974_v32  ;;  %v7044_v30 = vsub.f32 %v13088_v50, %v14259_v6  ;;  %v13162_v13 = vsub.f32 %v13091_v0, %v14260_v63  ;;  %v2264_v37 = vsub.f32 1.0, %v13115_v43  ;;  %v13165_v26 = vpop.f32.mrf.mxu1  ;;  %v5057_v35 = vadd.f32 %v5056_v59, %v5027_v57 }
 0x303   :  { %6951 = vmatpush.msrb.mxu0 %v14256_v19  ;;  %6982 = vmatpush.msrb.mxu1 %v12961_v15  ;;  %v13143_v19 = vpop.f32.mrf.mxu0  ;;  %v13151_v15 = vand.u32 4294901760, %v2360_v51  ;;  %v3917_v22 = vadd.f32 %v12557_v36, %v12543_v48  ;;  %v4529_v10 = vadd.f32 %v12850_v38, %v4502_v31  ;;  %v13177_v43 = vand.u32 4294901760, %v2328_v46 }
 0x304   :  { %6899 = vmatpush.msra.mxu2 %v13011_v34  ;;  %6926 = vmatpush.msra.mxu3 %v12987_v18  ;;  %v13179_v11 = vand.u32 4294901760, %v2296_v56  ;;  %v4344_v52 = vadd.f32 %v12765_v45, %v4317_v1  ;;  %v7039_v34 = vand.u32 4294901760, %v7038_v41  ;;  %v7050_v48 = vsub.f32 %v13096_v4, %v7049_v25  ;;  %v14263_v1 = vld [vmem:[#allocation79_spill] sm:$0xff] }
 0x305   :  { %6955 = vmatpush.msrb.mxu0 %v14258_v58  ;;  %6984 = vmatpush.msrb.mxu1 %v12974_v32  ;;  %v4872_v32 = vadd.f32 %v13013_v24, %v4842_v60  ;;  %v14262_v24 = vand.u32 4294901760, %v13024_v53  ;;  %v13189_v36 = vsub.f32 %v2360_v51, %v13151_v15  ;;  %v3947_v38 = vadd.f32 %v12586_v23, %v3917_v22  ;;  %v14267_v22 = vld [vmem:[#allocation19_spill] sm:$0xff] }
 0x306   :  { %6902 = vmatpush.msra.mxu2 %v13024_v53  ;;  %6928 = vmatpush.msra.mxu3 %v12998_v62  ;;  %v4562_v31 = vadd.f32 %v12882_v47, %v4529_v10  ;;  %v13196_v45 = vand.u32 4294901760, %v2264_v37  ;;  %v4714_v53 = vadd.f32 %v12937_v28, %v4687_v16  ;;  %v7045_v59 = vand.u32 4294901760, %v7044_v30 }
 0x307   :  { %6959 = vmatpush.msrb.mxu0 %v14261_v44  ;;  %6986 = vmatpush.msrb.mxu1 %v12987_v18  ;;  %v4159_v18 = vadd.f32 %v12678_v27, %v4132_v49  ;;  %v4899_v51 = vadd.f32 %v13026_v61, %v4872_v32  ;;  %v5084_v60 = vadd.f32 %v5083_v39, %v5057_v35  ;;  %v7051_v61 = vand.u32 4294901760, %v7050_v48  ;;  %v14265_v44 = vld [vmem:[#allocation26_spill] sm:$0xff] }
 0x308   :  { %6780 = vmatmul.f32.vlgmr.msrb.gmra.mxu2 %v10703_v12  ;;  %6805 = vmatmul.f32.vlgmr.msrb.gmra.mxu3 %v10703_v12  ;;  %v13205_v27 = vsub.f32 %v2328_v46, %v13177_v43  ;;  %v13208_v47 = vsub.f32 %v2296_v56, %v13179_v11  ;;  %v4377_v41 = vadd.f32 %v12778_v40, %v4344_v52  ;;  %v7222_v40 = vand.u32 4294901760, %v13189_v36 }
 0x309   :  { %6963 = vmatpush.msrb.mxu0 %v14262_v24  ;;  %6988 = vmatpush.msrb.mxu1 %v12998_v62  ;;  %v4192_v23 = vadd.f32 %v12710_v5, %v4159_v18  ;;  %v5170_v28 = vpop.f32.mrf.mxu2  ;;  %v5211_v62 = vpop.f32.mrf.mxu3  ;;  %v4932_v5 = vadd.f32 %v13056_v54, %v4899_v51  ;;  %v13215_v58 = vmul.f32 %v14263_v1, %v14263_v1  ;;  %v7057_v54 = vand.u32 4294901760, %v13162_v13 }
 0x30a   :  { %7007 = vmatpush.msrb.mxu2 %v13054_v7  ;;  %7040 = vmatpush.msrb.mxu3 %v7039_v34  ;;  %v5212_v39 = vadd.f32 %v5211_v62, %v5170_v28  ;;  %v3974_v46 = vadd.f32 %v12588_v3, %v3947_v38  ;;  %v4587_v56 = vadd.f32 %v12884_v14, %v4562_v31  ;;  %v14264_v14 = vld [vmem:[#allocation81_spill] sm:$0xff]  ;;  %v7234_v16 = vand.u32 4294901760, %v13208_v47  ;;  %v5268_v13 = vpop.f32.mrf.mxu1  ;;  %v14271_v31 = vld [vmem:[#allocation24_spill] sm:$0xff] }
 0x30b   :  { %6834 = vmatmul.f32.vlgmr.msra.gmra.mxu0 %v10817_v42  ;;  %6875 = vmatmul.f32.vlgmr.msra.gmra.mxu1 %v10703_v12  ;;  %v5241_v57 = vpop.f32.mrf.mxu0  ;;  %v4747_v49 = vadd.f32 %v12950_v33, %v4714_v53  ;;  %v13226_v6 = vsub.f32 %v2264_v37, %v13196_v45  ;;  %v5117_v3 = vadd.f32 %v13143_v19, %v5084_v60  ;;  %v7228_v33 = vand.u32 4294901760, %v13205_v27  ;;  %v14266_v19 = vld [vmem:[#allocation22_spill] sm:$0xff]  ;;  %v14270_v38 = vld [vmem:[#allocation85_spill] sm:$0xff] }
 0x30c   :  { %7009 = vmatpush.msrb.mxu2 %v13067_v21  ;;  %7046 = vmatpush.msrb.mxu3 %v7045_v59  ;;  %v13231_v30 = vmul.f32 %v14264_v14, %v14264_v14  ;;  %v4217_v63 = vadd.f32 %v12712_v29, %v4192_v23  ;;  %v4402_v37 = vadd.f32 %v14265_v44, %v4377_v41  ;;  %v14268_v29 = vld [vmem:[#allocation10_spill] sm:$0xff]  ;;  %v2361_v48 = vsub.f32 1.0, %v13215_v58 }
 0x30d   :  { %7078 = vmatpush.msra.mxu0 %v13078_v20  ;;  %7107 = vmatpush.msra.mxu1 %v13054_v7  ;;  %v4957_v32 = vadd.f32 %v14266_v19, %v4932_v5  ;;  %v5242_v35 = vadd.f32 %v5241_v57, %v5212_v39  ;;  %v4007_v10 = vadd.f32 %v14267_v22, %v3974_v46  ;;  %v14269_v52 = vperm.slane %v14268_v29, 3  ;;  %v14276_v46 = vld [vmem:[#allocation28_spill] sm:$0xff] }
 0x30e   :  { %7011 = vmatpush.msrb.mxu2 %v13073_v55  ;;  %7052 = vmatpush.msrb.mxu3 %v7051_v61  ;;  %v7223_v34 = vsub.f32 %v13189_v36, %v7222_v40  ;;  %v13252_v18 = vmul.f32 %v14270_v38, %v14270_v38  ;;  %v4772_v53 = vadd.f32 %v14271_v31, %v4747_v49  ;;  %v7240_v59 = vand.u32 4294901760, %v13226_v6 }
 0x30f   :  { %7081 = vmatpush.msra.mxu0 %v13088_v50  ;;  %7109 = vmatpush.msra.mxu1 %v13067_v21  ;;  %v8300_v24 = vmul.f32 %v4587_v56, %v14269_v52  ;;  %v5142_v51 = vadd.f32 %v13165_v26, %v5117_v3  ;;  %v14272_v60 = vperm.slane %v14268_v29, 1  ;;  %v14273_v28 = vand.u32 4294901760, %v13078_v20 }
 0x310   :  { %7013 = vmatpush.msrb.mxu2 %v13069_v9  ;;  %7058 = vmatpush.msrb.mxu3 %v7057_v54  ;;  %v7229_v62 = vsub.f32 %v13205_v27, %v7228_v33  ;;  %v7235_v41 = vsub.f32 %v13208_v47, %v7234_v16  ;;  %v2297_v61 = vsub.f32 1.0, %v13125_v17  ;;  %v14274_v26 = vperm.slane %v14268_v29, 2 }
 0x311   :  { %7084 = vmatpush.msra.mxu0 %v13096_v4  ;;  %7111 = vmatpush.msra.mxu1 %v13073_v55  ;;  %v8298_v23 = vmul.f32 %v4217_v63, %v14272_v60  ;;  %v14275_v20 = vperm.slane %v14268_v29, 5  ;;  %v2329_v1 = vsub.f32 1.0, %v13231_v30  ;;  %v5269_v58 = vadd.f32 %v5268_v13, %v5242_v35 }
 0x312   :  { %6905 = vmatmul.f32.vlgmr.msra.gmra.mxu2 %v14203_v2  ;;  %6932 = vmatmul.f32.vlgmr.msra.gmra.mxu3 %v10765_v8  ;;  %v8299_v5 = vmul.f32 %v4402_v37, %v14274_v26  ;;  %v4032_v56 = vadd.f32 %v14276_v46, %v4007_v10  ;;  %v8332_v57 = vsub.f32 0.0, %v8300_v24  ;;  %v14277_v49 = vand.u32 4294901760, %v13088_v50  ;;  %v14283_v26 = vld [vmem:[#allocation88_spill] sm:$0xff] }
 0x313   :  { %7087 = vmatpush.msra.mxu0 %v13091_v0  ;;  %7113 = vmatpush.msra.mxu1 %v13069_v9  ;;  %v8302_v39 = vmul.f32 %v4957_v32, %v14275_v20  ;;  %v7224_v54 = vand.u32 4294901760, %v7223_v34  ;;  %v13282_v3 = vand.u32 4294901760, %v2361_v48  ;;  %v5326_v14 = vpop.f32.mrf.mxu3  ;;  %v14278_v63 = vperm.slane %v14268_v29, 4  ;;  %v5355_v22 = vpop.f32.mrf.mxu0 }
 0x314   :  { %7136 = vmatpush.msra.mxu2 %v14273_v28  ;;  %7167 = vmatpush.msra.mxu3 %v13054_v7  ;;  %v5301_v7 = vpop.f32.mrf.mxu2  ;;  %v14279_v30 = vperm.slane %v14268_v29, 6  ;;  %v2265_v37 = vsub.f32 1.0, %v13252_v18  ;;  %v8330_v50 = vsub.f32 0.0, %v8298_v23  ;;  %v7230_v32 = vand.u32 4294901760, %v7229_v62 }
 0x315   :  { %6965 = vmatmul.f32.vlgmr.msrb.gmra.mxu0 %v10703_v12  ;;  %6990 = vmatmul.f32.vlgmr.msrb.gmra.mxu1 %v10703_v12  ;;  %v8301_v44 = vmul.f32 %v4772_v53, %v14278_v63  ;;  %v5302_v19 = vadd.f32 %v5301_v7, %v5269_v58  ;;  %v7241_v35 = vsub.f32 %v13226_v6, %v7240_v59  ;;  %v8331_v10 = vsub.f32 0.0, %v8299_v5  ;;  %v14284_v58 = vld [vmem:[#allocation90_spill] sm:$0xff]  ;;  %v14285_v63 = vld [vmem:[#allocation92_spill] sm:$0xff] }
 0x316   :  { %7140 = vmatpush.msra.mxu2 %v14277_v49  ;;  %7169 = vmatpush.msra.mxu3 %v13067_v21  ;;  %v8303_v13 = vmul.f32 %v5142_v51, %v14279_v30  ;;  %v13298_v21 = vand.u32 4294901760, %v2297_v61  ;;  %v8334_v52 = vsub.f32 0.0, %v8302_v39  ;;  %v13302_v24 = vand.u32 4294901760, %v2329_v1  ;;  %v5396_v51 = vpop.f32.mrf.mxu1 }
 0x317   :  { %7192 = vmatpush.msrb.mxu0 %v13151_v15  ;;  %7225 = vmatpush.msrb.mxu1 %v7224_v54  ;;  %v5327_v4 = vadd.f32 %v5326_v14, %v5302_v19  ;;  %v8394_v38 = vrot.slane %v8332_v57, 5  ;;  %v14281_v18 = vand.u32 4294901760, %v13091_v0  ;;  %v7236_v31 = vand.u32 4294901760, %v7235_v41 }
 0x318   :  { %7144 = vmatpush.msra.mxu2 %v7049_v25  ;;  %7171 = vmatpush.msra.mxu3 %v13073_v55  ;;  %v14280_v25 = vperm.slane %v14268_v29, 0  ;;  %v13309_v53 = vsub.f32 %v2361_v48, %v13282_v3  ;;  %v8333_v60 = vsub.f32 0.0, %v8301_v44  ;;  %v8335_v55 = vsub.f32 0.0, %v8303_v13 }
 0x319   :  { %7194 = vmatpush.msrb.mxu0 %v13177_v43  ;;  %7231 = vmatpush.msrb.mxu1 %v7230_v32  ;;  %v14282_v23 = vperm.slane %v14268_v29, 7  ;;  %v5397_v62 = vadd.f32 %v5396_v51, %v5355_v22  ;;  %v13317_v5 = vmul.f32 %v14283_v26, %v14283_v26  ;;  %v8392_v0 = vrot.slane %v8330_v50, 7 }
 0x31a   :  { %v8297_v34 = vmul.f32 %v4032_v56, %v14280_v25  ;;  %7148 = vmatpush.msra.mxu2 %v14281_v18  ;;  %7173 = vmatpush.msra.mxu3 %v13069_v9  ;;  %v7242_v48 = vand.u32 4294901760, %v7241_v35  ;;  %v13320_v41 = vand.u32 4294901760, %v2265_v37  ;;  %v8393_v20 = vrot.slane %v8331_v10, 6  ;;  %v14286_v10 = vld [vmem:[#allocation86_spill] sm:$0xff] }
 0x31b   :  { %7196 = vmatpush.msrb.mxu0 %v13179_v11  ;;  %v8304_v28 = vmul.f32 %v5327_v4, %v14282_v23  ;;  %7237 = vmatpush.msrb.mxu1 %v7236_v31  ;;  %v8396_v9 = vrot.slane %v8334_v52, 3  ;;  %v13325_v29 = vsub.f32 %v2329_v1, %v13302_v24  ;;  %v13329_v46 = vmul.f32 %v14284_v58, %v14284_v58  ;;  %v14287_v58 = vld [vmem:[#allocation89_spill] sm:$0xff] }
 0x31c   :  { %7019 = vmatmul.f32.vlgmr.msrb.gmra.mxu2 %v10817_v42  ;;  %7060 = vmatmul.f32.vlgmr.msrb.gmra.mxu3 %v10703_v12  ;;  %v8329_v56 = vsub.f32 0.0, %v8297_v34  ;;  %v7407_v57 = vand.u32 4294901760, %v13309_v53  ;;  %v13336_v49 = vsub.f32 %v2297_v61, %v13298_v21  ;;  %v8427_v54 = vsel %vm8415_vm5, %v8393_v20, %v8394_v38 }
 0x31d   :  { %7198 = vmatpush.msrb.mxu0 %v13196_v45  ;;  %v8336_v39 = vsub.f32 0.0, %v8304_v28  ;;  %7243 = vmatpush.msrb.mxu1 %v7242_v48  ;;  %v8395_v1 = vrot.slane %v8333_v60, 4  ;;  %v8397_v7 = vrot.slane %v8335_v55, 2  ;;  %v13343_v44 = vmul.f32 %v14285_v63, %v14285_v63  ;;  %v5426_v13 = vpop.f32.mrf.mxu2  ;;  %v5453_v19 = vpop.f32.mrf.mxu3  ;;  %v14288_v63 = vld [vmem:[#allocation91_spill] sm:$0xff] }
 0x31e   :  { %7263 = vmatpush.msrb.mxu2 %v13189_v36  ;;  %7292 = vmatpush.msrb.mxu3 %v13151_v15  ;;  %v8426_v30 = vsel %vm8413_vm6, %v8329_v56, %v8392_v0  ;;  %v13349_v17 = vsub.f32 %v2265_v37, %v13320_v41  ;;  %v2362_v61 = vsub.f32 1.0, %v13317_v5  ;;  %v7413_v32 = vand.u32 4294901760, %v13325_v29 }
 0x31f   :  { %7090 = vmatmul.f32.vlgmr.msra.gmra.mxu0 %v14203_v2  ;;  %v8398_v14 = vrot.slane %v8336_v39, 1  ;;  %7117 = vmatmul.f32.vlgmr.msra.gmra.mxu1 %v10765_v8  ;;  %v8429_v50 = vsel %vm8419_vm8, %v8395_v1, %v8396_v9  ;;  %v5427_v22 = vadd.f32 %v5426_v13, %v5397_v62  ;;  %v13360_v37 = vmul.f32 %v14286_v10, %v14286_v10 }
 0x320   :  { %7266 = vmatpush.msrb.mxu2 %v13205_v27  ;;  %7294 = vmatpush.msrb.mxu3 %v13177_v43  ;;  %v8428_v52 = vsel %vm8417_vm7, %v8426_v30, %v8427_v54  ;;  %v2330_v36 = vsub.f32 1.0, %v13329_v46  ;;  %v7408_v25 = vsub.f32 %v13309_v53, %v7407_v57  ;;  %v7419_v34 = vand.u32 4294901760, %v13336_v49  ;;  %v5511_v27 = vpop.f32.mrf.mxu1 }
 0x321   :  { %7321 = vmatpush.msra.mxu0 %v7222_v40  ;;  %v8430_v35 = vsel %vm8421_vm9, %v8397_v7, %v8398_v14  ;;  %7352 = vmatpush.msra.mxu1 %v13151_v15  ;;  %v5486_v40 = vpop.f32.mrf.mxu0  ;;  %v5454_v38 = vadd.f32 %v5453_v19, %v5427_v22  ;;  %v13377_v18 = vand.u32 4294901760, %v2362_v61  ;;  %v2298_v31 = vsub.f32 1.0, %v13343_v44  ;;  %v14289_v19 = vld [vmem:[#allocation94_spill] sm:$0xff] }
 0x322   :  { %7269 = vmatpush.msrb.mxu2 %v13208_v47  ;;  %v8431_v4 = vsel %vm8423_vm10, %v8429_v50, %v8430_v35  ;;  %7296 = vmatpush.msrb.mxu3 %v13179_v11  ;;  %v7425_v51 = vand.u32 4294901760, %v13349_v17  ;;  %v13389_v60 = vand.u32 4294901760, %v2330_v36  ;;  %v2266_v55 = vsub.f32 1.0, %v13360_v37  ;;  %v14290_v37 = vld [vmem:[#allocation87_spill] sm:$0xff] }
 0x323   :  { %7325 = vmatpush.msra.mxu0 %v7228_v33  ;;  %v8432_v15 = vsel %vm2060_vm3, %v8428_v52, %v8431_v4  ;;  %7354 = vmatpush.msra.mxu1 %v13177_v43  ;;  %v7414_v33 = vsub.f32 %v13325_v29, %v7413_v32  ;;  %v5487_v43 = vadd.f32 %v5486_v40, %v5454_v38  ;;  %v7409_v47 = vand.u32 4294901760, %v7408_v25 }
 0x324   :  { %7272 = vmatpush.msrb.mxu2 %v13226_v6  ;;  %8452 = vst [vmem:[#allocation4 + $0x8] sm:$0xff] %v8432_v15  ;;  %7298 = vmatpush.msrb.mxu3 %v13196_v45  ;;  %v13405_v28 = vand.u32 4294901760, %v2298_v31  ;;  %v13416_v62 = vand.u32 4294901760, %v2266_v55  ;;  %v2235_v46 = vmul.f32 %v14287_v58, %v14287_v58  ;;  %v2203_v44 = vmul.f32 %v14288_v63, %v14288_v63 }
 0x325   :  { %7329 = vmatpush.msra.mxu0 %v7234_v16  ;;  %7356 = vmatpush.msra.mxu1 %v13179_v11  ;;  %v7420_v16 = vsub.f32 %v13336_v49, %v7419_v34  ;;  %v13398_v23 = vadd.f32 %v5511_v27, %v5487_v43  ;;  %v13403_v11 = vsub.f32 %v2362_v61, %v13377_v18  ;;  %v7415_v6 = vand.u32 4294901760, %v7414_v33  ;;  %v14291_v33 = vld [vmem:[#allocation11_spill] sm:$0xff] }
 0x326   :  { %7150 = vmatmul.f32.vlgmr.msra.gmra.mxu2 %v10703_v12  ;;  %7175 = vmatmul.f32.vlgmr.msra.gmra.mxu3 %v10703_v12  ;;  %v13423_v9 = vsub.f32 %v2298_v31, %v13405_v28  ;;  %v13432_v7 = vsub.f32 %v2266_v55, %v13416_v62  ;;  %v2171_v50 = vmul.f32 %v14289_v19, %v14289_v19  ;;  %v2363_v35 = vsub.f32 1.0, %v2235_v46 }
 0x327   :  { %7333 = vmatpush.msra.mxu0 %v7240_v59  ;;  %7358 = vmatpush.msra.mxu1 %v13196_v45  ;;  %v7426_v59 = vsub.f32 %v13349_v17, %v7425_v51  ;;  %v13414_v45 = vsub.f32 %v2330_v36, %v13389_v60  ;;  %v5540_v26 = vpop.f32.mrf.mxu2  ;;  %v5581_v5 = vpop.f32.mrf.mxu3  ;;  %v7421_v0 = vand.u32 4294901760, %v7420_v16  ;;  %v7592_v20 = vand.u32 4294901760, %v13403_v11 }
 0x328   :  { %7377 = vmatpush.msra.mxu2 %v13282_v3  ;;  %7410 = vmatpush.msra.mxu3 %v7409_v47  ;;  %v5582_v48 = vadd.f32 %v5581_v5, %v5540_v26  ;;  %v5638_v14 = vpop.f32.mrf.mxu1  ;;  %v7604_v13 = vand.u32 4294901760, %v13423_v9  ;;  %v7610_v10 = vand.u32 4294901760, %v13432_v7  ;;  %v13456_v52 = vmul.f32 %v14290_v37, %v14290_v37  ;;  %v14295_v5 = vld [vmem:[#allocation97_spill] sm:$0xff] }
 0x329   :  { %7204 = vmatmul.f32.vlgmr.msrb.gmra.mxu0 %v10817_v42  ;;  %7245 = vmatmul.f32.vlgmr.msrb.gmra.mxu1 %v10703_v12  ;;  %v5611_v39 = vpop.f32.mrf.mxu0  ;;  %v7427_v56 = vand.u32 4294901760, %v7426_v59  ;;  %v7598_v1 = vand.u32 4294901760, %v13414_v45  ;;  %v7593_v61 = vsub.f32 %v13403_v11, %v7592_v20  ;;  %v2331_v4 = vsub.f32 1.0, %v2203_v44 }
 0x32a   :  { %7379 = vmatpush.msra.mxu2 %v13302_v24  ;;  %7416 = vmatpush.msra.mxu3 %v7415_v6  ;;  %v5612_v54 = vadd.f32 %v5611_v39, %v5582_v48  ;;  %v2299_v25 = vsub.f32 1.0, %v2171_v50  ;;  %v2267_v31 = vsub.f32 1.0, %v13456_v52  ;;  %v14293_v16 = vperm.slane %v14291_v33, 1  ;;  %v14297_v50 = vld [vmem:[#allocation101_spill] sm:$0xff] }
 0x32b   :  { %7448 = vmatpush.msrb.mxu0 %v13309_v53  ;;  %7477 = vmatpush.msrb.mxu1 %v13282_v3  ;;  %v7599_v22 = vsub.f32 %v13414_v45, %v7598_v1  ;;  %v7594_v53 = vand.u32 4294901760, %v7593_v61 }
 0x32c   :  { %7381 = vmatpush.msra.mxu2 %v13298_v21  ;;  %7422 = vmatpush.msra.mxu3 %v7421_v0  ;;  %v5639_v30 = vadd.f32 %v5638_v14, %v5612_v54  ;;  %v13494_v47 = vand.u32 4294901760, %v2299_v25  ;;  %v13506_v59 = vand.u32 4294901760, %v2267_v31  ;;  %v2204_v0 = vmul.f32 %v14295_v5, %v14295_v5  ;;  %v14300_v5 = vld [vmem:[#allocation100_spill] sm:$0xff] }
 0x32d   :  { %7451 = vmatpush.msrb.mxu0 %v13325_v29  ;;  %7479 = vmatpush.msrb.mxu1 %v13302_v24  ;;  %v7600_v29 = vand.u32 4294901760, %v7599_v22 }
 0x32e   :  { %7383 = vmatpush.msra.mxu2 %v13320_v41  ;;  %7428 = vmatpush.msra.mxu3 %v7427_v56  ;;  %v13515_v58 = vsub.f32 %v2299_v25, %v13494_v47  ;;  %v14296_v56 = vld [vmem:[#allocation99_spill] sm:$0xff]  ;;  %v13530_v61 = vsub.f32 %v2267_v31, %v13506_v59  ;;  %v2332_v22 = vsub.f32 1.0, %v2204_v0  ;;  %v2173_v0 = vmul.f32 %v14300_v5, %v14300_v5 }
 0x32f   :  { %7454 = vmatpush.msrb.mxu0 %v13336_v49  ;;  %7481 = vmatpush.msrb.mxu1 %v13298_v21  ;;  %v2172_v54 = vmul.f32 %v14296_v56, %v14296_v56 }
 0x330   :  { %7275 = vmatmul.f32.vlgmr.msrb.gmra.mxu2 %v14203_v2  ;;  %7302 = vmatmul.f32.vlgmr.msrb.gmra.mxu3 %v10765_v8 }
 0x331   :  { %7457 = vmatpush.msrb.mxu0 %v13349_v17  ;;  %7483 = vmatpush.msrb.mxu1 %v13320_v41  ;;  %v5671_v36 = vpop.f32.mrf.mxu2  ;;  %v5696_v40 = vpop.f32.mrf.mxu3  ;;  %v2300_v52 = vsub.f32 1.0, %v2172_v54  ;;  %v14301_v54 = vld [vmem:[#allocation102_spill] sm:$0xff] }
 0x332   :  { %7506 = vmatpush.msrb.mxu2 %v7407_v57  ;;  %7537 = vmatpush.msrb.mxu3 %v13282_v3  ;;  %v7605_v57 = vsub.f32 %v13423_v9, %v7604_v13  ;;  %v13468_v3 = vand.u32 4294901760, %v2363_v35  ;;  %v5672_v15 = vadd.f32 %v5671_v36, %v5639_v30  ;;  %v13475_v38 = vpop.f32.mrf.mxu0 }
 0x333   :  { %7335 = vmatmul.f32.vlgmr.msra.gmra.mxu0 %v10703_v12  ;;  %7360 = vmatmul.f32.vlgmr.msra.gmra.mxu1 %v10703_v12 }
 0x334   :  { %7510 = vmatpush.msrb.mxu2 %v7413_v32  ;;  %7539 = vmatpush.msrb.mxu3 %v13302_v24  ;;  %v7611_v32 = vsub.f32 %v13432_v7, %v7610_v10  ;;  %v13479_v24 = vand.u32 4294901760, %v2331_v4  ;;  %v5697_v27 = vadd.f32 %v5696_v40, %v5672_v15  ;;  %v7606_v49 = vand.u32 4294901760, %v7605_v57 }
 0x335   :  { %7562 = vmatpush.msra.mxu0 %v13377_v18  ;;  %7595 = vmatpush.msra.mxu1 %v7594_v53  ;;  %v13492_v55 = vsub.f32 %v2363_v35, %v13468_v3  ;;  %v2140_v35 = vmul.f32 %v14297_v50, %v14297_v50  ;;  %v13576_v57 = vand.u32 4294901760, %v2300_v52 }
 0x336   :  { %7514 = vmatpush.msrb.mxu2 %v7419_v34  ;;  %7541 = vmatpush.msrb.mxu3 %v13298_v21  ;;  %v13484_v34 = vpop.f32.mrf.mxu1  ;;  %v14292_v21 = vperm.slane %v14291_v33, 0  ;;  %v8306_v17 = vmul.f32 %v5697_v27, %v14293_v16  ;;  %v14298_v27 = vld [vmem:[#allocation96_spill] sm:$0xff] }
 0x337   :  { %7564 = vmatpush.msra.mxu0 %v13389_v60  ;;  %7601 = vmatpush.msra.mxu1 %v7600_v29  ;;  %v7777_v39 = vand.u32 4294901760, %v13492_v55  ;;  %v2268_v53 = vsub.f32 1.0, %v2140_v35 }
 0x338   :  { %7518 = vmatpush.msrb.mxu2 %v7425_v51  ;;  %7543 = vmatpush.msrb.mxu3 %v13320_v41  ;;  %v8305_v43 = vmul.f32 %v13398_v23, %v14292_v21  ;;  %v14294_v51 = vld [vmem:[#allocation95_spill] sm:$0xff]  ;;  %v7612_v41 = vand.u32 4294901760, %v7611_v32  ;;  %v13504_v23 = vsub.f32 %v2331_v4, %v13479_v24  ;;  %v8338_v26 = vsub.f32 0.0, %v8306_v17 }
 0x339   :  { %7566 = vmatpush.msra.mxu0 %v13405_v28  ;;  %v2236_v6 = vmul.f32 %v14294_v51, %v14294_v51  ;;  %7607 = vmatpush.msra.mxu1 %v7606_v49  ;;  %v13598_v32 = vsub.f32 %v2300_v52, %v13576_v57  ;;  %v2237_v49 = vmul.f32 %v14298_v27, %v14298_v27  ;;  %v14299_v51 = vld [vmem:[#allocation98_spill] sm:$0xff] }
 0x33a   :  { %7389 = vmatmul.f32.vlgmr.msra.gmra.mxu2 %v10817_v42  ;;  %7430 = vmatmul.f32.vlgmr.msra.gmra.mxu3 %v10703_v12  ;;  %v8337_v48 = vsub.f32 0.0, %v8305_v43  ;;  %v8399_v46 = vrot.slane %v8338_v26, 7  ;;  %v7783_v30 = vand.u32 4294901760, %v13504_v23  ;;  %v13539_v37 = vpop.f32.mrf.mxu0 }
 0x33b   :  { %7568 = vmatpush.msra.mxu0 %v13416_v62  ;;  %7613 = vmatpush.msra.mxu1 %v7612_v41  ;;  %v2364_v14 = vsub.f32 1.0, %v2236_v6  ;;  %v13521_v63 = vpop.f32.mrf.mxu2  ;;  %v13523_v44 = vpop.f32.mrf.mxu3  ;;  %v2205_v6 = vmul.f32 %v14299_v51, %v14299_v51  ;;  %v7974_v26 = vand.u32 4294901760, %v13598_v32 }
 0x33c   :  { %7633 = vmatpush.msra.mxu2 %v13403_v11  ;;  %7662 = vmatpush.msra.mxu3 %v13377_v18  ;;  %v13533_v19 = vsel %vm8413_vm6, %v8337_v48, %v8399_v46  ;;  %v7778_v11 = vsub.f32 %v13492_v55, %v7777_v39  ;;  %v2365_v48 = vsub.f32 1.0, %v2237_v49 }
 0x33d   :  { %7460 = vmatmul.f32.vlgmr.msrb.gmra.mxu0 %v14203_v2  ;;  %7487 = vmatmul.f32.vlgmr.msrb.gmra.mxu1 %v10765_v8  ;;  %v2333_v50 = vsub.f32 1.0, %v2205_v6 }
 0x33e   :  { %7636 = vmatpush.msra.mxu2 %v13414_v45  ;;  %7664 = vmatpush.msra.mxu3 %v13389_v60  ;;  %v13552_v4 = vpop.f32.mrf.mxu1  ;;  %v7784_v45 = vsub.f32 %v13504_v23, %v7783_v30 }
 0x33f   :  { %7691 = vmatpush.msrb.mxu0 %v7592_v20  ;;  %7722 = vmatpush.msrb.mxu1 %v13377_v18  ;;  %v7789_v20 = vand.u32 4294901760, %v13515_v58  ;;  %v13550_v18 = vand.u32 4294901760, %v2364_v14 }
 0x340   :  { %7639 = vmatpush.msra.mxu2 %v13423_v9  ;;  %7666 = vmatpush.msra.mxu3 %v13405_v28  ;;  %v7779_v9 = vand.u32 4294901760, %v7778_v11  ;;  %v7785_v36 = vand.u32 4294901760, %v7784_v45  ;;  %v2301_v11 = vsub.f32 1.0, %v2173_v0 }
 0x341   :  { %7695 = vmatpush.msrb.mxu0 %v7598_v1  ;;  %7724 = vmatpush.msrb.mxu1 %v13389_v60  ;;  %v7795_v1 = vand.u32 4294901760, %v13530_v61  ;;  %v13563_v60 = vand.u32 4294901760, %v2332_v22 }
 0x342   :  { %7642 = vmatpush.msra.mxu2 %v13432_v7  ;;  %7668 = vmatpush.msra.mxu3 %v13416_v62  ;;  %v13600_v31 = vpop.f32.mrf.mxu0 }
 0x343   :  { %7699 = vmatpush.msrb.mxu0 %v7604_v13  ;;  %7726 = vmatpush.msrb.mxu1 %v13405_v28  ;;  %v7790_v13 = vsub.f32 %v13515_v58, %v7789_v20  ;;  %v13574_v28 = vsub.f32 %v2364_v14, %v13550_v18  ;;  %v7796_v7 = vsub.f32 %v13530_v61, %v7795_v1 }
 0x344   :  { %7520 = vmatmul.f32.vlgmr.msrb.gmra.mxu2 %v10703_v12  ;;  %7545 = vmatmul.f32.vlgmr.msrb.gmra.mxu3 %v10703_v12  ;;  %v2141_v14 = vmul.f32 %v14301_v54, %v14301_v54 }
 0x345   :  { %7703 = vmatpush.msrb.mxu0 %v7610_v10  ;;  %7728 = vmatpush.msrb.mxu1 %v13416_v62  ;;  %v13585_v62 = vsub.f32 %v2332_v22, %v13563_v60  ;;  %v13587_v10 = vand.u32 4294901760, %v2268_v53  ;;  %v13589_v40 = vpop.f32.mrf.mxu2  ;;  %v13591_v25 = vpop.f32.mrf.mxu3  ;;  %v7791_v15 = vand.u32 4294901760, %v7790_v13  ;;  %v7962_v29 = vand.u32 4294901760, %v13574_v28 }
 0x346   :  { %7747 = vmatpush.msrb.mxu2 %v13468_v3  ;;  %7780 = vmatpush.msrb.mxu3 %v7779_v9  ;;  %v7797_v21 = vand.u32 4294901760, %v7796_v7  ;;  %v13611_v17 = vpop.f32.mrf.mxu1  ;;  %v2269_v45 = vsub.f32 1.0, %v2141_v14  ;;  %v5952_v14 = vadd.f32 %v13591_v25, %v13589_v40 }
 0x347   :  { %7574 = vmatmul.f32.vlgmr.msra.gmra.mxu0 %v10817_v42  ;;  %7615 = vmatmul.f32.vlgmr.msra.gmra.mxu1 %v10703_v12  ;;  %v7968_v43 = vand.u32 4294901760, %v13585_v62  ;;  %v13609_v16 = vsub.f32 %v2268_v53, %v13587_v10  ;;  %v7963_v41 = vsub.f32 %v13574_v28, %v7962_v29 }
 0x348   :  { %7749 = vmatpush.msrb.mxu2 %v13479_v24  ;;  %7786 = vmatpush.msrb.mxu3 %v7785_v36 }
 0x349   :  { %7818 = vmatpush.msra.mxu0 %v13492_v55  ;;  %7847 = vmatpush.msra.mxu1 %v13468_v3  ;;  %v7969_v46 = vsub.f32 %v13585_v62, %v7968_v43  ;;  %v7980_v56 = vand.u32 4294901760, %v13609_v16  ;;  %v7964_v55 = vand.u32 4294901760, %v7963_v41 }
 0x34a   :  { %7751 = vmatpush.msrb.mxu2 %v13494_v47  ;;  %7792 = vmatpush.msrb.mxu3 %v7791_v15 }
 0x34b   :  { %7821 = vmatpush.msra.mxu0 %v13504_v23  ;;  %7849 = vmatpush.msra.mxu1 %v13479_v24  ;;  %v7970_v23 = vand.u32 4294901760, %v7969_v46 }
 0x34c   :  { %7753 = vmatpush.msrb.mxu2 %v13506_v59  ;;  %7798 = vmatpush.msrb.mxu3 %v7797_v21  ;;  %v13651_v52 = vpop.f32.mrf.mxu0 }
 0x34d   :  { %7824 = vmatpush.msra.mxu0 %v13515_v58  ;;  %7851 = vmatpush.msra.mxu1 %v13494_v47 }
 0x34e   :  { %7645 = vmatmul.f32.vlgmr.msra.gmra.mxu2 %v14203_v2  ;;  %7672 = vmatmul.f32.vlgmr.msra.gmra.mxu3 %v10765_v8  ;;  %v13662_v53 = vpop.f32.mrf.mxu1 }
 0x34f   :  { %7827 = vmatpush.msra.mxu0 %v13530_v61  ;;  %7853 = vmatpush.msra.mxu1 %v13506_v59  ;;  %v13637_v35 = vpop.f32.mrf.mxu2  ;;  %v13639_v22 = vpop.f32.mrf.mxu3 }
 0x350   :  { %7876 = vmatpush.msra.mxu2 %v7777_v39  ;;  %7907 = vmatpush.msra.mxu3 %v13468_v3  ;;  %v7975_v39 = vsub.f32 %v13598_v32, %v7974_v26  ;;  %v13649_v3 = vand.u32 4294901760, %v2365_v48 }
 0x351   :  { %7705 = vmatmul.f32.vlgmr.msrb.gmra.mxu0 %v10703_v12  ;;  %7730 = vmatmul.f32.vlgmr.msrb.gmra.mxu1 %v10703_v12 }
 0x352   :  { %7880 = vmatpush.msra.mxu2 %v7783_v30  ;;  %7909 = vmatpush.msra.mxu3 %v13479_v24  ;;  %v7981_v30 = vsub.f32 %v13609_v16, %v7980_v56  ;;  %v13660_v24 = vand.u32 4294901760, %v2333_v50  ;;  %v7976_v58 = vand.u32 4294901760, %v7975_v39 }
 0x353   :  { %7932 = vmatpush.msrb.mxu0 %v13550_v18  ;;  %7965 = vmatpush.msrb.mxu1 %v7964_v55  ;;  %v5767_v55 = vadd.f32 %v13484_v34, %v13475_v38 }
 0x354   :  { %7884 = vmatpush.msra.mxu2 %v7789_v20  ;;  %7911 = vmatpush.msra.mxu3 %v13494_v47  ;;  %v13669_v20 = vsub.f32 %v2365_v48, %v13649_v3  ;;  %v13671_v47 = vand.u32 4294901760, %v2301_v11  ;;  %v7982_v9 = vand.u32 4294901760, %v7981_v30  ;;  %v13677_v61 = vsub.f32 %v2333_v50, %v13660_v24 }
 0x355   :  { %7934 = vmatpush.msrb.mxu0 %v13563_v60  ;;  %7971 = vmatpush.msrb.mxu1 %v7970_v23  ;;  %v6137_v23 = vadd.f32 %v13662_v53, %v13651_v52 }
 0x356   :  { %7888 = vmatpush.msra.mxu2 %v7795_v1  ;;  %7913 = vmatpush.msra.mxu3 %v13506_v59  ;;  %v13679_v1 = vand.u32 4294901760, %v2269_v45  ;;  %v8147_v36 = vand.u32 4294901760, %v13669_v20  ;;  %v13690_v7 = vsub.f32 %v2301_v11, %v13671_v47  ;;  %v13692_v15 = vpop.f32.mrf.mxu0  ;;  %v8153_v27 = vand.u32 4294901760, %v13677_v61  ;;  %v13701_v21 = vpop.f32.mrf.mxu1 }
 0x357   :  { %7936 = vmatpush.msrb.mxu0 %v13576_v57  ;;  %7977 = vmatpush.msrb.mxu1 %v7976_v58  ;;  %v5797_v11 = vadd.f32 %v13521_v63, %v5767_v55 }
 0x358   :  { %7759 = vmatmul.f32.vlgmr.msrb.gmra.mxu2 %v10817_v42  ;;  %7800 = vmatmul.f32.vlgmr.msrb.gmra.mxu3 %v10703_v12  ;;  %v8164_v49 = vsub.f32 %v2269_v45, %v13679_v1  ;;  %v8148_v51 = vsub.f32 %v13669_v20, %v8147_v36 }
 0x359   :  { %7938 = vmatpush.msrb.mxu0 %v13587_v10  ;;  %v13681_v59 = vpop.f32.mrf.mxu2  ;;  %7983 = vmatpush.msrb.mxu1 %v7982_v9  ;;  %v13684_v13 = vpop.f32.mrf.mxu3  ;;  %v5824_v38 = vadd.f32 %v13523_v44, %v5797_v11 }
 0x35a   :  { %8003 = vmatpush.msrb.mxu2 %v13574_v28  ;;  %8032 = vmatpush.msrb.mxu3 %v13550_v18  ;;  %v8159_v28 = vand.u32 4294901760, %v13690_v7  ;;  %v6167_v25 = vadd.f32 %v13681_v59, %v6137_v23 }
 0x35b   :  { %7830 = vmatmul.f32.vlgmr.msra.gmra.mxu0 %v14203_v2  ;;  %7857 = vmatmul.f32.vlgmr.msra.gmra.mxu1 %v10765_v8  ;;  %v5857_v58 = vadd.f32 %v13539_v37, %v5824_v38 }
 0x35c   :  { %8006 = vmatpush.msrb.mxu2 %v13585_v62  ;;  %8034 = vmatpush.msrb.mxu3 %v13563_v60  ;;  %v8160_v62 = vsub.f32 %v13690_v7, %v8159_v28 }
 0x35d   :  { %8061 = vmatpush.msra.mxu0 %v7962_v29  ;;  %8092 = vmatpush.msra.mxu1 %v13550_v18  ;;  %v8154_v18 = vsub.f32 %v13677_v61, %v8153_v27  ;;  %v8165_v29 = vand.u32 4294901760, %v8164_v49 }
 0x35e   :  { %8009 = vmatpush.msrb.mxu2 %v13598_v32  ;;  %8036 = vmatpush.msrb.mxu3 %v13576_v57 }
 0x35f   :  { %8065 = vmatpush.msra.mxu0 %v7968_v43  ;;  %8094 = vmatpush.msra.mxu1 %v13563_v60  ;;  %v8149_v60 = vand.u32 4294901760, %v8148_v51  ;;  %v8166_v41 = vsub.f32 %v8164_v49, %v8165_v29 }
 0x360   :  { %8012 = vmatpush.msrb.mxu2 %v13609_v16  ;;  %8038 = vmatpush.msrb.mxu3 %v13587_v10  ;;  %v6351_v6 = vpop.f32.mrf.mxu0  ;;  %v8161_v16 = vand.u32 4294901760, %v8160_v62 }
 0x361   :  { %8069 = vmatpush.msra.mxu0 %v7974_v26  ;;  %8096 = vmatpush.msra.mxu1 %v13576_v57  ;;  %v8155_v57 = vand.u32 4294901760, %v8154_v18  ;;  %v6378_v26 = vpop.f32.mrf.mxu1 }
 0x362   :  { %7890 = vmatmul.f32.vlgmr.msra.gmra.mxu2 %v10703_v12  ;;  %7915 = vmatmul.f32.vlgmr.msra.gmra.mxu3 %v10703_v12 }
 0x363   :  { %8073 = vmatpush.msra.mxu0 %v7980_v56  ;;  %v6280_v43 = vpop.f32.mrf.mxu2  ;;  %8098 = vmatpush.msra.mxu1 %v13587_v10  ;;  %v6321_v32 = vpop.f32.mrf.mxu3  ;;  %v8167_v10 = vand.u32 4294901760, %v8166_v41 }
 0x364   :  { %8117 = vmatpush.msra.mxu2 %v13649_v3  ;;  %8150 = vmatpush.msra.mxu3 %v8149_v60  ;;  %v6322_v39 = vadd.f32 %v6321_v32, %v6280_v43  ;;  %v14305_v60 = vperm.slane %v14291_v33, 4  ;;  %v14306_v43 = vperm.slane %v14291_v33, 6 }
 0x365   :  { %7944 = vmatmul.f32.vlgmr.msrb.gmra.mxu0 %v10817_v42  ;;  %7985 = vmatmul.f32.vlgmr.msrb.gmra.mxu1 %v10703_v12 }
 0x366   :  { %8119 = vmatpush.msra.mxu2 %v13660_v24  ;;  %8156 = vmatpush.msra.mxu3 %v8155_v57  ;;  %v6352_v30 = vadd.f32 %v6351_v6, %v6322_v39 }
 0x367   :  { %8188 = vmatpush.msrb.mxu0 %v13669_v20  ;;  %8217 = vmatpush.msrb.mxu1 %v13649_v3 }
 0x368   :  { %8121 = vmatpush.msra.mxu2 %v13671_v47  ;;  %8162 = vmatpush.msra.mxu3 %v8161_v16  ;;  %v6379_v52 = vadd.f32 %v6378_v26, %v6352_v30 }
 0x369   :  { %8191 = vmatpush.msrb.mxu0 %v13677_v61  ;;  %8219 = vmatpush.msrb.mxu1 %v13660_v24 }
 0x36a   :  { %8123 = vmatpush.msra.mxu2 %v13679_v1  ;;  %8168 = vmatpush.msra.mxu3 %v8167_v10  ;;  %v6465_v5 = vpop.f32.mrf.mxu0  ;;  %v6506_v48 = vpop.f32.mrf.mxu1 }
 0x36b   :  { %8194 = vmatpush.msrb.mxu0 %v13690_v7  ;;  %8221 = vmatpush.msrb.mxu1 %v13671_v47  ;;  %v6507_v40 = vadd.f32 %v6506_v48, %v6465_v5 }
 0x36c   :  { %8015 = vmatmul.f32.vlgmr.msrb.gmra.mxu2 %v14203_v2  ;;  %8042 = vmatmul.f32.vlgmr.msrb.gmra.mxu3 %v10765_v8 }
 0x36d   :  { %8197 = vmatpush.msrb.mxu0 %v8164_v49  ;;  %v6411_v0 = vpop.f32.mrf.mxu2  ;;  %8223 = vmatpush.msrb.mxu1 %v13679_v1  ;;  %v6436_v46 = vpop.f32.mrf.mxu3  ;;  %v14303_v49 = vperm.slane %v14291_v33, 2 }
 0x36e   :  { %8246 = vmatpush.msrb.mxu2 %v8147_v36  ;;  %8277 = vmatpush.msrb.mxu3 %v13649_v3  ;;  %v6412_v20 = vadd.f32 %v6411_v0, %v6379_v52  ;;  %v14307_v0 = vperm.slane %v14291_v33, 7 }
 0x36f   :  { %8075 = vmatmul.f32.vlgmr.msra.gmra.mxu0 %v10703_v12  ;;  %8100 = vmatmul.f32.vlgmr.msra.gmra.mxu1 %v10703_v12 }
 0x370   :  { %8250 = vmatpush.msrb.mxu2 %v8153_v27  ;;  %8279 = vmatpush.msrb.mxu3 %v13660_v24  ;;  %v6194_v24 = vadd.f32 %v13684_v13, %v6167_v25 }
 0x372   :  { %8254 = vmatpush.msrb.mxu2 %v8159_v28  ;;  %8281 = vmatpush.msrb.mxu3 %v13671_v47 }
 0x374   :  { %8258 = vmatpush.msrb.mxu2 %v8165_v29  ;;  %8283 = vmatpush.msrb.mxu3 %v13679_v1  ;;  %v6596_v56 = vpop.f32.mrf.mxu0  ;;  %v6621_v54 = vpop.f32.mrf.mxu1  ;;  %v6437_v1 = vadd.f32 %v6436_v46, %v6412_v20 }
 0x375   :  { %8129 = vmatmul.f32.vlgmr.msra.gmra.mxu2 %v10817_v42  ;;  %8170 = vmatmul.f32.vlgmr.msra.gmra.mxu3 %v10703_v12  ;;  %v5982_v42 = vadd.f32 %v13600_v31, %v5952_v14 }
 0x377   :  { %8200 = vmatmul.f32.vlgmr.msrb.gmra.mxu0 %v14203_v2  ;;  %v6536_v50 = vpop.f32.mrf.mxu2  ;;  %8227 = vmatmul.f32.vlgmr.msrb.gmra.mxu1 %v10765_v8  ;;  %v6563_v3 = vpop.f32.mrf.mxu3  ;;  %v6009_v8 = vadd.f32 %v13611_v17, %v5982_v42  ;;  %v6227_v17 = vadd.f32 %v13692_v15, %v6194_v24 }
 0x378   :  { %v6537_v2 = vadd.f32 %v6536_v50, %v6507_v40 }
 0x379   :  { %v6042_v31 = vadd.f32 %v13637_v35, %v6009_v8  ;;  %v14302_v35 = vperm.slane %v14291_v33, 3  ;;  %v6252_v36 = vadd.f32 %v13701_v21, %v6227_v17 }
 0x37a   :  { %v6564_v45 = vadd.f32 %v6563_v3, %v6537_v2 }
 0x37b   :  { %v6067_v44 = vadd.f32 %v13639_v22, %v6042_v31  ;;  %v14304_v22 = vperm.slane %v14291_v33, 5  ;;  %v8309_v62 = vmul.f32 %v6252_v36, %v14305_v60 }
 0x37c   :  { %v6597_v61 = vadd.f32 %v6596_v56, %v6564_v45 }
 0x37d   :  { %8260 = vmatmul.f32.vlgmr.msrb.gmra.mxu2 %v10703_v12  ;;  %8285 = vmatmul.f32.vlgmr.msrb.gmra.mxu3 %v10703_v12  ;;  %v5882_v12 = vadd.f32 %v13552_v4, %v5857_v58  ;;  %v8308_v13 = vmul.f32 %v6067_v44, %v14302_v35  ;;  %v8310_v28 = vmul.f32 %v6437_v1, %v14304_v22  ;;  %v8341_v10 = vsub.f32 0.0, %v8309_v62 }
 0x37e   :  { %v6721_v34 = vpop.f32.mrf.mxu0  ;;  %v6748_v63 = vpop.f32.mrf.mxu1  ;;  %v6622_v7 = vadd.f32 %v6621_v54, %v6597_v61 }
 0x37f   :  { %v8307_v51 = vmul.f32 %v5882_v12, %v14303_v49  ;;  %v8340_v4 = vsub.f32 0.0, %v8308_v13  ;;  %v8342_v41 = vsub.f32 0.0, %v8310_v28  ;;  %v8402_v50 = vrot.slane %v8341_v10, 4  ;;  %v14308_v12 = vld [vmem:[#allocation13_spill] sm:$0xff] }
 0x380   :  { %v8311_v6 = vmul.f32 %v6622_v7, %v14306_v43  ;;  %v14309_v1 = vperm.slane %v14308_v12, 0  ;;  %v14310_v35 = vperm.slane %v14308_v12, 1 }
 0x381   :  { %v6650_v53 = vpop.f32.mrf.mxu2  ;;  %v6691_v47 = vpop.f32.mrf.mxu3  ;;  %v8339_v57 = vsub.f32 0.0, %v8307_v51  ;;  %v8401_v16 = vrot.slane %v8340_v4, 5  ;;  %v8403_v56 = vrot.slane %v8342_v41, 3 }
 0x382   :  { %v6692_v9 = vadd.f32 %v6691_v47, %v6650_v53  ;;  %v8343_v5 = vsub.f32 0.0, %v8311_v6 }
 0x383   :  { %v8400_v46 = vrot.slane %v8339_v57, 6  ;;  %v8436_v42 = vsel %vm8419_vm8, %v8402_v50, %v8403_v56 }
 0x384   :  { %v6722_v59 = vadd.f32 %v6721_v34, %v6692_v9  ;;  %v8404_v55 = vrot.slane %v8343_v5, 2 }
 0x385   :  { %v8434_v14 = vsel %vm8415_vm5, %v8400_v46, %v8401_v16 }
 0x386   :  { %v6749_v15 = vadd.f32 %v6748_v63, %v6722_v59  ;;  %v8435_v33 = vsel %vm8417_vm7, %v13533_v19, %v8434_v14 }
 0x388   :  { %v6835_v27 = vpop.f32.mrf.mxu0  ;;  %v6876_v37 = vpop.f32.mrf.mxu1 }
 0x389   :  { %v6877_v18 = vadd.f32 %v6876_v37, %v6835_v27 }
 0x38b   :  { %v6781_v29 = vpop.f32.mrf.mxu2  ;;  %v6806_v32 = vpop.f32.mrf.mxu3 }
 0x38c   :  { %v6782_v21 = vadd.f32 %v6781_v29, %v6749_v15 }
 0x38e   :  { %v6807_v26 = vadd.f32 %v6806_v32, %v6782_v21 }
 0x390   :  { %v8312_v48 = vmul.f32 %v6807_v26, %v14307_v0 }
 0x392   :  { %v8344_v54 = vsub.f32 0.0, %v8312_v48  ;;  %v6966_v11 = vpop.f32.mrf.mxu0  ;;  %v6991_v8 = vpop.f32.mrf.mxu1 }
 0x394   :  { %v8405_v39 = vrot.slane %v8344_v54, 1 }
 0x395   :  { %v6906_v3 = vpop.f32.mrf.mxu2  ;;  %v6933_v25 = vpop.f32.mrf.mxu3 }
 0x396   :  { %v8437_v23 = vsel %vm8421_vm9, %v8404_v55, %v8405_v39  ;;  %v6907_v40 = vadd.f32 %v6906_v3, %v6877_v18 }
 0x397   :  { %v8438_v30 = vsel %vm8423_vm10, %v8436_v42, %v8437_v23 }
 0x398   :  { %v8439_v2 = vsel %vm2060_vm3, %v8435_v33, %v8438_v30  ;;  %v6934_v38 = vadd.f32 %v6933_v25, %v6907_v40 }
 0x399   :  { %8453 = vst [vmem:[#allocation4 + $0x10] sm:$0xff] %v8439_v2 }
 0x39a   :  { %v6967_v34 = vadd.f32 %v6966_v11, %v6934_v38 }
 0x39c   :  { %v6992_v63 = vadd.f32 %v6991_v8, %v6967_v34  ;;  %v7091_v24 = vpop.f32.mrf.mxu0  ;;  %v7118_v53 = vpop.f32.mrf.mxu1 }
 0x39e   :  { %v8313_v59 = vmul.f32 %v6992_v63, %v14309_v1 }
 0x39f   :  { %v7020_v31 = vpop.f32.mrf.mxu2  ;;  %v7061_v52 = vpop.f32.mrf.mxu3 }
 0x3a0   :  { %v7062_v45 = vadd.f32 %v7061_v52, %v7020_v31  ;;  %v8345_v7 = vsub.f32 0.0, %v8313_v59 }
 0x3a2   :  { %v7092_v58 = vadd.f32 %v7091_v24, %v7062_v45 }
 0x3a4   :  { %v7119_v20 = vadd.f32 %v7118_v53, %v7092_v58 }
 0x3a6   :  { %v7205_v9 = vpop.f32.mrf.mxu0  ;;  %v7246_v61 = vpop.f32.mrf.mxu1 }
 0x3a7   :  { %v7247_v14 = vadd.f32 %v7246_v61, %v7205_v9 }
 0x3a9   :  { %v7151_v47 = vpop.f32.mrf.mxu2  ;;  %v7176_v19 = vpop.f32.mrf.mxu3 }
 0x3aa   :  { %v7152_v44 = vadd.f32 %v7151_v47, %v7119_v20 }
 0x3ac   :  { %v7177_v17 = vadd.f32 %v7176_v19, %v7152_v44 }
 0x3ae   :  { %v8314_v13 = vmul.f32 %v7177_v17, %v14310_v35  ;;  %v14311_v35 = vperm.slane %v14308_v12, 3 }
 0x3b0   :  { %v8346_v36 = vsub.f32 0.0, %v8314_v13  ;;  %v7336_v49 = vpop.f32.mrf.mxu0  ;;  %v7361_v28 = vpop.f32.mrf.mxu1 }
 0x3b2   :  { %v8406_v27 = vrot.slane %v8346_v36, 7 }
 0x3b3   :  { %v7276_v37 = vpop.f32.mrf.mxu2  ;;  %v7303_v22 = vpop.f32.mrf.mxu3 }
 0x3b4   :  { %v13792_v51 = vsel %vm8413_vm6, %v8345_v7, %v8406_v27  ;;  %v7277_v55 = vadd.f32 %v7276_v37, %v7247_v14  ;;  %v14312_v27 = vperm.slane %v14308_v12, 2 }
 0x3b6   :  { %v7304_v38 = vadd.f32 %v7303_v22, %v7277_v55 }
 0x3b8   :  { %v7337_v52 = vadd.f32 %v7336_v49, %v7304_v38  ;;  %v14313_v49 = vperm.slane %v14308_v12, 5 }
 0x3ba   :  { %v7461_v18 = vpop.f32.mrf.mxu0  ;;  %v7488_v4 = vpop.f32.mrf.mxu1  ;;  %v7362_v17 = vadd.f32 %v7361_v28, %v7337_v52 }
 0x3bc   :  { %v8315_v37 = vmul.f32 %v7362_v17, %v14312_v27 }
 0x3bd   :  { %v7390_v15 = vpop.f32.mrf.mxu2  ;;  %v7431_v29 = vpop.f32.mrf.mxu3 }
 0x3be   :  { %v7432_v54 = vadd.f32 %v7431_v29, %v7390_v15 }
 0x3c0   :  { %v7462_v39 = vadd.f32 %v7461_v18, %v7432_v54 }
 0x3c2   :  { %v7489_v8 = vadd.f32 %v7488_v4, %v7462_v39  ;;  %v14314_v4 = vperm.slane %v14308_v12, 4 }
 0x3c4   :  { %v7575_v62 = vpop.f32.mrf.mxu0  ;;  %v7616_v6 = vpop.f32.mrf.mxu1 }
 0x3c5   :  { %v7617_v3 = vadd.f32 %v7616_v6, %v7575_v62 }
 0x3c7   :  { %v7521_v60 = vpop.f32.mrf.mxu2  ;;  %v7546_v43 = vpop.f32.mrf.mxu3 }
 0x3c8   :  { %v7522_v34 = vadd.f32 %v7521_v60, %v7489_v8  ;;  %v14315_v60 = vperm.slane %v14308_v12, 6 }
 0x3ca   :  { %v7547_v58 = vadd.f32 %v7546_v43, %v7522_v34 }
 0x3cc   :  { %v8316_v13 = vmul.f32 %v7547_v58, %v14311_v35 }
 0x3ce   :  { %v7706_v32 = vpop.f32.mrf.mxu0  ;;  %v7731_v41 = vpop.f32.mrf.mxu1  ;;  %v8348_v29 = vsub.f32 0.0, %v8316_v13 }
 0x3d1   :  { %v7646_v21 = vpop.f32.mrf.mxu2  ;;  %v7673_v57 = vpop.f32.mrf.mxu3 }
 0x3d2   :  { %v7647_v25 = vadd.f32 %v7646_v21, %v7617_v3  ;;  %v8347_v21 = vsub.f32 0.0, %v8315_v37 }
 0x3d4   :  { %v7674_v63 = vadd.f32 %v7673_v57, %v7647_v25 }
 0x3d6   :  { %v7707_v20 = vadd.f32 %v7706_v32, %v7674_v63 }
 0x3d8   :  { %v7831_v16 = vpop.f32.mrf.mxu0  ;;  %v7858_v5 = vpop.f32.mrf.mxu1  ;;  %v7732_v36 = vadd.f32 %v7731_v41, %v7707_v20  ;;  %v8408_v41 = vrot.slane %v8348_v29, 5 }
 0x3da   :  { %v8317_v28 = vmul.f32 %v7732_v36, %v14314_v4 }
 0x3db   :  { %v7760_v26 = vpop.f32.mrf.mxu2  ;;  %v7801_v10 = vpop.f32.mrf.mxu3 }
 0x3dc   :  { %v7802_v50 = vadd.f32 %v7801_v10, %v7760_v26  ;;  %v8349_v26 = vsub.f32 0.0, %v8317_v28  ;;  %v14316_v10 = vperm.slane %v14308_v12, 7 }
 0x3de   :  { %v7832_v33 = vadd.f32 %v7831_v16, %v7802_v50  ;;  %v8409_v54 = vrot.slane %v8349_v26, 4 }
 0x3e0   :  { %v7859_v31 = vadd.f32 %v7858_v5, %v7832_v33 }
 0x3e2   :  { %v7945_v48 = vpop.f32.mrf.mxu0  ;;  %v7986_v56 = vpop.f32.mrf.mxu1 }
 0x3e3   :  { %v7987_v11 = vadd.f32 %v7986_v56, %v7945_v48 }
 0x3e5   :  { %v7891_v0 = vpop.f32.mrf.mxu2  ;;  %v7916_v46 = vpop.f32.mrf.mxu3 }
 0x3e6   :  { %v7892_v45 = vadd.f32 %v7891_v0, %v7859_v31  ;;  %v8407_v0 = vrot.slane %v8347_v21, 6 }
 0x3e8   :  { %v7917_v61 = vadd.f32 %v7916_v46, %v7892_v45  ;;  %v8441_v56 = vsel %vm8415_vm5, %v8407_v0, %v8408_v41 }
 0x3e9   :  { %v8442_v3 = vsel %vm8417_vm7, %v13792_v51, %v8441_v56 }
 0x3ea   :  { %v8318_v22 = vmul.f32 %v7917_v61, %v14313_v49 }
 0x3ec   :  { %v8076_v23 = vpop.f32.mrf.mxu0  ;;  %v8101_v2 = vpop.f32.mrf.mxu1  ;;  %v8350_v32 = vsub.f32 0.0, %v8318_v22 }
 0x3ee   :  { %v8410_v48 = vrot.slane %v8350_v32, 3 }
 0x3ef   :  { %v8016_v42 = vpop.f32.mrf.mxu2  ;;  %v8043_v40 = vpop.f32.mrf.mxu3 }
 0x3f0   :  { %v8017_v30 = vadd.f32 %v8016_v42, %v7987_v11  ;;  %v8443_v55 = vsel %vm8419_vm8, %v8409_v54, %v8410_v48 }
 0x3f2   :  { %v8044_v24 = vadd.f32 %v8043_v40, %v8017_v30 }
 0x3f4   :  { %v8077_v47 = vadd.f32 %v8076_v23, %v8044_v24  ;;  %v8201_v44 = vpop.f32.mrf.mxu0  ;;  %v8228_v59 = vpop.f32.mrf.mxu1 }
 0x3f6   :  { %v8102_v7 = vadd.f32 %v8101_v2, %v8077_v47 }
 0x3f8   :  { %v8130_v53 = vpop.f32.mrf.mxu2  ;;  %v8171_v9 = vpop.f32.mrf.mxu3  ;;  %v8319_v62 = vmul.f32 %v8102_v7, %v14315_v60 }
 0x3f9   :  { %v8172_v19 = vadd.f32 %v8171_v9, %v8130_v53 }
 0x3fa   :  { %v8351_v16 = vsub.f32 0.0, %v8319_v62 }
 0x3fb   :  { %v8202_v1 = vadd.f32 %v8201_v44, %v8172_v19 }
 0x3fc   :  { %v8411_v14 = vrot.slane %v8351_v16, 2 }
 0x3fd   :  { %v8229_v15 = vadd.f32 %v8228_v59, %v8202_v1 }
 0x400   :  { %v8261_v18 = vpop.f32.mrf.mxu2  ;;  %v8286_v6 = vpop.f32.mrf.mxu3 }
 0x401   :  { %v8262_v43 = vadd.f32 %v8261_v18, %v8229_v15 }
 0x403   :  { %v8287_v57 = vadd.f32 %v8286_v6, %v8262_v43 }
 0x405   :  { %v8320_v5 = vmul.f32 %v8287_v57, %v14316_v10 }
 0x407   :  { %v8352_v46 = vsub.f32 0.0, %v8320_v5 }
 0x409   :  { %v8412_v50 = vrot.slane %v8352_v46, 1 }
 0x40b   :  { %v8444_v39 = vsel %vm8421_vm9, %v8411_v14, %v8412_v50 }
 0x40c   :  { %v8445_v11 = vsel %vm8423_vm10, %v8443_v55, %v8444_v39 }
 0x40d   :  { %v8446_v12 = vsel %vm2060_vm3, %v8442_v3, %v8445_v11 }
 0x40e   :  { %8454 = vst [vmem:[#allocation4 + $0x18] sm:$0xff] %v8446_v12 }
 0x40f   :  { %8879 = vsyncadd [#allocation3], 1984  ;;  %s8883_s10 = sshll.u32 %s13829_s7, 4  ;;  %s9455_s11 = smov [#allocation2]   ;;  %s8884_s10 = int_to_ptr.hbm [resolvable:$true] %s8883_s10 }
 0x410   :  { %s8881_s12 = sshll.u32 %s9455_s11, 4  ;;  %s8882_s12 = int_to_ptr.vmem [resolvable:$true] %s8881_s12 }
 0x411   :  { %8886 = dma.vmem_to_hbm [thread:$0]  %s8882_s12, 64, %s8884_s10, [#allocation3]  }
 0x412   :  { %8890 = vsyncadd [#allocation5], 496  ;;  %s8894_s15 = sshll.u32 %s13830_s8, 4  ;;  %s9456_s16 = smov [#allocation4]   ;;  %s8895_s15 = int_to_ptr.hbm [resolvable:$true] %s8894_s15 }
 0x413   :  { %s8892_s17 = sshll.u32 %s9456_s16, 4  ;;  %s9457_s18 = smov [#allocation6]   ;;  %s8893_s17 = int_to_ptr.vmem [resolvable:$true] %s8892_s17 }
 0x414   :  { %8897 = dma.vmem_to_hbm [thread:$0]  %s8893_s17, 16, %s8895_s15, [#allocation5]  }
 0x415   :  { %s8903_s19 = sshll.u32 %s9457_s18, 4  ;;  %s8905_s7 = sshll.u32 %s13831_s9, 4  ;;  %s8904_s19 = int_to_ptr.vmem [resolvable:$true] %s8903_s19  ;;  %s8906_s7 = int_to_ptr.hbm [resolvable:$true] %s8905_s7 }
 0x416   :  { %8908 = dma.vmem_to_hbm [thread:$0]  %s8904_s19, 16, %s8906_s7, [#allocation5]  }
 0x417   :  { %9450 = dma.done.wait [#allocation3], 2048  }
 0x418   :  { %9451 = vsyncadd [#allocation3], 4294965248 }
 0x419   :  { %9452 = dma.done.wait [#allocation5], 528  }
 0x41a   :  { %9453 = vsyncadd [#allocation5], 4294966768 }
 0x41b   :  { %8921 = vsyncpa [#allocation3], 1 }
 0x41c   :  { %8922 = vsyncpa [#allocation5], 1 }

</bundles_post_ra>
